<compile_context>
chip_gen: v7x
topology: tpu7x:2x2x1
jax: 0.10.0
libtpu: 0.0.40
codegen_flags: <defaults>
</compile_context>

<pallas_src>
import functools

import jax
import jax.numpy as jnp
from jax import lax
from jax.experimental import pallas as pl
from jax.experimental.pallas import tpu as pltpu

LRELU_SLOPE = 0.05
BN_EPS = 1e-5
VMEM_LIMIT = 32 * 1024 * 1024      # fits scoped VMEM on v5e / v6e / v7x


# ----------------------------------------------------------------------------
# Pallas kernels (single K step: the whole padded K dimension is one block)
# ----------------------------------------------------------------------------
def mm_bias_kernel(a_ref, b_ref, bias_ref, o_ref, *, apply_lrelu, slope):
    """o = A @ B + bias, optionally followed by leaky_relu.

    A/B tiles are bf16 (native MXU dtype); accumulation & epilogue in f32.
    """
    y = jnp.dot(a_ref[...], b_ref[...], preferred_element_type=jnp.float32)
    y = y + bias_ref[...]                       # (tm, tn) + (1, tn)
    if apply_lrelu:
        y = jnp.where(y >= 0, y, y * slope)
    o_ref[...] = y.astype(o_ref.dtype)


def mm_bias_bn_lrelu_kernel(a_ref, b_ref, bias_ref, gamma_ref, beta_ref, o_ref,
                            *, slope, eps, m_real):
    """o = leaky_relu(BatchNorm(A @ B + bias)) with training-mode batch stats.

    Requires the full M in a single block (grid is over N only), so the
    per-channel mean/var are complete.  Statistics are restricted to the
    m_real valid rows in case M was padded (padded rows hold only the bias).
    """
    y = jnp.dot(a_ref[...], b_ref[...], preferred_element_type=jnp.float32)
    y = y + bias_ref[...]
    if m_real == y.shape[0]:
        mean = jnp.mean(y, axis=0, keepdims=True)
        var = jnp.mean((y - mean) ** 2, axis=0, keepdims=True)   # biased var
    else:
        valid = lax.broadcasted_iota(jnp.int32, y.shape, 0) < m_real
        cnt = jnp.float32(m_real)
        mean = jnp.sum(jnp.where(valid, y, 0.0), axis=0, keepdims=True) / cnt
        var = jnp.sum(jnp.where(valid, (y - mean) ** 2, 0.0),
                      axis=0, keepdims=True) / cnt
    y = (y - mean) * lax.rsqrt(var + eps) * gamma_ref[...] + beta_ref[...]
    o_ref[...] = jnp.where(y >= 0, y, y * slope).astype(o_ref.dtype)


# ----------------------------------------------------------------------------
# Wrappers
# ----------------------------------------------------------------------------
def _round_up(x, m):
    return ((x + m - 1) // m) * m


def _pad2d(x, rows, cols):
    r, c = x.shape
    if r == rows and c == cols:
        return x
    return jnp.pad(x, ((0, rows - r), (0, cols - c)))


def conv_matmul(a, b, bias, *, gamma=None, beta=None, apply_lrelu=False,
                slope=LRELU_SLOPE, eps=BN_EPS):
    """(M, K) @ (K, N) + bias[N] with fused activation / BatchNorm epilogue.

    a, b are cast to bf16; accumulation and the epilogue run in f32.
    K is one full block (no reduction grid axis).
    """
    M, K = a.shape
    _, N = b.shape
    fuse_bn = gamma is not None

    Kp = _round_up(K, 128)
    tn = min(256, _round_up(N, 128))
    Np = _round_up(N, tn)
    if fuse_bn:
        # Whole M in one block so batch statistics see every row.
        # NOTE: for much larger batch/spatial this block must be re-tiled over
        # M with partial-sum stats (v7x has only 64 MiB physical VMEM).
        tm = Mp = _round_up(M, 16)
    else:
        tm = min(128, _round_up(M, 16))
        Mp = _round_up(M, tm)

    ap = _pad2d(a.astype(jnp.bfloat16), Mp, Kp)
    bp = _pad2d(b.astype(jnp.bfloat16), Kp, Np)
    biasp = _pad2d(bias.astype(jnp.float32).reshape(1, -1), 1, Np)

    if fuse_bn:
        gammap = _pad2d(gamma.astype(jnp.float32).reshape(1, -1), 1, Np)
        betap = _pad2d(beta.astype(jnp.float32).reshape(1, -1), 1, Np)
        out = pl.pallas_call(
            functools.partial(mm_bias_bn_lrelu_kernel,
                              slope=slope, eps=eps, m_real=M),
            out_shape=jax.ShapeDtypeStruct((Mp, Np), jnp.float32),
            grid_spec=pltpu.PrefetchScalarGridSpec(
                num_scalar_prefetch=0,
                grid=(Np // tn,),
                in_specs=[
                    pl.BlockSpec((Mp, Kp), lambda j: (0, 0)),
                    pl.BlockSpec((Kp, tn), lambda j: (0, j)),
                    pl.BlockSpec((1, tn), lambda j: (0, j)),
                    pl.BlockSpec((1, tn), lambda j: (0, j)),
                    pl.BlockSpec((1, tn), lambda j: (0, j)),
                ],
                out_specs=pl.BlockSpec((Mp, tn), lambda j: (0, j)),
            ),
            compiler_params=pltpu.CompilerParams(
                dimension_semantics=("parallel",),
                vmem_limit_bytes=VMEM_LIMIT),
        )(ap, bp, biasp, gammap, betap)
    else:
        out = pl.pallas_call(
            functools.partial(mm_bias_kernel,
                              apply_lrelu=apply_lrelu, slope=slope),
            out_shape=jax.ShapeDtypeStruct((Mp, Np), jnp.float32),
            grid_spec=pltpu.PrefetchScalarGridSpec(
                num_scalar_prefetch=0,
                grid=(Mp // tm, Np // tn),
                in_specs=[
                    pl.BlockSpec((tm, Kp), lambda i, j: (i, 0)),
                    pl.BlockSpec((Kp, tn), lambda i, j: (0, j)),
                    pl.BlockSpec((1, tn), lambda i, j: (0, j)),
                ],
                out_specs=pl.BlockSpec((tm, tn), lambda i, j: (i, j)),
            ),
            compiler_params=pltpu.CompilerParams(
                dimension_semantics=("parallel", "parallel"),
                vmem_limit_bytes=VMEM_LIMIT),
        )(ap, bp, biasp)
    return out[:M, :N]


def im2col(x_nhwc, kh, kw, stride, pad):
    """Extract conv patches.  Returns (N*OH*OW, KH*KW*C) and (N, OH, OW)."""
    x = jnp.pad(x_nhwc, ((0, 0), (pad, pad), (pad, pad), (0, 0)))
    n, h, w, c = x.shape
    oh = (h - kh) // stride + 1
    ow = (w - kw) // stride + 1
    cols = []
    for i in range(kh):
        for j in range(kw):
            cols.append(x[:, i:i + stride * oh:stride,
                          j:j + stride * ow:stride, :])
    patches = jnp.stack(cols, axis=-2)              # (N, OH, OW, KH*KW, C)
    return patches.reshape(n * oh * ow, kh * kw * c), (n, oh, ow)


def conv2d_pallas(x_nhwc, w_oihw, bias, *, stride, pad, apply_lrelu=False,
                  gamma=None, beta=None):
    """Conv2d (PyTorch OIHW weights) via im2col + fused Pallas matmul.

    Returns NHWC output.  If gamma/beta given: fused BN(batch stats)+lrelu.
    """
    oc, ic, kh, kw = w_oihw.shape
    patches, (n, oh, ow) = im2col(x_nhwc, kh, kw, stride, pad)
    # Weight reordered to match patch layout: (KH, KW, IC) with IC fastest.
    w_mat = jnp.transpose(w_oihw, (2, 3, 1, 0)).reshape(kh * kw * ic, oc)
    out = conv_matmul(patches, w_mat, bias,
                      gamma=gamma, beta=beta, apply_lrelu=apply_lrelu)
    return out.reshape(n, oh, ow, oc)


# ----------------------------------------------------------------------------
# Parameter init (deterministic, PyTorch-default-style fan_in uniform)
# ----------------------------------------------------------------------------
def init_conv(key, oc, ic, kh, kw):
    k = 1.0 / jnp.sqrt(jnp.float32(ic * kh * kw))
    kw_key, kb_key = jax.random.split(key)
    w = jax.random.uniform(kw_key, (oc, ic, kh, kw), jnp.float32, -k, k)
    b = jax.random.uniform(kb_key, (oc,), jnp.float32, -k, k)
    return w, b


def init_params(conv_dim=64):
    keys = jax.random.split(jax.random.PRNGKey(42), 4)
    p = {}
    p["w1"], p["b1"] = init_conv(keys[0], conv_dim, 1, 4, 4)          # Dx: 1 in-channel
    p["w2"], p["b2"] = init_conv(keys[1], conv_dim * 2, conv_dim, 4, 4)
    p["w3"], p["b3"] = init_conv(keys[2], conv_dim * 4, conv_dim * 2, 4, 4)
    p["wf"], p["bf"] = init_conv(keys[3], 11, conv_dim * 4, 4, 4)
    # BatchNorm defaults: weight=1, bias=0.
    p["g2"] = jnp.ones((conv_dim * 2,), jnp.float32)
    p["be2"] = jnp.zeros((conv_dim * 2,), jnp.float32)
    p["g3"] = jnp.ones((conv_dim * 4,), jnp.float32)
    p["be3"] = jnp.zeros((conv_dim * 4,), jnp.float32)
    return p


# ----------------------------------------------------------------------------
# Full Dx forward
# ----------------------------------------------------------------------------
def dx_forward(x_nchw, p):
    x = jnp.transpose(x_nchw, (0, 2, 3, 1))          # NCHW -> NHWC

    # cnn1: Conv(1, 64, 4, 2, 1, bn=False) + leaky_relu (fused epilogue)
    x = conv2d_pallas(x, p["w1"], p["b1"], stride=2, pad=1, apply_lrelu=True)

    # cnn2: Conv(64, 128, 4, 2, 1) + BN + leaky_relu (all fused)
    x = conv2d_pallas(x, p["w2"], p["b2"], stride=2, pad=1,
                      gamma=p["g2"], beta=p["be2"])

    # cnn3: Conv(128, 256, 4, 2, 1) + BN + leaky_relu (all fused)
    x = conv2d_pallas(x, p["w3"], p["b3"], stride=2, pad=1,
                      gamma=p["g3"], beta=p["be3"])

    # fc: Conv(256, 11, 4, 1, 0, bn=False), no activation, then squeeze
    x = conv2d_pallas(x, p["wf"], p["bf"], stride=1, pad=0)
    n, oh, ow, oc = x.shape
    # spatial is 1x1 here, so (N, 1*1*11) == PyTorch .squeeze() result (N, 11)
    return x.reshape(n, oh * ow * oc)


# ----------------------------------------------------------------------------
# Pure-JAX references (numeric verification)
# ----------------------------------------------------------------------------
def conv_ref(x, w, b, stride, pad, bf16_ops):
    lhs, rhs = x, w
    if bf16_ops:
        lhs = lhs.astype(jnp.bfloat16)
        rhs = rhs.astype(jnp.bfloat16)
    y = lax.conv_general_dilated(
        lhs, rhs, (stride, stride), [(pad, pad), (pad, pad)],
        dimension_numbers=("NCHW", "OIHW", "NCHW"),
        preferred_element_type=jnp.float32,
        precision=lax.Precision.HIGHEST)
    return y + b.reshape(1, -1, 1, 1)


def bn_ref(x, gamma, beta):
    mean = jnp.mean(x, axis=(0, 2, 3), keepdims=True)
    var = jnp.mean((x - mean) ** 2, axis=(0, 2, 3), keepdims=True)
    return ((x - mean) * lax.rsqrt(var + BN_EPS)
            * gamma.reshape(1, -1, 1, 1) + beta.reshape(1, -1, 1, 1))


def lrelu_ref(x):
    return jnp.where(x >= 0, x, x * LRELU_SLOPE)


def dx_ref(x, p, *, bf16_ops):
    o = lrelu_ref(conv_ref(x, p["w1"], p["b1"], 2, 1, bf16_ops))
    o = lrelu_ref(bn_ref(conv_ref(o, p["w2"], p["b2"], 2, 1, bf16_ops),
                         p["g2"], p["be2"]))
    o = lrelu_ref(bn_ref(conv_ref(o, p["w3"], p["b3"], 2, 1, bf16_ops),
                         p["g3"], p["be3"]))
    o = conv_ref(o, p["wf"], p["bf"], 1, 0, bf16_ops)
    return jnp.squeeze(o)


# ----------------------------------------------------------------------------
if __name__ == "__main__":
    # Smallest valid spatial size: 32x32 -> 16 -> 8 -> 4 -> 1x1 after fc conv.
    x = jax.random.normal(jax.random.PRNGKey(0), (2, 1, 32, 32), jnp.float32)
    params = init_params(conv_dim=64)

    out = jax.block_until_ready(jax.jit(dx_forward)(x, params))
    assert out.shape == (2, 11), out.shape

    # Tight check against a reference using the same bf16 matmul operands
    # (validates the kernel math: conv, bias, BN batch stats, leaky_relu).
    ref16 = jax.block_until_ready(dx_ref(x, params, bf16_ops=True))
    err16 = float(jnp.max(jnp.abs(out - ref16)))
    assert jnp.allclose(out, ref16, atol=2e-3, rtol=2e-3), err16

    # Looser sanity check against the full-f32 PyTorch-equivalent reference
    # (difference is only bf16 operand rounding on the MXU path).
    ref32 = jax.block_until_ready(dx_ref(x, params, bf16_ops=False))
    err32 = float(jnp.max(jnp.abs(out - ref32)))
    assert jnp.allclose(out, ref32, atol=1e-1, rtol=1e-1), err32

    print("KERNEL_OK")
</pallas_src>

<mosaic_0001>
module attributes {stable_mosaic.version = 11 : i64} {
  func.func @mm_bias_kernel(%arg0: i32, %arg1: i32, %arg2: memref<128x128xbf16, #tpu.memory_space<vmem>>, %arg3: memref<128x128xbf16, #tpu.memory_space<vmem>>, %arg4: memref<1x128xf32, #tpu.memory_space<vmem>>, %arg5: memref<128x128xf32, #tpu.memory_space<vmem>>) attributes {dimension_semantics = [#tpu.dimension_semantics<parallel>, #tpu.dimension_semantics<parallel>], iteration_bounds = array<i64: 4, 1>, scalar_prefetch = 0 : i64, scratch_operands = 0 : i64, tpu.core_type = #tpu.core_type<tc>, window_params = [{transform_indices = @transform_0, window_bounds = array<i64: 128, 128>}, {transform_indices = @transform_1, window_bounds = array<i64: 128, 128>}, {transform_indices = @transform_2, window_bounds = array<i64: 1, 128>}, {transform_indices = @transform_3, window_bounds = array<i64: 128, 128>}]} {
    %c0 = arith.constant 0 : index
    %c0_0 = arith.constant 0 : index
    %0 = vector.load %arg2[%c0, %c0_0] : memref<128x128xbf16, #tpu.memory_space<vmem>>, vector<128x128xbf16>
    %c0_1 = arith.constant 0 : index
    %c0_2 = arith.constant 0 : index
    %1 = vector.load %arg3[%c0_1, %c0_2] : memref<128x128xbf16, #tpu.memory_space<vmem>>, vector<128x128xbf16>
    %cst = arith.constant dense<0.000000e+00> : vector<128x128xf32>
    %2 = tpu.matmul %0, %1, %cst {dimension_numbers = #tpu.dot_dimension_numbers<[1], [0], [0], [1], [0, 0, 1, 1], [], []>} : vector<128x128xbf16>, vector<128x128xbf16>, vector<128x128xf32> -> vector<128x128xf32>
    %c0_3 = arith.constant 0 : index
    %c0_4 = arith.constant 0 : index
    %3 = vector.load %arg4[%c0_3, %c0_4] : memref<1x128xf32, #tpu.memory_space<vmem>>, vector<1x128xf32>
    %4 = vector.broadcast %3 : vector<1x128xf32> to vector<128x128xf32>
    %5 = arith.addf %2, %4 : vector<128x128xf32>
    %cst_5 = arith.constant 0.000000e+00 : f32
    %6 = vector.broadcast %cst_5 : f32 to vector<128x128xf32>
    %7 = arith.cmpf oge, %5, %6 : vector<128x128xf32>
    %cst_6 = arith.constant 5.000000e-02 : f32
    %8 = vector.broadcast %cst_6 : f32 to vector<128x128xf32>
    %9 = arith.mulf %5, %8 : vector<128x128xf32>
    %10 = arith.select %7, %5, %9 : vector<128x128xi1>, vector<128x128xf32>
    %c0_7 = arith.constant 0 : index
    %c0_8 = arith.constant 0 : index
    %11 = vector.load %arg5[%c0_7, %c0_8] : memref<128x128xf32, #tpu.memory_space<vmem>>, vector<128x128xf32>
    tpu.vector_store %arg5[%c0_7, %c0_8], %10 {strides = array<i32>} : memref<128x128xf32, #tpu.memory_space<vmem>>, vector<128x128xf32>,
    return
  }
  func.func @transform_0(%arg0: i32, %arg1: i32) -> (i32, i32) {
    %c0_i32 = arith.constant 0 : i32
    %c0_i32_0 = arith.constant 0 : i32
    return %arg0, %c0_i32 : i32, i32
  }
  func.func @transform_1(%arg0: i32, %arg1: i32) -> (i32, i32) {
    %c0_i32 = arith.constant 0 : i32
    %c0_i32_0 = arith.constant 0 : i32
    return %c0_i32, %arg1 : i32, i32
  }
  func.func @transform_2(%arg0: i32, %arg1: i32) -> (i32, i32) {
    %c0_i32 = arith.constant 0 : i32
    %c0_i32_0 = arith.constant 0 : i32
    return %c0_i32, %arg1 : i32, i32
  }
  func.func @transform_3(%arg0: i32, %arg1: i32) -> (i32, i32) {
    %c0_i32 = arith.constant 0 : i32
    return %arg0, %arg1 : i32, i32
  }
}

module attributes {stable_mosaic.version = 11 : i64} {
  func.func @mm_bias_bn_lrelu_kernel(%arg0: i32, %arg1: memref<128x1024xbf16, #tpu.memory_space<vmem>>, %arg2: memref<1024x128xbf16, #tpu.memory_space<vmem>>, %arg3: memref<1x128xf32, #tpu.memory_space<vmem>>, %arg4: memref<1x128xf32, #tpu.memory_space<vmem>>, %arg5: memref<1x128xf32, #tpu.memory_space<vmem>>, %arg6: memref<128x128xf32, #tpu.memory_space<vmem>>) attributes {dimension_semantics = [#tpu.dimension_semantics<parallel>], iteration_bounds = array<i64: 1>, scalar_prefetch = 0 : i64, scratch_operands = 0 : i64, tpu.core_type = #tpu.core_type<tc>, window_params = [{pipeline_mode = #tpu.pipeline_mode<synchronous>, transform_indices = @transform_0, window_bounds = array<i64: 128, 1024>}, {transform_indices = @transform_1, window_bounds = array<i64: 1024, 128>}, {transform_indices = @transform_2, window_bounds = array<i64: 1, 128>}, {transform_indices = @transform_3, window_bounds = array<i64: 1, 128>}, {transform_indices = @transform_4, window_bounds = array<i64: 1, 128>}, {transform_indices = @transform_5, window_bounds = array<i64: 128, 128>}]} {
    %c0 = arith.constant 0 : index
    %c0_0 = arith.constant 0 : index
    %0 = vector.load %arg1[%c0, %c0_0] : memref<128x1024xbf16, #tpu.memory_space<vmem>>, vector<128x1024xbf16>
    %c0_1 = arith.constant 0 : index
    %c0_2 = arith.constant 0 : index
    %1 = vector.load %arg2[%c0_1, %c0_2] : memref<1024x128xbf16, #tpu.memory_space<vmem>>, vector<1024x128xbf16>
    %cst = arith.constant dense<0.000000e+00> : vector<128x128xf32>
    %2 = tpu.matmul %0, %1, %cst {dimension_numbers = #tpu.dot_dimension_numbers<[1], [0], [0], [1], [0, 0, 1, 1], [], []>} : vector<128x1024xbf16>, vector<1024x128xbf16>, vector<128x128xf32> -> vector<128x128xf32>
    %c0_3 = arith.constant 0 : index
    %c0_4 = arith.constant 0 : index
    %3 = vector.load %arg3[%c0_3, %c0_4] : memref<1x128xf32, #tpu.memory_space<vmem>>, vector<1x128xf32>
    %4 = vector.broadcast %3 : vector<1x128xf32> to vector<128x128xf32>
    %5 = arith.addf %2, %4 : vector<128x128xf32>
    %cst_5 = arith.constant dense<0.000000e+00> : vector<128xf32>
    %6 = vector.multi_reduction <add>, %5, %cst_5 [0] : vector<128x128xf32> to vector<128xf32>
    %7 = vector.shape_cast %6 : vector<128xf32> to vector<1x128xf32>
    %cst_6 = arith.constant 1.280000e+02 : f32
    %8 = vector.broadcast %cst_6 : f32 to vector<1x128xf32>
    %9 = arith.divf %7, %8 : vector<1x128xf32>
    %10 = vector.broadcast %9 : vector<1x128xf32> to vector<128x128xf32>
    %11 = arith.subf %5, %10 : vector<128x128xf32>
    %12 = arith.mulf %11, %11 : vector<128x128xf32>
    %cst_7 = arith.constant dense<0.000000e+00> : vector<128xf32>
    %13 = vector.multi_reduction <add>, %12, %cst_7 [0] : vector<128x128xf32> to vector<128xf32>
    %14 = vector.shape_cast %13 : vector<128xf32> to vector<1x128xf32>
    %cst_8 = arith.constant 1.280000e+02 : f32
    %15 = vector.broadcast %cst_8 : f32 to vector<1x128xf32>
    %16 = arith.divf %14, %15 : vector<1x128xf32>
    %17 = vector.broadcast %9 : vector<1x128xf32> to vector<128x128xf32>
    %18 = arith.subf %5, %17 : vector<128x128xf32>
    %cst_9 = arith.constant 9.99999974E-6 : f32
    %19 = vector.broadcast %cst_9 : f32 to vector<1x128xf32>
    %20 = arith.addf %16, %19 : vector<1x128xf32>
    %21 = math.rsqrt %20 : vector<1x128xf32>
    %22 = vector.broadcast %21 : vector<1x128xf32> to vector<128x128xf32>
    %23 = arith.mulf %18, %22 : vector<128x128xf32>
    %c0_10 = arith.constant 0 : index
    %c0_11 = arith.constant 0 : index
    %24 = vector.load %arg4[%c0_10, %c0_11] : memref<1x128xf32, #tpu.memory_space<vmem>>, vector<1x128xf32>
    %25 = vector.broadcast %24 : vector<1x128xf32> to vector<128x128xf32>
    %26 = arith.mulf %23, %25 : vector<128x128xf32>
    %c0_12 = arith.constant 0 : index
    %c0_13 = arith.constant 0 : index
    %27 = vector.load %arg5[%c0_12, %c0_13] : memref<1x128xf32, #tpu.memory_space<vmem>>, vector<1x128xf32>
    %28 = vector.broadcast %27 : vector<1x128xf32> to vector<128x128xf32>
    %29 = arith.addf %26, %28 : vector<128x128xf32>
    %cst_14 = arith.constant 0.000000e+00 : f32
    %30 = vector.broadcast %cst_14 : f32 to vector<128x128xf32>
    %31 = arith.cmpf oge, %29, %30 : vector<128x128xf32>
    %cst_15 = arith.constant 5.000000e-02 : f32
    %32 = vector.broadcast %cst_15 : f32 to vector<128x128xf32>
    %33 = arith.mulf %29, %32 : vector<128x128xf32>
    %34 = arith.select %31, %29, %33 : vector<128x128xi1>, vector<128x128xf32>
    %c0_16 = arith.constant 0 : index
    %c0_17 = arith.constant 0 : index
    %35 = vector.load %arg6[%c0_16, %c0_17] : memref<128x128xf32, #tpu.memory_space<vmem>>, vector<128x128xf32>
    tpu.vector_store %arg6[%c0_16, %c0_17], %34 {strides = array<i32>} : memref<128x128xf32, #tpu.memory_space<vmem>>, vector<128x128xf32>,
    return
  }
  func.func @transform_0(%arg0: i32) -> (i32, i32) {
    %c0_i32 = arith.constant 0 : i32
    %c0_i32_0 = arith.constant 0 : i32
    %c0_i32_1 = arith.constant 0 : i32
    return %c0_i32, %c0_i32_0 : i32, i32
  }
  func.func @transform_1(%arg0: i32) -> (i32, i32) {
    %c0_i32 = arith.constant 0 : i32
    %c0_i32_0 = arith.constant 0 : i32
    return %c0_i32, %arg0 : i32, i32
  }
  func.func @transform_2(%arg0: i32) -> (i32, i32) {
    %c0_i32 = arith.constant 0 : i32
    %c0_i32_0 = arith.constant 0 : i32
    return %c0_i32, %arg0 : i32, i32
  }
  func.func @transform_3(%arg0: i32) -> (i32, i32) {
    %c0_i32 = arith.constant 0 : i32
    %c0_i32_0 = arith.constant 0 : i32
    return %c0_i32, %arg0 : i32, i32
  }
  func.func @transform_4(%arg0: i32) -> (i32, i32) {
    %c0_i32 = arith.constant 0 : i32
    %c0_i32_0 = arith.constant 0 : i32
    return %c0_i32, %arg0 : i32, i32
  }
  func.func @transform_5(%arg0: i32) -> (i32, i32) {
    %c0_i32 = arith.constant 0 : i32
    %c0_i32_0 = arith.constant 0 : i32
    return %c0_i32, %arg0 : i32, i32
  }
}

module attributes {stable_mosaic.version = 11 : i64} {
  func.func @mm_bias_bn_lrelu_kernel(%arg0: i32, %arg1: memref<32x2048xbf16, #tpu.memory_space<vmem>>, %arg2: memref<2048x256xbf16, #tpu.memory_space<vmem>>, %arg3: memref<1x256xf32, #tpu.memory_space<vmem>>, %arg4: memref<1x256xf32, #tpu.memory_space<vmem>>, %arg5: memref<1x256xf32, #tpu.memory_space<vmem>>, %arg6: memref<32x256xf32, #tpu.memory_space<vmem>>) attributes {dimension_semantics = [#tpu.dimension_semantics<parallel>], iteration_bounds = array<i64: 1>, scalar_prefetch = 0 : i64, scratch_operands = 0 : i64, tpu.core_type = #tpu.core_type<tc>, window_params = [{pipeline_mode = #tpu.pipeline_mode<synchronous>, transform_indices = @transform_0, window_bounds = array<i64: 32, 2048>}, {transform_indices = @transform_1, window_bounds = array<i64: 2048, 256>}, {transform_indices = @transform_2, window_bounds = array<i64: 1, 256>}, {transform_indices = @transform_3, window_bounds = array<i64: 1, 256>}, {transform_indices = @transform_4, window_bounds = array<i64: 1, 256>}, {transform_indices = @transform_5, window_bounds = array<i64: 32, 256>}]} {
    %c0 = arith.constant 0 : index
    %c0_0 = arith.constant 0 : index
    %0 = vector.load %arg1[%c0, %c0_0] : memref<32x2048xbf16, #tpu.memory_space<vmem>>, vector<32x2048xbf16>
    %c0_1 = arith.constant 0 : index
    %c0_2 = arith.constant 0 : index
    %1 = vector.load %arg2[%c0_1, %c0_2] : memref<2048x256xbf16, #tpu.memory_space<vmem>>, vector<2048x256xbf16>
    %cst = arith.constant dense<0.000000e+00> : vector<32x256xf32>
    %2 = tpu.matmul %0, %1, %cst {dimension_numbers = #tpu.dot_dimension_numbers<[1], [0], [0], [1], [0, 0, 1, 1], [], []>} : vector<32x2048xbf16>, vector<2048x256xbf16>, vector<32x256xf32> -> vector<32x256xf32>
    %c0_3 = arith.constant 0 : index
    %c0_4 = arith.constant 0 : index
    %3 = vector.load %arg3[%c0_3, %c0_4] : memref<1x256xf32, #tpu.memory_space<vmem>>, vector<1x256xf32>
    %4 = vector.broadcast %3 : vector<1x256xf32> to vector<32x256xf32>
    %5 = arith.addf %2, %4 : vector<32x256xf32>
    %cst_5 = arith.constant dense<0.000000e+00> : vector<256xf32>
    %6 = vector.multi_reduction <add>, %5, %cst_5 [0] : vector<32x256xf32> to vector<256xf32>
    %7 = vector.shape_cast %6 : vector<256xf32> to vector<1x256xf32>
    %cst_6 = arith.constant 3.200000e+01 : f32
    %8 = vector.broadcast %cst_6 : f32 to vector<1x256xf32>
    %9 = arith.divf %7, %8 : vector<1x256xf32>
    %10 = vector.broadcast %9 : vector<1x256xf32> to vector<32x256xf32>
    %11 = arith.subf %5, %10 : vector<32x256xf32>
    %12 = arith.mulf %11, %11 : vector<32x256xf32>
    %cst_7 = arith.constant dense<0.000000e+00> : vector<256xf32>
    %13 = vector.multi_reduction <add>, %12, %cst_7 [0] : vector<32x256xf32> to vector<256xf32>
    %14 = vector.shape_cast %13 : vector<256xf32> to vector<1x256xf32>
    %cst_8 = arith.constant 3.200000e+01 : f32
    %15 = vector.broadcast %cst_8 : f32 to vector<1x256xf32>
    %16 = arith.divf %14, %15 : vector<1x256xf32>
    %17 = vector.broadcast %9 : vector<1x256xf32> to vector<32x256xf32>
    %18 = arith.subf %5, %17 : vector<32x256xf32>
    %cst_9 = arith.constant 9.99999974E-6 : f32
    %19 = vector.broadcast %cst_9 : f32 to vector<1x256xf32>
    %20 = arith.addf %16, %19 : vector<1x256xf32>
    %21 = math.rsqrt %20 : vector<1x256xf32>
    %22 = vector.broadcast %21 : vector<1x256xf32> to vector<32x256xf32>
    %23 = arith.mulf %18, %22 : vector<32x256xf32>
    %c0_10 = arith.constant 0 : index
    %c0_11 = arith.constant 0 : index
    %24 = vector.load %arg4[%c0_10, %c0_11] : memref<1x256xf32, #tpu.memory_space<vmem>>, vector<1x256xf32>
    %25 = vector.broadcast %24 : vector<1x256xf32> to vector<32x256xf32>
    %26 = arith.mulf %23, %25 : vector<32x256xf32>
    %c0_12 = arith.constant 0 : index
    %c0_13 = arith.constant 0 : index
    %27 = vector.load %arg5[%c0_12, %c0_13] : memref<1x256xf32, #tpu.memory_space<vmem>>, vector<1x256xf32>
    %28 = vector.broadcast %27 : vector<1x256xf32> to vector<32x256xf32>
    %29 = arith.addf %26, %28 : vector<32x256xf32>
    %cst_14 = arith.constant 0.000000e+00 : f32
    %30 = vector.broadcast %cst_14 : f32 to vector<32x256xf32>
    %31 = arith.cmpf oge, %29, %30 : vector<32x256xf32>
    %cst_15 = arith.constant 5.000000e-02 : f32
    %32 = vector.broadcast %cst_15 : f32 to vector<32x256xf32>
    %33 = arith.mulf %29, %32 : vector<32x256xf32>
    %34 = arith.select %31, %29, %33 : vector<32x256xi1>, vector<32x256xf32>
    %c0_16 = arith.constant 0 : index
    %c0_17 = arith.constant 0 : index
    %35 = vector.load %arg6[%c0_16, %c0_17] : memref<32x256xf32, #tpu.memory_space<vmem>>, vector<32x256xf32>
    tpu.vector_store %arg6[%c0_16, %c0_17], %34 {strides = array<i32>} : memref<32x256xf32, #tpu.memory_space<vmem>>, vector<32x256xf32>,
    return
  }
  func.func @transform_0(%arg0: i32) -> (i32, i32) {
    %c0_i32 = arith.constant 0 : i32
    %c0_i32_0 = arith.constant 0 : i32
    %c0_i32_1 = arith.constant 0 : i32
    return %c0_i32, %c0_i32_0 : i32, i32
  }
  func.func @transform_1(%arg0: i32) -> (i32, i32) {
    %c0_i32 = arith.constant 0 : i32
    %c0_i32_0 = arith.constant 0 : i32
    return %c0_i32, %arg0 : i32, i32
  }
  func.func @transform_2(%arg0: i32) -> (i32, i32) {
    %c0_i32 = arith.constant 0 : i32
    %c0_i32_0 = arith.constant 0 : i32
    return %c0_i32, %arg0 : i32, i32
  }
  func.func @transform_3(%arg0: i32) -> (i32, i32) {
    %c0_i32 = arith.constant 0 : i32
    %c0_i32_0 = arith.constant 0 : i32
    return %c0_i32, %arg0 : i32, i32
  }
  func.func @transform_4(%arg0: i32) -> (i32, i32) {
    %c0_i32 = arith.constant 0 : i32
    %c0_i32_0 = arith.constant 0 : i32
    return %c0_i32, %arg0 : i32, i32
  }
  func.func @transform_5(%arg0: i32) -> (i32, i32) {
    %c0_i32 = arith.constant 0 : i32
    %c0_i32_0 = arith.constant 0 : i32
    return %c0_i32, %arg0 : i32, i32
  }
}

module attributes {stable_mosaic.version = 11 : i64} {
  func.func @mm_bias_kernel(%arg0: i32, %arg1: i32, %arg2: memref<16x4096xbf16, #tpu.memory_space<vmem>>, %arg3: memref<4096x128xbf16, #tpu.memory_space<vmem>>, %arg4: memref<1x128xf32, #tpu.memory_space<vmem>>, %arg5: memref<16x128xf32, #tpu.memory_space<vmem>>) attributes {dimension_semantics = [#tpu.dimension_semantics<parallel>, #tpu.dimension_semantics<parallel>], iteration_bounds = array<i64: 1, 1>, scalar_prefetch = 0 : i64, scratch_operands = 0 : i64, tpu.core_type = #tpu.core_type<tc>, window_params = [{transform_indices = @transform_0, window_bounds = array<i64: 16, 4096>}, {transform_indices = @transform_1, window_bounds = array<i64: 4096, 128>}, {transform_indices = @transform_2, window_bounds = array<i64: 1, 128>}, {transform_indices = @transform_3, window_bounds = array<i64: 16, 128>}]} {
    %c0 = arith.constant 0 : index
    %c0_0 = arith.constant 0 : index
    %0 = vector.load %arg2[%c0, %c0_0] : memref<16x4096xbf16, #tpu.memory_space<vmem>>, vector<16x4096xbf16>
    %c0_1 = arith.constant 0 : index
    %c0_2 = arith.constant 0 : index
    %1 = vector.load %arg3[%c0_1, %c0_2] : memref<4096x128xbf16, #tpu.memory_space<vmem>>, vector<4096x128xbf16>
    %cst = arith.constant dense<0.000000e+00> : vector<16x128xf32>
    %2 = tpu.matmul %0, %1, %cst {dimension_numbers = #tpu.dot_dimension_numbers<[1], [0], [0], [1], [0, 0, 1, 1], [], []>} : vector<16x4096xbf16>, vector<4096x128xbf16>, vector<16x128xf32> -> vector<16x128xf32>
    %c0_3 = arith.constant 0 : index
    %c0_4 = arith.constant 0 : index
    %3 = vector.load %arg4[%c0_3, %c0_4] : memref<1x128xf32, #tpu.memory_space<vmem>>, vector<1x128xf32>
    %4 = vector.broadcast %3 : vector<1x128xf32> to vector<16x128xf32>
    %5 = arith.addf %2, %4 : vector<16x128xf32>
    %c0_5 = arith.constant 0 : index
    %c0_6 = arith.constant 0 : index
    %6 = vector.load %arg5[%c0_5, %c0_6] : memref<16x128xf32, #tpu.memory_space<vmem>>, vector<16x128xf32>
    tpu.vector_store %arg5[%c0_5, %c0_6], %5 {strides = array<i32>} : memref<16x128xf32, #tpu.memory_space<vmem>>, vector<16x128xf32>,
    return
  }
  func.func @transform_0(%arg0: i32, %arg1: i32) -> (i32, i32) {
    %c0_i32 = arith.constant 0 : i32
    %c0_i32_0 = arith.constant 0 : i32
    return %arg0, %c0_i32 : i32, i32
  }
  func.func @transform_1(%arg0: i32, %arg1: i32) -> (i32, i32) {
    %c0_i32 = arith.constant 0 : i32
    %c0_i32_0 = arith.constant 0 : i32
    return %c0_i32, %arg1 : i32, i32
  }
  func.func @transform_2(%arg0: i32, %arg1: i32) -> (i32, i32) {
    %c0_i32 = arith.constant 0 : i32
    %c0_i32_0 = arith.constant 0 : i32
    return %c0_i32, %arg1 : i32, i32
  }
  func.func @transform_3(%arg0: i32, %arg1: i32) -> (i32, i32) {
    %c0_i32 = arith.constant 0 : i32
    return %arg0, %arg1 : i32, i32
  }
}

</mosaic_0001>

<bundles_post_ra>
// kernel: dx_forward.4
= control target key start
LH: loop header
LB: loop body
LE: loop exit
PB: predicated region body
PF: predicated region fallthrough
CT: control target
= control target key end

     0   :  { %s802_s12 = smov 0   ;;  %s804_s13 = smov 0   ;;  %s912_s0 = inlined_call_operand.vmem [shape: bf16[512,128], index: 0, kind: input, shape index: {}]   ;;  %s913_s1 = inlined_call_operand.vmem [shape: bf16[128,128], index: 1, kind: input, shape index: {}]   ;;  %s914_s2 = inlined_call_operand.vmem [shape: f32[1,128], index: 2, kind: input, shape index: {}]   ;;  %s915_s3 = inlined_call_operand.vmem [shape: f32[512,128], index: 3, kind: output, shape index: {}]  }
   0x1   :  { %s806_s14 = smov 0  }
   0x2 LB: > { %s25_s15 = sadd.s32 1, %s776_s13  ;;  %p630_p0 = scmp.ge.s32.totalorder %s780_s14, 1  ;;  %s780_s14 = sphi %s806_s14, %s13_s14   ;;  %s776_s13 = sphi %s804_s13, %s917_s13   ;;  %s772_s12 = sphi %s802_s12, %s916_s12  }
   0x3   : > { %p27_p1 = scmp.ge.s32.totalorder %s25_s15, 4  ;;  %p169_p2 = scmp.lt.s32.totalorder %s780_s14, 5 }
   0x5   : > { %s919_s15 = smov (%p27_p1, %s25_s15), 0  ;;  %p170_p3 = pnand %p630_p0, %p169_p2 }
   0x6   : > { %v742_v0 = vld [vmem:[%s913_s1] sm:$0xff] (!%p170_p3)   ;;  %s631_s18 = sshll.u32 (!%p170_p3), %s772_s12, 4  ;;  %v743_v1 = vld [vmem:[%s913_s1 + $0x8] sm:$0xff] (!%p170_p3)   ;;  %v744_v2 = vld [vmem:[%s913_s1 + $0x10] sm:$0xff] (!%p170_p3)  }
   0x7   : > { %173 = sbr.rel (%p170_p3) target bundleno = 271 (0x10f), region = 32  ;;  %p204_p4 = scmp.lt.s32.totalorder (!%p170_p3), %s631_s18, 63  ;;  %670 = vmatprep.subr.bf16.mxu0 (!%p170_p3), %v742_v0  ;;  %702 = vmatprep.subr.bf16.mxu1 (!%p170_p3), %v742_v0  ;;  %v745_v3 = vld [vmem:[%s913_s1 + $0x18] sm:$0xff] (!%p170_p3)   ;;  %v746_v6 = vld [vmem:[%s913_s1 + $0x20] sm:$0xff] (!%p170_p3)   ;;  %v747_v7 = vld [vmem:[%s913_s1 + $0x28] sm:$0xff] (!%p170_p3)  }
   0x8   : > { %671 = vmatpush3.bf16.msra.mxu0 (!%p170_p3), %v742_v0  ;;  %710 = vmatpush3.bf16.msra.mxu1 (!%p170_p3), %v742_v0  ;;  %v748_v8 = vld [vmem:[%s913_s1 + $0x30] sm:$0xff] (!%p170_p3)   ;;  %v749_v9 = vld [vmem:[%s913_s1 + $0x38] sm:$0xff] (!%p170_p3)   ;;  %v863_v16 = vld [vmem:[%s914_s2] ss:$0 sm:$0xff] (!%p170_p3) }
   0x9   : > { %672 = vmatprep.subr.bf16.mxu0 (!%p170_p3), %v743_v1  ;;  %703 = vmatprep.subr.bf16.mxu1 (!%p170_p3), %v743_v1 }
   0xc   : > { %673 = vmatpush3.bf16.msra.mxu0 (!%p170_p3), %v743_v1  ;;  %711 = vmatpush3.bf16.msra.mxu1 (!%p170_p3), %v743_v1 }
   0xd   : > { %674 = vmatprep.subr.bf16.mxu0 (!%p170_p3), %v744_v2  ;;  %704 = vmatprep.subr.bf16.mxu1 (!%p170_p3), %v744_v2 }
   0xe   : > { %s921_s18 = smov (!%p204_p4, %s631_s18), 63 }
   0xf   : > { %s632_s23 = sshll.u32 %s921_s18, 2  ;;  %s634_s12 = sshll.u32 %s921_s18, 3 }
  0x10   : > { %s835_s26 = scalar_lea.vmem %s912_s0, %s632_s23  ;;  %675 = vmatpush3.bf16.msra.mxu0 %v744_v2  ;;  %712 = vmatpush3.bf16.msra.mxu1 %v744_v2  ;;  %s873_s19 = scalar_lea.vmem %s915_s3, %s634_s12 }
  0x11   : > { %v750_v4 = vld [vmem:[%s835_s26] sm:$0xff]   ;;  %676 = vmatprep.subr.bf16.mxu0 %v745_v3  ;;  %705 = vmatprep.subr.bf16.mxu1 %v745_v3  ;;  %v752_v10 = vld [vmem:[%s835_s26 + $0x8] sm:$0xff]   ;;  %v754_v12 = vld [vmem:[%s835_s26 + $0x10] sm:$0xff]  }
  0x12   : > { %v751_v5 = vld [vmem:[%s835_s26 + $0x20] sm:$0xff]   ;;  %686 = vmatprep.mubr.bf16.mxu0 %v750_v4  ;;  %v753_v11 = vld [vmem:[%s835_s26 + $0x28] sm:$0xff]   ;;  %v755_v13 = vld [vmem:[%s835_s26 + $0x30] sm:$0xff]  }
  0x13   : > { %694 = vmatprep.mubr.bf16.mxu1 %v751_v5  ;;  %v756_v14 = vld [vmem:[%s835_s26 + $0x18] sm:$0xff]  }
  0x14   : > { %677 = vmatpush3.bf16.msra.mxu0 %v745_v3  ;;  %713 = vmatpush3.bf16.msra.mxu1 %v745_v3  ;;  %v757_v15 = vld [vmem:[%s835_s26 + $0x38] sm:$0xff]  }
  0x15   : > { %678 = vmatprep.subr.bf16.mxu0 %v746_v6  ;;  %706 = vmatprep.subr.bf16.mxu1 %v746_v6 }
  0x18   : > { %679 = vmatpush3.bf16.msra.mxu0 %v746_v6  ;;  %714 = vmatpush3.bf16.msra.mxu1 %v746_v6 }
  0x19   : > { %680 = vmatprep.subr.bf16.mxu0 %v747_v7  ;;  %707 = vmatprep.subr.bf16.mxu1 %v747_v7 }
  0x1c   : > { %681 = vmatpush3.bf16.msra.mxu0 %v747_v7  ;;  %715 = vmatpush3.bf16.msra.mxu1 %v747_v7 }
  0x1d   : > { %682 = vmatprep.subr.bf16.mxu0 %v748_v8  ;;  %708 = vmatprep.subr.bf16.mxu1 %v748_v8 }
  0x20   : > { %683 = vmatpush3.bf16.msra.mxu0 %v748_v8  ;;  %716 = vmatpush3.bf16.msra.mxu1 %v748_v8 }
  0x21   : > { %684 = vmatprep.subr.bf16.mxu0 %v749_v9  ;;  %709 = vmatprep.subr.bf16.mxu1 %v749_v9 }
  0x24   : > { %685 = vmatpush3.bf16.msra.mxu0 %v749_v9  ;;  %717 = vmatpush3.bf16.msra.mxu1 %v749_v9 }
  0x27   : > { %687 = vmatmul.mubr.bf16.vlgmr.msra.gmra.mrb[0].mxu0 %v752_v10  ;;  %695 = vmatmul.mubr.bf16.vlgmr.msra.gmra.mrb[0].mxu1 %v753_v11 }
  0x28   : > { %690 = vmatprep.mubr.bf16.mxu0 %v754_v12  ;;  %698 = vmatprep.mubr.bf16.mxu1 %v755_v13 }
  0x2f   : > { %691 = vmatmul.mubr.bf16.gmra.mrb[4].mxu0 %v756_v14  ;;  %699 = vmatmul.mubr.bf16.gmra.mrb[4].mxu1 %v757_v15 }
  0xfa   : > { %v688_v17 = vpop.f32.mrb[0].mxu0  ;;  %v696_v18 = vpop.f32.mrb[0].mxu1 }
  0xfb   : > { %v404_v19 = vadd.f32 %v688_v17, %v863_v16  ;;  %v436_v20 = vadd.f32 %v696_v18, %v863_v16  ;;  %v395_v21 = vpop.f32.mrb[1].mxu0  ;;  %v427_v22 = vpop.f32.mrb[1].mxu1 }
  0xfc   : > { %v396_v23 = vadd.f32 %v863_v16, %v395_v21  ;;  %v428_v24 = vadd.f32 %v863_v16, %v427_v22  ;;  %v689_v25 = vpop.f32.mrb[2].mxu0  ;;  %v697_v26 = vpop.f32.mrb[2].mxu1 }
  0xfd   : > { %vm460_vm0 = vcmp.ge.f32.partialorder %v404_v19, 0.0  ;;  %v476_v27 = vmul.f32 0.05, %v404_v19  ;;  %vm468_vm1 = vcmp.ge.f32.partialorder %v436_v20, 0.0  ;;  %v484_v28 = vmul.f32 0.05, %v436_v20 }
  0xfe   : > { %vm458_vm2 = vcmp.ge.f32.partialorder %v396_v23, 0.0  ;;  %v474_v29 = vmul.f32 0.05, %v396_v23  ;;  %vm466_vm3 = vcmp.ge.f32.partialorder %v428_v24, 0.0  ;;  %v482_v30 = vmul.f32 0.05, %v428_v24 }
  0xff   : > { %v492_v31 = vsel %vm460_vm0, %v404_v19, %v476_v27  ;;  %v500_v32 = vsel %vm468_vm1, %v436_v20, %v484_v28  ;;  %v407_v33 = vadd.f32 %v689_v25, %v863_v16  ;;  %v439_v34 = vadd.f32 %v697_v26, %v863_v16  ;;  %v398_v35 = vpop.f32.mrb[3].mxu0  ;;  %v430_v36 = vpop.f32.mrb[3].mxu1 }
 0x100   : > { %508 = vst [vmem:[%s873_s19 + $0x10] sm:$0xff] %v492_v31  ;;  %516 = vst [vmem:[%s873_s19 + $0x50] sm:$0xff] %v500_v32  ;;  %v490_v37 = vsel %vm458_vm2, %v396_v23, %v474_v29  ;;  %v498_v38 = vsel %vm466_vm3, %v428_v24, %v482_v30  ;;  %v399_v39 = vadd.f32 %v863_v16, %v398_v35 }
 0x101   : > { %v431_v40 = vadd.f32 %v863_v16, %v430_v36  ;;  %506 = vst [vmem:[%s873_s19] sm:$0xff] %v490_v37  ;;  %514 = vst [vmem:[%s873_s19 + $0x40] sm:$0xff] %v498_v38  ;;  %vm461_vm4 = vcmp.ge.f32.partialorder %v407_v33, 0.0  ;;  %v477_v41 = vmul.f32 0.05, %v407_v33  ;;  %vm469_vm5 = vcmp.ge.f32.partialorder %v439_v34, 0.0 }
 0x102   : > { %v485_v42 = vmul.f32 0.05, %v439_v34  ;;  %vm459_vm6 = vcmp.ge.f32.partialorder %v399_v39, 0.0  ;;  %v475_v43 = vmul.f32 0.05, %v399_v39  ;;  %v692_v47 = vpop.f32.mrb[4].mxu0 }
 0x103   : > { %vm467_vm7 = vcmp.ge.f32.partialorder %v431_v40, 0.0  ;;  %v483_v44 = vmul.f32 0.05, %v431_v40  ;;  %v493_v45 = vsel %vm461_vm4, %v407_v33, %v477_v41  ;;  %v700_v48 = vpop.f32.mrb[4].mxu1  ;;  %v420_v51 = vadd.f32 %v692_v47, %v863_v16  ;;  %v411_v53 = vpop.f32.mrb[5].mxu0 }
 0x104   : > { %v501_v46 = vsel %vm469_vm5, %v439_v34, %v485_v42  ;;  %509 = vst [vmem:[%s873_s19 + $0x18] sm:$0xff] %v493_v45  ;;  %v491_v49 = vsel %vm459_vm6, %v399_v39, %v475_v43  ;;  %v452_v52 = vadd.f32 %v700_v48, %v863_v16  ;;  %v443_v54 = vpop.f32.mrb[5].mxu1  ;;  %v412_v55 = vadd.f32 %v863_v16, %v411_v53  ;;  %v693_v57 = vpop.f32.mrb[6].mxu0 }
 0x105   : > { %517 = vst [vmem:[%s873_s19 + $0x58] sm:$0xff] %v501_v46  ;;  %v499_v50 = vsel %vm467_vm7, %v431_v40, %v483_v44  ;;  %507 = vst [vmem:[%s873_s19 + $0x8] sm:$0xff] %v491_v49  ;;  %v444_v56 = vadd.f32 %v863_v16, %v443_v54  ;;  %v701_v58 = vpop.f32.mrb[6].mxu1  ;;  %vm464_vm8 = vcmp.ge.f32.partialorder %v420_v51, 0.0  ;;  %v480_v59 = vmul.f32 0.05, %v420_v51 }
 0x106   : > { %515 = vst [vmem:[%s873_s19 + $0x48] sm:$0xff] %v499_v50  ;;  %vm472_vm9 = vcmp.ge.f32.partialorder %v452_v52, 0.0  ;;  %v488_v60 = vmul.f32 0.05, %v452_v52  ;;  %vm462_vm10 = vcmp.ge.f32.partialorder %v412_v55, 0.0  ;;  %v423_v1 = vadd.f32 %v693_v57, %v863_v16  ;;  %v414_v3 = vpop.f32.mrb[7].mxu0 }
 0x107   : > { %v478_v61 = vmul.f32 0.05, %v412_v55  ;;  %vm470_vm11 = vcmp.ge.f32.partialorder %v444_v56, 0.0  ;;  %v486_v62 = vmul.f32 0.05, %v444_v56  ;;  %v496_v63 = vsel %vm464_vm8, %v420_v51, %v480_v59  ;;  %v446_v4 = vpop.f32.mrb[7].mxu1 }
 0x108   : > { %v504_v0 = vsel %vm472_vm9, %v452_v52, %v488_v60  ;;  %v455_v2 = vadd.f32 %v701_v58, %v863_v16  ;;  %512 = vst [vmem:[%s873_s19 + $0x30] sm:$0xff] %v496_v63  ;;  %v415_v7 = vadd.f32 %v863_v16, %v414_v3  ;;  %v447_v8 = vadd.f32 %v863_v16, %v446_v4 }
 0x109   : > { %520 = vst [vmem:[%s873_s19 + $0x70] sm:$0xff] %v504_v0  ;;  %v494_v5 = vsel %vm462_vm10, %v412_v55, %v478_v61  ;;  %v502_v6 = vsel %vm470_vm11, %v444_v56, %v486_v62  ;;  %vm465_vm12 = vcmp.ge.f32.partialorder %v423_v1, 0.0  ;;  %v481_v9 = vmul.f32 0.05, %v423_v1 }
 0x10a   : > { %510 = vst [vmem:[%s873_s19 + $0x20] sm:$0xff] %v494_v5  ;;  %518 = vst [vmem:[%s873_s19 + $0x60] sm:$0xff] %v502_v6  ;;  %vm473_vm13 = vcmp.ge.f32.partialorder %v455_v2, 0.0  ;;  %v489_v10 = vmul.f32 0.05, %v455_v2  ;;  %vm463_vm14 = vcmp.ge.f32.partialorder %v415_v7, 0.0 }
 0x10b   : > { %v479_v11 = vmul.f32 0.05, %v415_v7  ;;  %vm471_vm15 = vcmp.ge.f32.partialorder %v447_v8, 0.0  ;;  %v487_v12 = vmul.f32 0.05, %v447_v8  ;;  %v497_v13 = vsel %vm465_vm12, %v423_v1, %v481_v9 }
 0x10c   : > { %v505_v14 = vsel %vm473_vm13, %v455_v2, %v489_v10  ;;  %513 = vst [vmem:[%s873_s19 + $0x38] sm:$0xff] %v497_v13 }
 0x10d   : > { %521 = vst [vmem:[%s873_s19 + $0x78] sm:$0xff] %v505_v14  ;;  %v495_v15 = vsel %vm463_vm14, %v415_v7, %v479_v11  ;;  %v503_v17 = vsel %vm471_vm15, %v447_v8, %v487_v12 }
 0x10e   : > { %511 = vst [vmem:[%s873_s19 + $0x28] sm:$0xff] %v495_v15  ;;  %519 = vst [vmem:[%s873_s19 + $0x68] sm:$0xff] %v503_v17 }
 0x10f PF: > { %s13_s14 = sadd.s32 1, %s780_s14   ;;  %s916_s12 = smov %s776_s13 }
 0x110   : > { %p10_p5 = scmp.ge.s32.totalorder %s13_s14, 6   ;;  %s917_s13 = smov %s919_s15 }
 0x112   :  { %12 = sbr.rel (!%p10_p5) target bundleno = 2 (0x2), region = 68 }

// kernel: dx_forward.5
= control target key start
LH: loop header
LB: loop body
LE: loop exit
PB: predicated region body
PF: predicated region fallthrough
CT: control target
= control target key end

     0   :  { %s2567_s1 = inlined_call_operand.vmem [shape: bf16[1024,128], index: 1, kind: input, shape index: {}]   ;;  %s2568_s0 = inlined_call_operand.vmem [shape: bf16[128,1024], index: 0, kind: input, shape index: {}]   ;;  %s2569_s2 = inlined_call_operand.vmem [shape: f32[1,128], index: 2, kind: input, shape index: {}]   ;;  %s2570_s3 = inlined_call_operand.vmem [shape: f32[1,128], index: 3, kind: input, shape index: {}]   ;;  %s2571_s4 = inlined_call_operand.vmem [shape: f32[1,128], index: 4, kind: input, shape index: {}]   ;;  %s2572_s5 = inlined_call_operand.vmem [shape: f32[128,128], index: 5, kind: output, shape index: {}]  }
   0x1   :  { %v1908_v0 = vld [vmem:[%s2567_s1 + $0x40] sm:$0xff]   ;;  %v1912_v4 = vld [vmem:[%s2567_s1 + $0x48] sm:$0xff]   ;;  %v1916_v8 = vld [vmem:[%s2567_s1 + $0x50] sm:$0xff]  }
   0x2   :  { %v1909_v1 = vld [vmem:[%s2567_s1 + $0xc0] sm:$0xff]   ;;  %1652 = vmatprep.subr.bf16.mxu0 %v1908_v0  ;;  %v1913_v5 = vld [vmem:[%s2567_s1 + $0xc8] sm:$0xff]   ;;  %v1917_v9 = vld [vmem:[%s2567_s1 + $0xd0] sm:$0xff]  }
   0x3   :  { %v1910_v2 = vld [vmem:[%s2567_s1] sm:$0xff]   ;;  %1716 = vmatprep.subr.bf16.mxu1 %v1909_v1  ;;  %v1914_v6 = vld [vmem:[%s2567_s1 + $0x8] sm:$0xff]   ;;  %v1918_v10 = vld [vmem:[%s2567_s1 + $0x10] sm:$0xff]  }
   0x4   :  { %v1911_v3 = vld [vmem:[%s2567_s1 + $0x80] sm:$0xff]   ;;  %1653 = vmatpush3.bf16.msra.mxu0 %v1910_v2  ;;  %v1915_v7 = vld [vmem:[%s2567_s1 + $0x88] sm:$0xff]   ;;  %v1919_v11 = vld [vmem:[%s2567_s1 + $0x90] sm:$0xff]  }
   0x5   :  { %1717 = vmatpush3.bf16.msra.mxu1 %v1911_v3  ;;  %1654 = vmatprep.subr.bf16.mxu0 %v1912_v4  ;;  %v1920_v12 = vld [vmem:[%s2567_s1 + $0x58] sm:$0xff]   ;;  %v1924_v16 = vld [vmem:[%s2567_s1 + $0x60] sm:$0xff]   ;;  %v1928_v20 = vld [vmem:[%s2567_s1 + $0x68] sm:$0xff]  }
   0x6   :  { %1718 = vmatprep.subr.bf16.mxu1 %v1913_v5  ;;  %v1921_v13 = vld [vmem:[%s2567_s1 + $0xd8] sm:$0xff]   ;;  %v1925_v17 = vld [vmem:[%s2567_s1 + $0xe0] sm:$0xff]   ;;  %v1929_v21 = vld [vmem:[%s2567_s1 + $0xe8] sm:$0xff]  }
   0x7   :  { %v1922_v14 = vld [vmem:[%s2567_s1 + $0x18] sm:$0xff]   ;;  %v1926_v18 = vld [vmem:[%s2567_s1 + $0x20] sm:$0xff]   ;;  %v1930_v22 = vld [vmem:[%s2567_s1 + $0x28] sm:$0xff]  }
   0x8   :  { %1655 = vmatpush3.bf16.msra.mxu0 %v1914_v6  ;;  %v1923_v15 = vld [vmem:[%s2567_s1 + $0x98] sm:$0xff]   ;;  %v1927_v19 = vld [vmem:[%s2567_s1 + $0xa0] sm:$0xff]   ;;  %v1931_v23 = vld [vmem:[%s2567_s1 + $0xa8] sm:$0xff]  }
   0x9   :  { %1719 = vmatpush3.bf16.msra.mxu1 %v1915_v7  ;;  %1656 = vmatprep.subr.bf16.mxu0 %v1916_v8  ;;  %v1932_v24 = vld [vmem:[%s2567_s1 + $0x70] sm:$0xff]   ;;  %v1936_v28 = vld [vmem:[%s2567_s1 + $0x78] sm:$0xff]   ;;  %v21_v32 = vld [vmem:[%s2568_s0] sm:$0xff] }
   0xa   :  { %1720 = vmatprep.subr.bf16.mxu1 %v1917_v9  ;;  %v1933_v25 = vld [vmem:[%s2567_s1 + $0xf0] sm:$0xff]   ;;  %v1937_v29 = vld [vmem:[%s2567_s1 + $0xf8] sm:$0xff]   ;;  %v25_v33 = vld [vmem:[%s2568_s0 + $0x20] sm:$0xff] }
   0xb   :  { %v1934_v26 = vld [vmem:[%s2567_s1 + $0x30] sm:$0xff]   ;;  %v1938_v30 = vld [vmem:[%s2567_s1 + $0x38] sm:$0xff]   ;;  %v22_v34 = vld [vmem:[%s2568_s0 + $0x8] sm:$0xff]  ;;  %v1522_v35 = vcombine.low %v21_v32, %v25_v33  ;;  %v1523_v36 = vcombine.high %v21_v32, %v25_v33 }
   0xc   :  { %1657 = vmatpush3.bf16.msra.mxu0 %v1918_v10  ;;  %v1935_v27 = vld [vmem:[%s2567_s1 + $0xb0] sm:$0xff]   ;;  %v1939_v31 = vld [vmem:[%s2567_s1 + $0xb8] sm:$0xff]   ;;  %v26_v37 = vld [vmem:[%s2568_s0 + $0x28] sm:$0xff] }
   0xd   :  { %1721 = vmatpush3.bf16.msra.mxu1 %v1919_v11  ;;  %1658 = vmatprep.subr.bf16.mxu0 %v1920_v12  ;;  %v1524_v38 = vcombine.low %v22_v34, %v26_v37  ;;  %v1525_v39 = vcombine.high %v22_v34, %v26_v37  ;;  %v1940_v40 = vld [vmem:[%s2567_s1 + $0x140] sm:$0xff]   ;;  %v30_v47 = vld [vmem:[%s2568_s0 + $0x48] sm:$0xff]  ;;  %v1948_v62 = vld [vmem:[%s2567_s1 + $0x150] sm:$0xff]  }
   0xe   :  { %1722 = vmatprep.subr.bf16.mxu1 %v1921_v13  ;;  %956 = vmatprep.mubr.bf16.mxu0 %v1523_v36  ;;  %v1941_v41 = vld [vmem:[%s2567_s1 + $0x100] sm:$0xff]   ;;  %v34_v48 = vld [vmem:[%s2568_s0 + $0x68] sm:$0xff]  ;;  %v1949_v63 = vld [vmem:[%s2567_s1 + $0x110] sm:$0xff]  }
   0xf   :  { %1053 = vmatprep.mubr.bf16.mxu1 %v1525_v39  ;;  %v1942_v42 = vld [vmem:[%s2567_s1 + $0x1c0] sm:$0xff]   ;;  %v1533_v49 = vcombine.high %v30_v47, %v34_v48  ;;  %v1944_v50 = vld [vmem:[%s2567_s1 + $0x148] sm:$0xff]   ;;  %v1532_v53 = vcombine.low %v30_v47, %v34_v48  ;;  %v1950_v0 = vld [vmem:[%s2567_s1 + $0x1d0] sm:$0xff]  }
  0x10   :  { %1659 = vmatpush3.bf16.msra.mxu0 %v1922_v14  ;;  %v1943_v43 = vld [vmem:[%s2567_s1 + $0x180] sm:$0xff]   ;;  %v1945_v52 = vld [vmem:[%s2567_s1 + $0x108] sm:$0xff]   ;;  %v1951_v1 = vld [vmem:[%s2567_s1 + $0x190] sm:$0xff]  }
  0x11   :  { %1723 = vmatpush3.bf16.msra.mxu1 %v1923_v15  ;;  %1660 = vmatprep.subr.bf16.mxu0 %v1924_v16  ;;  %v29_v44 = vld [vmem:[%s2568_s0 + $0x40] sm:$0xff]  ;;  %v1946_v54 = vld [vmem:[%s2567_s1 + $0x1c8] sm:$0xff]   ;;  %v1952_v10 = vld [vmem:[%s2567_s1 + $0x158] sm:$0xff]  }
  0x12   :  { %1724 = vmatprep.subr.bf16.mxu1 %v1925_v17  ;;  %v33_v45 = vld [vmem:[%s2568_s0 + $0x60] sm:$0xff]  ;;  %v1947_v55 = vld [vmem:[%s2567_s1 + $0x188] sm:$0xff]   ;;  %v1953_v11 = vld [vmem:[%s2567_s1 + $0x118] sm:$0xff]  }
  0x13   :  { %v1531_v46 = vcombine.high %v29_v44, %v33_v45  ;;  %v1530_v51 = vcombine.low %v29_v44, %v33_v45  ;;  %v37_v56 = vld [vmem:[%s2568_s0 + $0x80] sm:$0xff]  ;;  %v38_v58 = vld [vmem:[%s2568_s0 + $0x88] sm:$0xff]  ;;  %v1954_v12 = vld [vmem:[%s2567_s1 + $0x1d8] sm:$0xff]  }
  0x14   :  { %1661 = vmatpush3.bf16.msra.mxu0 %v1926_v18  ;;  %v41_v57 = vld [vmem:[%s2568_s0 + $0xa0] sm:$0xff]  ;;  %v42_v59 = vld [vmem:[%s2568_s0 + $0xa8] sm:$0xff]  ;;  %v1955_v13 = vld [vmem:[%s2567_s1 + $0x198] sm:$0xff]  }
  0x15   :  { %1725 = vmatpush3.bf16.msra.mxu1 %v1927_v19  ;;  %1662 = vmatprep.subr.bf16.mxu0 %v1928_v20  ;;  %v1539_v60 = vcombine.high %v37_v56, %v41_v57  ;;  %v1541_v61 = vcombine.high %v38_v58, %v42_v59  ;;  %v1538_v2 = vcombine.low %v37_v56, %v41_v57  ;;  %v45_v3 = vld [vmem:[%s2568_s0 + $0xc0] sm:$0xff]  ;;  %v46_v5 = vld [vmem:[%s2568_s0 + $0xc8] sm:$0xff]  ;;  %v1965_v39 = vld [vmem:[%s2567_s1 + $0x130] sm:$0xff]  }
  0x16   :  { %1726 = vmatprep.subr.bf16.mxu1 %v1929_v21  ;;  %v49_v4 = vld [vmem:[%s2568_s0 + $0xe0] sm:$0xff]  ;;  %v1540_v6 = vcombine.low %v38_v58, %v42_v59  ;;  %v50_v8 = vld [vmem:[%s2568_s0 + $0xe8] sm:$0xff]  ;;  %v1969_v48 = vld [vmem:[%s2567_s1 + $0x138] sm:$0xff]  }
  0x17   :  { %v1547_v7 = vcombine.high %v45_v3, %v49_v4  ;;  %v1549_v9 = vcombine.high %v46_v5, %v50_v8  ;;  %v53_v14 = vld [vmem:[%s2568_s0 + $0x100] sm:$0xff]  ;;  %v54_v16 = vld [vmem:[%s2568_s0 + $0x108] sm:$0xff]  ;;  %v1546_v19 = vcombine.low %v45_v3, %v49_v4  ;;  %v1548_v21 = vcombine.low %v46_v5, %v50_v8  ;;  %v32_v8 = vld [vmem:[%s2568_s0 + $0x58] sm:$0xff] }
  0x18   :  { %1663 = vmatpush3.bf16.msra.mxu0 %v1930_v22  ;;  %v57_v15 = vld [vmem:[%s2568_s0 + $0x120] sm:$0xff]  ;;  %v58_v17 = vld [vmem:[%s2568_s0 + $0x128] sm:$0xff] }
  0x19   :  { %1727 = vmatpush3.bf16.msra.mxu1 %v1931_v23  ;;  %1664 = vmatprep.subr.bf16.mxu0 %v1932_v24  ;;  %v1956_v18 = vld [vmem:[%s2567_s1 + $0x160] sm:$0xff]   ;;  %v1555_v22 = vcombine.high %v53_v14, %v57_v15  ;;  %v1557_v24 = vcombine.high %v54_v16, %v58_v17  ;;  %v1962_v32 = vld [vmem:[%s2567_s1 + $0x1e8] sm:$0xff]   ;;  %v1554_v34 = vcombine.low %v53_v14, %v57_v15  ;;  %v39_v14 = vld [vmem:[%s2568_s0 + $0x90] sm:$0xff] }
  0x1a   :  { %1728 = vmatprep.subr.bf16.mxu1 %v1933_v25  ;;  %v1957_v20 = vld [vmem:[%s2567_s1 + $0x120] sm:$0xff]   ;;  %v1963_v33 = vld [vmem:[%s2567_s1 + $0x1a8] sm:$0xff]   ;;  %v43_v15 = vld [vmem:[%s2568_s0 + $0xb0] sm:$0xff] }
  0x1b   :  { %v1958_v23 = vld [vmem:[%s2567_s1 + $0x1e0] sm:$0xff]   ;;  %v70_v44 = vld [vmem:[%s2568_s0 + $0x188] sm:$0xff] }
  0x1c   :  { %1665 = vmatpush3.bf16.msra.mxu0 %v1934_v26  ;;  %v1959_v25 = vld [vmem:[%s2567_s1 + $0x1a0] sm:$0xff]   ;;  %v74_v45 = vld [vmem:[%s2568_s0 + $0x1a8] sm:$0xff] }
  0x1d   :  { %1729 = vmatpush3.bf16.msra.mxu1 %v1935_v27  ;;  %1666 = vmatprep.subr.bf16.mxu0 %v1936_v28  ;;  %v61_v26 = vld [vmem:[%s2568_s0 + $0x140] sm:$0xff]  ;;  %v1960_v28 = vld [vmem:[%s2567_s1 + $0x168] sm:$0xff]   ;;  %v1572_v59 = vcombine.low %v70_v44, %v74_v45 }
  0x1e   :  { %1730 = vmatprep.subr.bf16.mxu1 %v1937_v29  ;;  %v65_v27 = vld [vmem:[%s2568_s0 + $0x160] sm:$0xff]  ;;  %v62_v29 = vld [vmem:[%s2568_s0 + $0x148] sm:$0xff] }
  0x1f   :  { %v1563_v36 = vcombine.high %v61_v26, %v65_v27  ;;  %v1562_v47 = vcombine.low %v61_v26, %v65_v27  ;;  %v78_v56 = vld [vmem:[%s2568_s0 + $0x1c8] sm:$0xff]  ;;  %v1542_v26 = vcombine.low %v39_v14, %v43_v15 }
  0x20   :  { %1667 = vmatpush3.bf16.msra.mxu0 %v1938_v30  ;;  %v66_v30 = vld [vmem:[%s2568_s0 + $0x168] sm:$0xff] }
  0x21   :  { %1731 = vmatpush3.bf16.msra.mxu1 %v1939_v31  ;;  %1780 = vmatprep.subr.bf16.mxu0 %v1940_v40  ;;  %v1961_v31 = vld [vmem:[%s2567_s1 + $0x128] sm:$0xff]   ;;  %v1565_v37 = vcombine.high %v62_v29, %v66_v30  ;;  %v1966_v40 = vld [vmem:[%s2567_s1 + $0x1f0] sm:$0xff]  }
  0x22   :  { %1844 = vmatprep.subr.bf16.mxu1 %v1942_v42  ;;  %v73_v42 = vld [vmem:[%s2568_s0 + $0x1a0] sm:$0xff]  ;;  %v82_v57 = vld [vmem:[%s2568_s0 + $0x1e8] sm:$0xff] }
  0x23   :  { %957 = vmatmul.mubr.bf16.vlgmr.msra.gmra.mrb[0].mxu0 %v1522_v35  ;;  %v1556_v35 = vcombine.low %v54_v16, %v58_v17  ;;  %v1580_v3 = vcombine.low %v78_v56, %v82_v57  ;;  %v40_v16 = vld [vmem:[%s2568_s0 + $0x98] sm:$0xff] }
  0x24   :  { %1054 = vmatmul.mubr.bf16.vlgmr.msra.gmra.mrb[0].mxu1 %v1524_v38  ;;  %1781 = vmatpush3.bf16.msra.mxu0 %v1941_v41  ;;  %v1964_v38 = vld [vmem:[%s2567_s1 + $0x170] sm:$0xff]   ;;  %v69_v41 = vld [vmem:[%s2568_s0 + $0x180] sm:$0xff]  ;;  %v44_v17 = vld [vmem:[%s2568_s0 + $0xb8] sm:$0xff] }
  0x25   :  { %1845 = vmatpush3.bf16.msra.mxu1 %v1943_v43  ;;  %964 = vmatprep.mubr.bf16.mxu0 %v1531_v46  ;;  %v1967_v43 = vld [vmem:[%s2567_s1 + $0x1b0] sm:$0xff]   ;;  %v1968_v46 = vld [vmem:[%s2567_s1 + $0x178] sm:$0xff]   ;;  %v1570_v58 = vcombine.low %v69_v41, %v73_v42  ;;  %v1544_v27 = vcombine.low %v40_v16, %v44_v17 }
  0x26   :  { %1061 = vmatprep.mubr.bf16.mxu1 %v1533_v49  ;;  %1782 = vmatprep.subr.bf16.mxu0 %v1944_v50  ;;  %v1564_v49 = vcombine.low %v62_v29, %v66_v30  ;;  %v1571_v50 = vcombine.high %v69_v41, %v73_v42  ;;  %v55_v30 = vld [vmem:[%s2568_s0 + $0x110] sm:$0xff]  ;;  %v68_v41 = vld [vmem:[%s2568_s0 + $0x178] sm:$0xff] }
  0x27   :  { %1846 = vmatprep.subr.bf16.mxu1 %v1946_v54  ;;  %v77_v54 = vld [vmem:[%s2568_s0 + $0x1c0] sm:$0xff] }
  0x28   :  { %1783 = vmatpush3.bf16.msra.mxu0 %v1945_v52  ;;  %v1573_v52 = vcombine.high %v70_v44, %v74_v45 }
  0x29   :  { %1847 = vmatpush3.bf16.msra.mxu1 %v1947_v55  ;;  %1784 = vmatprep.subr.bf16.mxu0 %v1948_v62  ;;  %v81_v55 = vld [vmem:[%s2568_s0 + $0x1e0] sm:$0xff]  ;;  %v23_v62 = vld [vmem:[%s2568_s0 + $0x10] sm:$0xff] }
  0x2a   :  { %1848 = vmatprep.subr.bf16.mxu1 %v1950_v0  ;;  %v24_v0 = vld [vmem:[%s2568_s0 + $0x18] sm:$0xff] }
  0x2b   :  { %965 = vmatmul.mubr.bf16.gmra.mrb[4].mxu0 %v1530_v51  ;;  %v1970_v51 = vld [vmem:[%s2567_s1 + $0x1f8] sm:$0xff]  }
  0x2c   :  { %1062 = vmatmul.mubr.bf16.gmra.mrb[4].mxu1 %v1532_v53  ;;  %972 = vmatprep.mubr.bf16.mxu0 %v1539_v60  ;;  %v1971_v53 = vld [vmem:[%s2567_s1 + $0x1b8] sm:$0xff]   ;;  %v1579_v60 = vcombine.high %v77_v54, %v81_v55 }
  0x2d   :  { %1069 = vmatprep.mubr.bf16.mxu1 %v1541_v61  ;;  %1785 = vmatpush3.bf16.msra.mxu0 %v1949_v63  ;;  %v1581_v61 = vcombine.high %v78_v56, %v82_v57  ;;  %v27_v63 = vld [vmem:[%s2568_s0 + $0x30] sm:$0xff]  ;;  %v80_v56 = vld [vmem:[%s2568_s0 + $0x1d8] sm:$0xff] }
  0x2e   :  { %1849 = vmatpush3.bf16.msra.mxu1 %v1951_v1  ;;  %1786 = vmatprep.subr.bf16.mxu0 %v1952_v10  ;;  %v28_v1 = vld [vmem:[%s2568_s0 + $0x38] sm:$0xff]  ;;  %v1527_v4 = vcombine.high %v23_v62, %v27_v63  ;;  %v1526_v10 = vcombine.low %v23_v62, %v27_v63 }
  0x2f   :  { %1850 = vmatprep.subr.bf16.mxu1 %v1954_v12  ;;  %v1529_v5 = vcombine.high %v24_v0, %v28_v1  ;;  %v84_v57 = vld [vmem:[%s2568_s0 + $0x1f8] sm:$0xff] }
  0x30   :  { %v1584_v63 = vcombine.low %v80_v56, %v84_v57 }
  0x31   :  { %1787 = vmatpush3.bf16.msra.mxu0 %v1953_v11  ;;  %v1528_v11 = vcombine.low %v24_v0, %v28_v1 }
  0x32   :  { %1851 = vmatpush3.bf16.msra.mxu1 %v1955_v13  ;;  %1788 = vmatprep.subr.bf16.mxu0 %v1956_v18 }
  0x33   :  { %973 = vmatmul.mubr.bf16.gmra.mrb[8].mxu0 %v1538_v2  ;;  %1852 = vmatprep.subr.bf16.mxu1 %v1958_v23  ;;  %v1578_v2 = vcombine.low %v77_v54, %v81_v55  ;;  %v51_v23 = vld [vmem:[%s2568_s0 + $0xf0] sm:$0xff] }
  0x34   :  { %1070 = vmatmul.mubr.bf16.gmra.mrb[8].mxu1 %v1540_v6  ;;  %980 = vmatprep.mubr.bf16.mxu0 %v1547_v7  ;;  %v31_v6 = vld [vmem:[%s2568_s0 + $0x50] sm:$0xff] }
  0x35   :  { %1077 = vmatprep.mubr.bf16.mxu1 %v1549_v9  ;;  %1789 = vmatpush3.bf16.msra.mxu0 %v1957_v20  ;;  %v35_v7 = vld [vmem:[%s2568_s0 + $0x70] sm:$0xff]  ;;  %v36_v9 = vld [vmem:[%s2568_s0 + $0x78] sm:$0xff]  ;;  %v1543_v20 = vcombine.high %v39_v14, %v43_v15 }
  0x36   :  { %1853 = vmatpush3.bf16.msra.mxu1 %v1959_v25  ;;  %1790 = vmatprep.subr.bf16.mxu0 %v1960_v28  ;;  %v1535_v12 = vcombine.high %v31_v6, %v35_v7  ;;  %v1537_v13 = vcombine.high %v32_v8, %v36_v9  ;;  %v1534_v18 = vcombine.low %v31_v6, %v35_v7  ;;  %v52_v25 = vld [vmem:[%s2568_s0 + $0xf8] sm:$0xff]  ;;  %v79_v54 = vld [vmem:[%s2568_s0 + $0x1d0] sm:$0xff] }
  0x37   :  { %1854 = vmatprep.subr.bf16.mxu1 %v1962_v32  ;;  %v56_v32 = vld [vmem:[%s2568_s0 + $0x118] sm:$0xff]  ;;  %v83_v55 = vld [vmem:[%s2568_s0 + $0x1f0] sm:$0xff] }
  0x38   :  { %v1582_v62 = vcombine.low %v79_v54, %v83_v55 }
  0x39   :  { %1791 = vmatpush3.bf16.msra.mxu0 %v1961_v31  ;;  %v59_v31 = vld [vmem:[%s2568_s0 + $0x130] sm:$0xff] }
  0x3a   :  { %1855 = vmatpush3.bf16.msra.mxu1 %v1963_v33  ;;  %1792 = vmatprep.subr.bf16.mxu0 %v1964_v38  ;;  %v60_v33 = vld [vmem:[%s2568_s0 + $0x138] sm:$0xff]  ;;  %v63_v38 = vld [vmem:[%s2568_s0 + $0x150] sm:$0xff]  ;;  %v1558_v42 = vcombine.low %v55_v30, %v59_v31 }
  0x3b   :  { %981 = vmatmul.mubr.bf16.gmra.mrb[12].mxu0 %v1546_v19  ;;  %1856 = vmatprep.subr.bf16.mxu1 %v1966_v40  ;;  %v1536_v19 = vcombine.low %v32_v8, %v36_v9  ;;  %v64_v40 = vld [vmem:[%s2568_s0 + $0x158] sm:$0xff] }
  0x3c   :  { %1078 = vmatmul.mubr.bf16.gmra.mrb[12].mxu1 %v1548_v21  ;;  %988 = vmatprep.mubr.bf16.mxu0 %v1555_v22  ;;  %v1545_v21 = vcombine.high %v40_v16, %v44_v17  ;;  %v47_v22 = vld [vmem:[%s2568_s0 + $0xd0] sm:$0xff]  ;;  %v1569_v45 = vcombine.high %v64_v40, %v68_v41 }
  0x3d   :  { %1085 = vmatprep.mubr.bf16.mxu1 %v1557_v24  ;;  %1793 = vmatpush3.bf16.msra.mxu0 %v1965_v39  ;;  %v48_v24 = vld [vmem:[%s2568_s0 + $0xd8] sm:$0xff]  ;;  %v1551_v28 = vcombine.high %v47_v22, %v51_v23  ;;  %v67_v39 = vld [vmem:[%s2568_s0 + $0x170] sm:$0xff] }
  0x3e   :  { %1857 = vmatpush3.bf16.msra.mxu1 %v1967_v43  ;;  %1794 = vmatprep.subr.bf16.mxu0 %v1968_v46  ;;  %v1553_v29 = vcombine.high %v48_v24, %v52_v25  ;;  %v1560_v43 = vcombine.low %v56_v32, %v60_v33  ;;  %v1567_v44 = vcombine.high %v63_v38, %v67_v39  ;;  %v71_v46 = vld [vmem:[%s2568_s0 + $0x190] sm:$0xff] }
  0x3f   :  { %1858 = vmatprep.subr.bf16.mxu1 %v1970_v51  ;;  %v1568_v51 = vcombine.low %v64_v40, %v68_v41 }
  0x41   :  { %1795 = vmatpush3.bf16.msra.mxu0 %v1969_v48  ;;  %v72_v48 = vld [vmem:[%s2568_s0 + $0x198] sm:$0xff] }
  0x42   :  { %1859 = vmatpush3.bf16.msra.mxu1 %v1971_v53 }
  0x43   :  { %989 = vmatmul.mubr.bf16.gmra.mrb[16].mxu0 %v1554_v34  ;;  %v1550_v34 = vcombine.low %v47_v22, %v51_v23 }
  0x44   :  { %1086 = vmatmul.mubr.bf16.gmra.mrb[16].mxu1 %v1556_v35  ;;  %996 = vmatprep.mubr.bf16.mxu0 %v1563_v36  ;;  %v1552_v35 = vcombine.low %v48_v24, %v52_v25  ;;  %v1559_v36 = vcombine.high %v55_v30, %v59_v31 }
  0x45   :  { %1093 = vmatprep.mubr.bf16.mxu1 %v1565_v37  ;;  %v1561_v37 = vcombine.high %v56_v32, %v60_v33 }
  0x4b   :  { %997 = vmatmul.mubr.bf16.gmra.mrb[20].mxu0 %v1562_v47  ;;  %v75_v47 = vld [vmem:[%s2568_s0 + $0x1b0] sm:$0xff] }
  0x4c   :  { %1094 = vmatmul.mubr.bf16.gmra.mrb[20].mxu1 %v1564_v49  ;;  %1004 = vmatprep.mubr.bf16.mxu0 %v1571_v50  ;;  %v76_v49 = vld [vmem:[%s2568_s0 + $0x1b8] sm:$0xff]  ;;  %v1566_v50 = vcombine.low %v63_v38, %v67_v39 }
  0x4d   :  { %1101 = vmatprep.mubr.bf16.mxu1 %v1573_v52  ;;  %v1575_v52 = vcombine.high %v71_v46, %v75_v47  ;;  %v1577_v53 = vcombine.high %v72_v48, %v76_v49 }
  0x53   :  { %1005 = vmatmul.mubr.bf16.gmra.mrb[24].mxu0 %v1570_v58  ;;  %v1574_v58 = vcombine.low %v71_v46, %v75_v47 }
  0x54   :  { %1102 = vmatmul.mubr.bf16.gmra.mrb[24].mxu1 %v1572_v59  ;;  %1012 = vmatprep.mubr.bf16.mxu0 %v1579_v60  ;;  %v1576_v59 = vcombine.low %v72_v48, %v76_v49  ;;  %v1583_v60 = vcombine.high %v79_v54, %v83_v55 }
  0x55   :  { %1109 = vmatprep.mubr.bf16.mxu1 %v1581_v61  ;;  %v1585_v61 = vcombine.high %v80_v56, %v84_v57 }
  0x5b   :  { %1013 = vmatmul.mubr.bf16.gmra.mrb[28].mxu0 %v1578_v2  ;;  %v2391_v2 = vld [vmem:[%s2569_s2] ss:$0 sm:$0xff] }
  0x5c   :  { %1110 = vmatmul.mubr.bf16.gmra.mrb[28].mxu1 %v1580_v3  ;;  %1150 = vmatprep.mubr.bf16.mxu0 %v1527_v4 }
  0x5d   :  { %1247 = vmatprep.mubr.bf16.mxu1 %v1529_v5 }
  0x63   :  { %1151 = vmatmul.mubr.bf16.vlgmr.msra.gmra.mrb[32].mxu0 %v1526_v10 }
  0x64   :  { %1248 = vmatmul.mubr.bf16.vlgmr.msra.gmra.mrb[32].mxu1 %v1528_v11  ;;  %1158 = vmatprep.mubr.bf16.mxu0 %v1535_v12 }
  0x65   :  { %1255 = vmatprep.mubr.bf16.mxu1 %v1537_v13 }
  0x6b   :  { %1159 = vmatmul.mubr.bf16.gmra.mrb[36].mxu0 %v1534_v18 }
  0x6c   :  { %1256 = vmatmul.mubr.bf16.gmra.mrb[36].mxu1 %v1536_v19  ;;  %1166 = vmatprep.mubr.bf16.mxu0 %v1543_v20 }
  0x6d   :  { %1263 = vmatprep.mubr.bf16.mxu1 %v1545_v21 }
  0x73   :  { %1167 = vmatmul.mubr.bf16.gmra.mrb[40].mxu0 %v1542_v26 }
  0x74   :  { %1264 = vmatmul.mubr.bf16.gmra.mrb[40].mxu1 %v1544_v27  ;;  %1174 = vmatprep.mubr.bf16.mxu0 %v1551_v28 }
  0x75   :  { %1271 = vmatprep.mubr.bf16.mxu1 %v1553_v29 }
  0x7b   :  { %1175 = vmatmul.mubr.bf16.gmra.mrb[44].mxu0 %v1550_v34 }
  0x7c   :  { %1272 = vmatmul.mubr.bf16.gmra.mrb[44].mxu1 %v1552_v35  ;;  %1182 = vmatprep.mubr.bf16.mxu0 %v1559_v36 }
  0x7d   :  { %1279 = vmatprep.mubr.bf16.mxu1 %v1561_v37 }
  0x83   :  { %1183 = vmatmul.mubr.bf16.gmra.mrb[48].mxu0 %v1558_v42 }
  0x84   :  { %1280 = vmatmul.mubr.bf16.gmra.mrb[48].mxu1 %v1560_v43  ;;  %1190 = vmatprep.mubr.bf16.mxu0 %v1567_v44 }
  0x85   :  { %1287 = vmatprep.mubr.bf16.mxu1 %v1569_v45 }
  0x8b   :  { %1191 = vmatmul.mubr.bf16.gmra.mrb[52].mxu0 %v1566_v50 }
  0x8c   :  { %1288 = vmatmul.mubr.bf16.gmra.mrb[52].mxu1 %v1568_v51  ;;  %1198 = vmatprep.mubr.bf16.mxu0 %v1575_v52 }
  0x8d   :  { %1295 = vmatprep.mubr.bf16.mxu1 %v1577_v53 }
  0x93   :  { %1199 = vmatmul.mubr.bf16.gmra.mrb[56].mxu0 %v1574_v58 }
  0x94   :  { %1296 = vmatmul.mubr.bf16.gmra.mrb[56].mxu1 %v1576_v59  ;;  %1206 = vmatprep.mubr.bf16.mxu0 %v1583_v60 }
  0x95   :  { %1303 = vmatprep.mubr.bf16.mxu1 %v1585_v61 }
  0x9b   :  { %1207 = vmatmul.mubr.bf16.gmra.mrb[60].mxu0 %v1582_v62 }
  0x9c   :  { %1304 = vmatmul.mubr.bf16.gmra.mrb[60].mxu1 %v1584_v63 }
  0xf6   :  { %v1668_v0 = vpop.f32.mrb[0].mxu0 }
  0xf7   :  { %v1732_v1 = vpop.f32.mrb[0].mxu1  ;;  %v1669_v3 = vpop.f32.mrb[1].mxu0 }
  0xf8   :  { %v1670_v4 = vadd.f32 %v1669_v3, %v1668_v0  ;;  %v1733_v5 = vpop.f32.mrb[1].mxu1  ;;  %v1671_v6 = vpop.f32.mrb[2].mxu0 }
  0xf9   :  { %v1734_v7 = vadd.f32 %v1733_v5, %v1732_v1  ;;  %v1735_v8 = vpop.f32.mrb[2].mxu1  ;;  %v1672_v9 = vpop.f32.mrb[3].mxu0 }
  0xfa   :  { %v959_v10 = vadd.f32 %v1670_v4, %v2391_v2  ;;  %v1673_v11 = vadd.f32 %v1672_v9, %v1671_v6  ;;  %v1736_v12 = vpop.f32.mrb[3].mxu1 }
  0xfb   :  { %v1737_v13 = vadd.f32 %v1736_v12, %v1735_v8 }
  0xfc   :  { %v2394_v14 = vadd.f32 %v1734_v7, %v959_v10  ;;  %v962_v15 = vadd.f32 %v1673_v11, %v2391_v2 }
  0xfe   :  { %v2397_v16 = vadd.f32 %v1737_v13, %v962_v15  ;;  %v1674_v17 = vpop.f32.mrb[4].mxu0 }
  0xff   :  { %v1738_v18 = vpop.f32.mrb[4].mxu1  ;;  %v1675_v19 = vpop.f32.mrb[5].mxu0 }
 0x100   :  { %v1676_v20 = vadd.f32 %v1675_v19, %v1674_v17  ;;  %v1739_v21 = vpop.f32.mrb[5].mxu1  ;;  %v1677_v22 = vpop.f32.mrb[6].mxu0 }
 0x101   :  { %v1740_v23 = vadd.f32 %v1739_v21, %v1738_v18  ;;  %v1741_v24 = vpop.f32.mrb[6].mxu1  ;;  %v1678_v25 = vpop.f32.mrb[7].mxu0 }
 0x102   :  { %v967_v26 = vadd.f32 %v1676_v20, %v2391_v2  ;;  %v1679_v27 = vadd.f32 %v1678_v25, %v1677_v22  ;;  %v1742_v28 = vpop.f32.mrb[7].mxu1 }
 0x103   :  { %v1743_v29 = vadd.f32 %v1742_v28, %v1741_v24 }
 0x104   :  { %v2400_v30 = vadd.f32 %v1740_v23, %v967_v26  ;;  %v970_v31 = vadd.f32 %v1679_v27, %v2391_v2 }
 0x106   :  { %v2403_v32 = vadd.f32 %v1743_v29, %v970_v31  ;;  %v1680_v33 = vpop.f32.mrb[8].mxu0 }
 0x107   :  { %v1744_v34 = vpop.f32.mrb[8].mxu1  ;;  %v1681_v35 = vpop.f32.mrb[9].mxu0 }
 0x108   :  { %v1682_v36 = vadd.f32 %v1681_v35, %v1680_v33  ;;  %v1745_v37 = vpop.f32.mrb[9].mxu1  ;;  %v1683_v38 = vpop.f32.mrb[10].mxu0 }
 0x109   :  { %v1746_v39 = vadd.f32 %v1745_v37, %v1744_v34  ;;  %v1747_v40 = vpop.f32.mrb[10].mxu1  ;;  %v1684_v41 = vpop.f32.mrb[11].mxu0 }
 0x10a   :  { %v975_v42 = vadd.f32 %v1682_v36, %v2391_v2  ;;  %v1685_v43 = vadd.f32 %v1684_v41, %v1683_v38  ;;  %v1748_v44 = vpop.f32.mrb[11].mxu1 }
 0x10b   :  { %v1749_v45 = vadd.f32 %v1748_v44, %v1747_v40 }
 0x10c   :  { %v2406_v46 = vadd.f32 %v1746_v39, %v975_v42  ;;  %v978_v47 = vadd.f32 %v1685_v43, %v2391_v2 }
 0x10e   :  { %v2409_v48 = vadd.f32 %v1749_v45, %v978_v47  ;;  %v1686_v49 = vpop.f32.mrb[12].mxu0 }
 0x10f   :  { %v1750_v50 = vpop.f32.mrb[12].mxu1  ;;  %v1687_v51 = vpop.f32.mrb[13].mxu0 }
 0x110   :  { %v1688_v52 = vadd.f32 %v1687_v51, %v1686_v49  ;;  %v1751_v53 = vpop.f32.mrb[13].mxu1  ;;  %v1689_v54 = vpop.f32.mrb[14].mxu0 }
 0x111   :  { %v1752_v55 = vadd.f32 %v1751_v53, %v1750_v50  ;;  %v1753_v56 = vpop.f32.mrb[14].mxu1  ;;  %v1690_v57 = vpop.f32.mrb[15].mxu0 }
 0x112   :  { %v983_v58 = vadd.f32 %v1688_v52, %v2391_v2  ;;  %v1691_v59 = vadd.f32 %v1690_v57, %v1689_v54  ;;  %v1754_v60 = vpop.f32.mrb[15].mxu1 }
 0x113   :  { %v1755_v61 = vadd.f32 %v1754_v60, %v1753_v56 }
 0x114   :  { %v2412_v62 = vadd.f32 %v1752_v55, %v983_v58  ;;  %v986_v63 = vadd.f32 %v1691_v59, %v2391_v2 }
 0x116   :  { %v2415_v0 = vadd.f32 %v1755_v61, %v986_v63  ;;  %v1692_v1 = vpop.f32.mrb[16].mxu0 }
 0x117   :  { %v1756_v3 = vpop.f32.mrb[16].mxu1  ;;  %v1693_v4 = vpop.f32.mrb[17].mxu0 }
 0x118   :  { %v1694_v5 = vadd.f32 %v1693_v4, %v1692_v1  ;;  %v1757_v6 = vpop.f32.mrb[17].mxu1  ;;  %v1695_v7 = vpop.f32.mrb[18].mxu0 }
 0x119   :  { %v1758_v8 = vadd.f32 %v1757_v6, %v1756_v3  ;;  %v1759_v9 = vpop.f32.mrb[18].mxu1  ;;  %v1696_v10 = vpop.f32.mrb[19].mxu0 }
 0x11a   :  { %v991_v11 = vadd.f32 %v1694_v5, %v2391_v2  ;;  %v1697_v12 = vadd.f32 %v1696_v10, %v1695_v7  ;;  %v1760_v13 = vpop.f32.mrb[19].mxu1 }
 0x11b   :  { %v1761_v15 = vadd.f32 %v1760_v13, %v1759_v9 }
 0x11c   :  { %v2418_v17 = vadd.f32 %v1758_v8, %v991_v11  ;;  %v994_v18 = vadd.f32 %v1697_v12, %v2391_v2 }
 0x11e   :  { %v2421_v19 = vadd.f32 %v1761_v15, %v994_v18  ;;  %v1698_v20 = vpop.f32.mrb[20].mxu0 }
 0x11f   :  { %v1762_v21 = vpop.f32.mrb[20].mxu1  ;;  %v1699_v22 = vpop.f32.mrb[21].mxu0 }
 0x120   :  { %v1700_v23 = vadd.f32 %v1699_v22, %v1698_v20  ;;  %v1763_v24 = vpop.f32.mrb[21].mxu1  ;;  %v1701_v25 = vpop.f32.mrb[22].mxu0 }
 0x121   :  { %v1764_v26 = vadd.f32 %v1763_v24, %v1762_v21  ;;  %v1765_v27 = vpop.f32.mrb[22].mxu1  ;;  %v1702_v28 = vpop.f32.mrb[23].mxu0 }
 0x122   :  { %v999_v29 = vadd.f32 %v1700_v23, %v2391_v2  ;;  %v1703_v31 = vadd.f32 %v1702_v28, %v1701_v25  ;;  %v1766_v33 = vpop.f32.mrb[23].mxu1 }
 0x123   :  { %v1767_v34 = vadd.f32 %v1766_v33, %v1765_v27 }
 0x124   :  { %v2424_v35 = vadd.f32 %v1764_v26, %v999_v29  ;;  %v1002_v36 = vadd.f32 %v1703_v31, %v2391_v2 }
 0x126   :  { %v2427_v37 = vadd.f32 %v1767_v34, %v1002_v36  ;;  %v1704_v38 = vpop.f32.mrb[24].mxu0 }
 0x127   :  { %v1768_v39 = vpop.f32.mrb[24].mxu1  ;;  %v1705_v40 = vpop.f32.mrb[25].mxu0 }
 0x128   :  { %v1706_v41 = vadd.f32 %v1705_v40, %v1704_v38  ;;  %v1769_v42 = vpop.f32.mrb[25].mxu1  ;;  %v1707_v43 = vpop.f32.mrb[26].mxu0 }
 0x129   :  { %v1770_v44 = vadd.f32 %v1769_v42, %v1768_v39  ;;  %v1771_v45 = vpop.f32.mrb[26].mxu1  ;;  %v1708_v47 = vpop.f32.mrb[27].mxu0 }
 0x12a   :  { %v1007_v49 = vadd.f32 %v1706_v41, %v2391_v2  ;;  %v1709_v50 = vadd.f32 %v1708_v47, %v1707_v43  ;;  %v1772_v51 = vpop.f32.mrb[27].mxu1 }
 0x12b   :  { %v1773_v52 = vadd.f32 %v1772_v51, %v1771_v45 }
 0x12c   :  { %v2430_v53 = vadd.f32 %v1770_v44, %v1007_v49  ;;  %v1010_v54 = vadd.f32 %v1709_v50, %v2391_v2 }
 0x12e   :  { %v2433_v55 = vadd.f32 %v1773_v52, %v1010_v54  ;;  %v1710_v56 = vpop.f32.mrb[28].mxu0 }
 0x12f   :  { %v1774_v57 = vpop.f32.mrb[28].mxu1  ;;  %v1711_v58 = vpop.f32.mrb[29].mxu0 }
 0x130   :  { %v1712_v59 = vadd.f32 %v1711_v58, %v1710_v56  ;;  %v1775_v60 = vpop.f32.mrb[29].mxu1  ;;  %v1713_v61 = vpop.f32.mrb[30].mxu0 }
 0x131   :  { %v1776_v63 = vadd.f32 %v1775_v60, %v1774_v57  ;;  %v1777_v1 = vpop.f32.mrb[30].mxu1  ;;  %v1714_v3 = vpop.f32.mrb[31].mxu0 }
 0x132   :  { %v1015_v4 = vadd.f32 %v1712_v59, %v2391_v2  ;;  %v1715_v5 = vadd.f32 %v1714_v3, %v1713_v61  ;;  %v1778_v6 = vpop.f32.mrb[31].mxu1 }
 0x133   :  { %v1779_v7 = vadd.f32 %v1778_v6, %v1777_v1 }
 0x134   :  { %v2436_v8 = vadd.f32 %v1776_v63, %v1015_v4  ;;  %v1018_v9 = vadd.f32 %v1715_v5, %v2391_v2 }
 0x136   :  { %v2439_v10 = vadd.f32 %v1779_v7, %v1018_v9  ;;  %v1796_v11 = vpop.f32.mrb[32].mxu0 }
 0x137   :  { %v1860_v12 = vpop.f32.mrb[32].mxu1  ;;  %v1797_v13 = vpop.f32.mrb[33].mxu0 }
 0x138   :  { %v1798_v15 = vadd.f32 %v1797_v13, %v1796_v11  ;;  %v1861_v18 = vpop.f32.mrb[33].mxu1  ;;  %v1799_v20 = vpop.f32.mrb[34].mxu0 }
 0x139   :  { %v1862_v21 = vadd.f32 %v1861_v18, %v1860_v12  ;;  %v1863_v22 = vpop.f32.mrb[34].mxu1  ;;  %v1800_v23 = vpop.f32.mrb[35].mxu0 }
 0x13a   :  { %v1153_v24 = vadd.f32 %v1798_v15, %v2394_v14  ;;  %v1801_v25 = vadd.f32 %v1800_v23, %v1799_v20  ;;  %v1864_v26 = vpop.f32.mrb[35].mxu1 }
 0x13b   :  { %v1865_v27 = vadd.f32 %v1864_v26, %v1863_v22 }
 0x13c   :  { %v2442_v28 = vadd.f32 %v1862_v21, %v1153_v24  ;;  %v1156_v2 = vadd.f32 %v1801_v25, %v2397_v16 }
 0x13e   :  { %v2445_v29 = vadd.f32 %v1865_v27, %v1156_v2  ;;  %v1802_v31 = vpop.f32.mrb[36].mxu0 }
 0x13f   :  { %v1866_v33 = vpop.f32.mrb[36].mxu1  ;;  %v1803_v34 = vpop.f32.mrb[37].mxu0 }
 0x140   :  { %v1312_v36 = vadd.f32 %v2445_v29, %v2442_v28  ;;  %v1804_v38 = vadd.f32 %v1803_v34, %v1802_v31  ;;  %v1867_v39 = vpop.f32.mrb[37].mxu1  ;;  %v1805_v40 = vpop.f32.mrb[38].mxu0 }
 0x141   :  { %v1868_v41 = vadd.f32 %v1867_v39, %v1866_v33  ;;  %v1869_v14 = vpop.f32.mrb[38].mxu1  ;;  %v1806_v42 = vpop.f32.mrb[39].mxu0 }
 0x142   :  { %v1161_v43 = vadd.f32 %v1804_v38, %v2400_v30  ;;  %v1807_v44 = vadd.f32 %v1806_v42, %v1805_v40  ;;  %v1870_v45 = vpop.f32.mrb[39].mxu1 }
 0x143   :  { %v1871_v47 = vadd.f32 %v1870_v45, %v1869_v14 }
 0x144   :  { %v2450_v16 = vadd.f32 %v1868_v41, %v1161_v43  ;;  %v1164_v49 = vadd.f32 %v1807_v44, %v2403_v32 }
 0x146   :  { %v1313_v50 = vadd.f32 %v1312_v36, %v2450_v16  ;;  %v2454_v51 = vadd.f32 %v1871_v47, %v1164_v49  ;;  %v1808_v52 = vpop.f32.mrb[40].mxu0 }
 0x147   :  { %v1872_v54 = vpop.f32.mrb[40].mxu1  ;;  %v1809_v56 = vpop.f32.mrb[41].mxu0 }
 0x148   :  { %v1314_v57 = vadd.f32 %v1313_v50, %v2454_v51  ;;  %v1810_v58 = vadd.f32 %v1809_v56, %v1808_v52  ;;  %v1873_v59 = vpop.f32.mrb[41].mxu1  ;;  %v1811_v60 = vpop.f32.mrb[42].mxu0 }
 0x149   :  { %v1874_v30 = vadd.f32 %v1873_v59, %v1872_v54  ;;  %v1875_v61 = vpop.f32.mrb[42].mxu1  ;;  %v1812_v63 = vpop.f32.mrb[43].mxu0 }
 0x14a   :  { %v1169_v1 = vadd.f32 %v1810_v58, %v2406_v46  ;;  %v1813_v3 = vadd.f32 %v1812_v63, %v1811_v60  ;;  %v1876_v4 = vpop.f32.mrb[43].mxu1 }
 0x14b   :  { %v1877_v32 = vadd.f32 %v1876_v4, %v1875_v61 }
 0x14c   :  { %v2458_v5 = vadd.f32 %v1874_v30, %v1169_v1  ;;  %v1172_v6 = vadd.f32 %v1813_v3, %v2409_v48 }
 0x14e   :  { %v1315_v7 = vadd.f32 %v1314_v57, %v2458_v5  ;;  %v2462_v9 = vadd.f32 %v1877_v32, %v1172_v6  ;;  %v1814_v11 = vpop.f32.mrb[44].mxu0 }
 0x14f   :  { %v1878_v12 = vpop.f32.mrb[44].mxu1  ;;  %v1815_v13 = vpop.f32.mrb[45].mxu0 }
 0x150   :  { %v1316_v15 = vadd.f32 %v1315_v7, %v2462_v9  ;;  %v1816_v18 = vadd.f32 %v1815_v13, %v1814_v11  ;;  %v1879_v20 = vpop.f32.mrb[45].mxu1  ;;  %v1817_v21 = vpop.f32.mrb[46].mxu0 }
 0x151   :  { %v1880_v46 = vadd.f32 %v1879_v20, %v1878_v12  ;;  %v1881_v22 = vpop.f32.mrb[46].mxu1  ;;  %v1818_v23 = vpop.f32.mrb[47].mxu0 }
 0x152   :  { %v1177_v24 = vadd.f32 %v1816_v18, %v2412_v62  ;;  %v1819_v25 = vadd.f32 %v1818_v23, %v1817_v21  ;;  %v1882_v26 = vpop.f32.mrb[47].mxu1 }
 0x153   :  { %v1883_v48 = vadd.f32 %v1882_v26, %v1881_v22 }
 0x154   :  { %v2466_v27 = vadd.f32 %v1880_v46, %v1177_v24  ;;  %v1180_v2 = vadd.f32 %v1819_v25, %v2415_v0 }
 0x156   :  { %v1317_v31 = vadd.f32 %v1316_v15, %v2466_v27  ;;  %v2470_v33 = vadd.f32 %v1883_v48, %v1180_v2  ;;  %v1820_v34 = vpop.f32.mrb[48].mxu0 }
 0x157   :  { %v1884_v36 = vpop.f32.mrb[48].mxu1  ;;  %v1821_v38 = vpop.f32.mrb[49].mxu0 }
 0x158   :  { %v1318_v39 = vadd.f32 %v1317_v31, %v2470_v33  ;;  %v1822_v40 = vadd.f32 %v1821_v38, %v1820_v34  ;;  %v1885_v41 = vpop.f32.mrb[49].mxu1  ;;  %v1823_v14 = vpop.f32.mrb[50].mxu0 }
 0x159   :  { %v1886_v62 = vadd.f32 %v1885_v41, %v1884_v36  ;;  %v1887_v42 = vpop.f32.mrb[50].mxu1  ;;  %v1824_v43 = vpop.f32.mrb[51].mxu0 }
 0x15a   :  { %v1185_v44 = vadd.f32 %v1822_v40, %v2418_v17  ;;  %v1825_v45 = vadd.f32 %v1824_v43, %v1823_v14  ;;  %v1888_v47 = vpop.f32.mrb[51].mxu1 }
 0x15b   :  { %v1889_v0 = vadd.f32 %v1888_v47, %v1887_v42 }
 0x15c   :  { %v2474_v49 = vadd.f32 %v1886_v62, %v1185_v44  ;;  %v1188_v50 = vadd.f32 %v1825_v45, %v2421_v19 }
 0x15e   :  { %v1319_v52 = vadd.f32 %v1318_v39, %v2474_v49  ;;  %v2478_v54 = vadd.f32 %v1889_v0, %v1188_v50  ;;  %v1826_v56 = vpop.f32.mrb[52].mxu0 }
 0x15f   :  { %v1890_v57 = vpop.f32.mrb[52].mxu1  ;;  %v1827_v58 = vpop.f32.mrb[53].mxu0 }
 0x160   :  { %v1320_v59 = vadd.f32 %v1319_v52, %v2478_v54  ;;  %v1828_v60 = vadd.f32 %v1827_v58, %v1826_v56  ;;  %v1891_v30 = vpop.f32.mrb[53].mxu1  ;;  %v1829_v61 = vpop.f32.mrb[54].mxu0 }
 0x161   :  { %v1892_v17 = vadd.f32 %v1891_v30, %v1890_v57  ;;  %v1893_v63 = vpop.f32.mrb[54].mxu1  ;;  %v1830_v1 = vpop.f32.mrb[55].mxu0 }
 0x162   :  { %v1193_v3 = vadd.f32 %v1828_v60, %v2424_v35  ;;  %v1831_v4 = vadd.f32 %v1830_v1, %v1829_v61  ;;  %v1894_v32 = vpop.f32.mrb[55].mxu1 }
 0x163   :  { %v1895_v19 = vadd.f32 %v1894_v32, %v1893_v63 }
 0x164   :  { %v1290_v6 = vadd.f32 %v1892_v17, %v1193_v3  ;;  %v1196_v7 = vadd.f32 %v1831_v4, %v2427_v37 }
 0x166   :  { %v1321_v11 = vadd.f32 %v1320_v59, %v1290_v6  ;;  %v1293_v12 = vadd.f32 %v1895_v19, %v1196_v7  ;;  %v1832_v13 = vpop.f32.mrb[56].mxu0 }
 0x167   :  { %v1896_v15 = vpop.f32.mrb[56].mxu1  ;;  %v1833_v18 = vpop.f32.mrb[57].mxu0 }
 0x168   :  { %v1322_v20 = vadd.f32 %v1321_v11, %v1293_v12  ;;  %v1834_v21 = vadd.f32 %v1833_v18, %v1832_v13  ;;  %v1897_v46 = vpop.f32.mrb[57].mxu1  ;;  %v1835_v22 = vpop.f32.mrb[58].mxu0 }
 0x169   :  { %v1898_v23 = vadd.f32 %v1897_v46, %v1896_v15  ;;  %v1899_v24 = vpop.f32.mrb[58].mxu1  ;;  %v1836_v25 = vpop.f32.mrb[59].mxu0 }
 0x16a   :  { %v1201_v35 = vadd.f32 %v1834_v21, %v2430_v53  ;;  %v1837_v26 = vadd.f32 %v1836_v25, %v1835_v22  ;;  %v1900_v48 = vpop.f32.mrb[59].mxu1 }
 0x16b   :  { %v1901_v2 = vadd.f32 %v1900_v48, %v1899_v24 }
 0x16c   :  { %v1298_v31 = vadd.f32 %v1898_v23, %v1201_v35  ;;  %v1204_v37 = vadd.f32 %v1837_v26, %v2433_v55 }
 0x16e   :  { %v1323_v34 = vadd.f32 %v1322_v20, %v1298_v31  ;;  %v1301_v36 = vadd.f32 %v1901_v2, %v1204_v37  ;;  %v1838_v38 = vpop.f32.mrb[60].mxu0 }
 0x16f   :  { %v1902_v39 = vpop.f32.mrb[60].mxu1  ;;  %v1839_v40 = vpop.f32.mrb[61].mxu0 }
 0x170   :  { %v1324_v41 = vadd.f32 %v1323_v34, %v1301_v36  ;;  %v1840_v14 = vadd.f32 %v1839_v40, %v1838_v38  ;;  %v1903_v62 = vpop.f32.mrb[61].mxu1  ;;  %v1841_v42 = vpop.f32.mrb[62].mxu0 }
 0x171   :  { %v1904_v43 = vadd.f32 %v1903_v62, %v1902_v39  ;;  %v1905_v44 = vpop.f32.mrb[62].mxu1  ;;  %v1842_v45 = vpop.f32.mrb[63].mxu0 }
 0x172   :  { %v1209_v53 = vadd.f32 %v1840_v14, %v2436_v8  ;;  %v1843_v47 = vadd.f32 %v1842_v45, %v1841_v42  ;;  %v1906_v0 = vpop.f32.mrb[63].mxu1 }
 0x173   :  { %v1907_v50 = vadd.f32 %v1906_v0, %v1905_v44 }
 0x174   :  { %v1306_v52 = vadd.f32 %v1904_v43, %v1209_v53  ;;  %v1212_v55 = vadd.f32 %v1843_v47, %v2439_v10 }
 0x176   :  { %v1325_v56 = vadd.f32 %v1324_v41, %v1306_v52  ;;  %v1309_v57 = vadd.f32 %v1907_v50, %v1212_v55 }
 0x178   :  { %v1326_v58 = vadd.f32 %v1325_v56, %v1309_v57 }
 0x17a   :  { %v1327_v59 = vrot.slane %v1326_v58, 4 }
 0x17c   :  { %v1328_v60 = vadd.f32 %v1327_v59, %v1326_v58 }
 0x17e   :  { %v1329_v30 = vrot.slane %v1328_v60, 2 }
 0x180   :  { %v1330_v61 = vadd.f32 %v1329_v30, %v1328_v60 }
 0x182   :  { %v1331_v17 = vrot.slane %v1330_v61, 1 }
 0x184   :  { %v1332_v63 = vadd.f32 %v1331_v17, %v1330_v61 }
 0x186   :  { %v1334_v1 = vmul.f32 0.0078125, %v1332_v63 }
 0x188   :  { %v1335_v3 = vsub.f32 %v2442_v28, %v1334_v1  ;;  %v1336_v8 = vsub.f32 %v2445_v29, %v1334_v1  ;;  %v1337_v4 = vsub.f32 %v2450_v16, %v1334_v1  ;;  %v1338_v32 = vsub.f32 %v2454_v51, %v1334_v1 }
 0x189   :  { %v1339_v10 = vsub.f32 %v2458_v5, %v1334_v1  ;;  %v1340_v19 = vsub.f32 %v2462_v9, %v1334_v1  ;;  %v1341_v7 = vsub.f32 %v2466_v27, %v1334_v1  ;;  %v1342_v11 = vsub.f32 %v2470_v33, %v1334_v1 }
 0x18a   :  { %v1343_v13 = vsub.f32 %v2474_v49, %v1334_v1  ;;  %v1344_v15 = vsub.f32 %v2478_v54, %v1334_v1  ;;  %v1345_v18 = vsub.f32 %v1290_v6, %v1334_v1  ;;  %v1346_v28 = vsub.f32 %v1293_v12, %v1334_v1 }
 0x18b   :  { %v1347_v20 = vsub.f32 %v1298_v31, %v1334_v1  ;;  %v1348_v29 = vsub.f32 %v1301_v36, %v1334_v1  ;;  %v1349_v21 = vsub.f32 %v1306_v52, %v1334_v1  ;;  %v1350_v16 = vsub.f32 %v1309_v57, %v1334_v1 }
 0x18c   :  { %v1351_v46 = vmul.f32 %v1335_v3, %v1335_v3  ;;  %v1352_v51 = vmul.f32 %v1336_v8, %v1336_v8  ;;  %v1353_v22 = vmul.f32 %v1337_v4, %v1337_v4  ;;  %v1354_v23 = vmul.f32 %v1338_v32, %v1338_v32 }
 0x18d   :  { %v1355_v24 = vmul.f32 %v1339_v10, %v1339_v10  ;;  %v1356_v25 = vmul.f32 %v1340_v19, %v1340_v19  ;;  %v1357_v35 = vmul.f32 %v1341_v7, %v1341_v7  ;;  %v1358_v26 = vmul.f32 %v1342_v11, %v1342_v11 }
 0x18e   :  { %v1367_v5 = vadd.f32 %v1352_v51, %v1351_v46  ;;  %v1359_v6 = vmul.f32 %v1343_v13, %v1343_v13  ;;  %v1360_v48 = vmul.f32 %v1344_v15, %v1344_v15  ;;  %v1361_v31 = vmul.f32 %v1345_v18, %v1345_v18  ;;  %v1650_v46 = vld [vmem:[%s2570_s3] ss:$0 sm:$0xff] }
 0x18f   :  { %v1362_v34 = vmul.f32 %v1346_v28, %v1346_v28  ;;  %v1363_v38 = vmul.f32 %v1347_v20, %v1347_v20  ;;  %v1364_v40 = vmul.f32 %v1348_v29, %v1348_v29  ;;  %v1365_v14 = vmul.f32 %v1349_v21, %v1349_v21 }
 0x190   :  { %v1368_v9 = vadd.f32 %v1367_v5, %v1353_v22  ;;  %v1366_v42 = vmul.f32 %v1350_v16, %v1350_v16 }
 0x192   :  { %v1369_v27 = vadd.f32 %v1368_v9, %v1354_v23 }
 0x194   :  { %v1370_v33 = vadd.f32 %v1369_v27, %v1355_v24 }
 0x196   :  { %v1371_v49 = vadd.f32 %v1370_v33, %v1356_v25  ;;  %v1651_v33 = vld [vmem:[%s2571_s4] ss:$0 sm:$0xff] }
 0x198   :  { %v1372_v54 = vadd.f32 %v1371_v49, %v1357_v35 }
 0x19a   :  { %v1373_v12 = vadd.f32 %v1372_v54, %v1358_v26 }
 0x19c   :  { %v1374_v2 = vadd.f32 %v1373_v12, %v1359_v6 }
 0x19e   :  { %v1375_v37 = vadd.f32 %v1374_v2, %v1360_v48 }
 0x1a0   :  { %v1376_v36 = vadd.f32 %v1375_v37, %v1361_v31 }
 0x1a2   :  { %v1377_v39 = vadd.f32 %v1376_v36, %v1362_v34 }
 0x1a4   :  { %v1378_v41 = vadd.f32 %v1377_v39, %v1363_v38 }
 0x1a6   :  { %v1379_v62 = vadd.f32 %v1378_v41, %v1364_v40 }
 0x1a8   :  { %v1380_v43 = vadd.f32 %v1379_v62, %v1365_v14 }
 0x1aa   :  { %v1381_v44 = vadd.f32 %v1380_v43, %v1366_v42 }
 0x1ac   :  { %v1382_v45 = vrot.slane %v1381_v44, 4 }
 0x1ae   :  { %v1383_v53 = vadd.f32 %v1382_v45, %v1381_v44 }
 0x1b0   :  { %v1384_v47 = vrot.slane %v1383_v53, 2 }
 0x1b2   :  { %v1385_v0 = vadd.f32 %v1384_v47, %v1383_v53 }
 0x1b4   :  { %v1386_v50 = vrot.slane %v1385_v0, 1 }
 0x1b6   :  { %v1387_v52 = vadd.f32 %v1386_v50, %v1385_v0 }
 0x1b8   :  { %v1388_v55 = vmul.f32 0.0078125, %v1387_v52 }
 0x1ba   :  { %v1389_v56 = vadd.f32 1e-05, %v1388_v55 }
 0x1bc   :  { %1972 = vrsqrt.f32 %v1389_v56 }
 0x1c6   :  { %v1973_v57 = vpop.eup %1972 }
 0x1c7   :  { %v1391_v58 = vmul.f32 %v1973_v57, %v1335_v3  ;;  %v1392_v59 = vmul.f32 %v1973_v57, %v1336_v8  ;;  %v1393_v60 = vmul.f32 %v1973_v57, %v1337_v4  ;;  %v1394_v30 = vmul.f32 %v1973_v57, %v1338_v32 }
 0x1c8   :  { %v1395_v61 = vmul.f32 %v1973_v57, %v1339_v10  ;;  %v1396_v17 = vmul.f32 %v1973_v57, %v1340_v19  ;;  %v1397_v63 = vmul.f32 %v1973_v57, %v1341_v7  ;;  %v1398_v1 = vmul.f32 %v1973_v57, %v1342_v11 }
 0x1c9   :  { %v1399_v51 = vmul.f32 %v1973_v57, %v1343_v13  ;;  %v1400_v22 = vmul.f32 %v1973_v57, %v1344_v15  ;;  %v1401_v5 = vmul.f32 %v1973_v57, %v1345_v18  ;;  %v1402_v23 = vmul.f32 %v1973_v57, %v1346_v28 }
 0x1ca   :  { %v1403_v9 = vmul.f32 %v1973_v57, %v1347_v20  ;;  %v1404_v24 = vmul.f32 %v1973_v57, %v1348_v29  ;;  %v1405_v27 = vmul.f32 %v1973_v57, %v1349_v21  ;;  %v1406_v25 = vmul.f32 %v1973_v57, %v1350_v16 }
 0x1cb   :  { %v1414_v3 = vmul.f32 %v1650_v46, %v1391_v58  ;;  %v1415_v8 = vmul.f32 %v1650_v46, %v1392_v59  ;;  %v1416_v4 = vmul.f32 %v1650_v46, %v1393_v60  ;;  %v1417_v32 = vmul.f32 %v1650_v46, %v1394_v30 }
 0x1cc   :  { %v1418_v10 = vmul.f32 %v1650_v46, %v1395_v61  ;;  %v1419_v19 = vmul.f32 %v1650_v46, %v1396_v17  ;;  %v1420_v7 = vmul.f32 %v1650_v46, %v1397_v63  ;;  %v1421_v11 = vmul.f32 %v1650_v46, %v1398_v1 }
 0x1cd   :  { %v1422_v13 = vmul.f32 %v1650_v46, %v1399_v51  ;;  %v1423_v15 = vmul.f32 %v1650_v46, %v1400_v22  ;;  %v1424_v18 = vmul.f32 %v1650_v46, %v1401_v5  ;;  %v1425_v28 = vmul.f32 %v1650_v46, %v1402_v23 }
 0x1ce   :  { %v1426_v20 = vmul.f32 %v1650_v46, %v1403_v9  ;;  %v1427_v29 = vmul.f32 %v1650_v46, %v1404_v24  ;;  %v1428_v21 = vmul.f32 %v1650_v46, %v1405_v27  ;;  %v1429_v16 = vmul.f32 %v1650_v46, %v1406_v25 }
 0x1cf   :  { %v1437_v35 = vadd.f32 %v1651_v33, %v1414_v3  ;;  %v1438_v49 = vadd.f32 %v1651_v33, %v1415_v8  ;;  %v1439_v26 = vadd.f32 %v1651_v33, %v1416_v4  ;;  %v1440_v54 = vadd.f32 %v1651_v33, %v1417_v32 }
 0x1d0   :  { %v1441_v6 = vadd.f32 %v1651_v33, %v1418_v10  ;;  %v1442_v12 = vadd.f32 %v1651_v33, %v1419_v19  ;;  %v1443_v48 = vadd.f32 %v1651_v33, %v1420_v7  ;;  %v1444_v2 = vadd.f32 %v1651_v33, %v1421_v11 }
 0x1d1   :  { %v1445_v31 = vadd.f32 %v1651_v33, %v1422_v13  ;;  %v1446_v37 = vadd.f32 %v1651_v33, %v1423_v15  ;;  %v1447_v34 = vadd.f32 %v1651_v33, %v1424_v18  ;;  %v1448_v36 = vadd.f32 %v1651_v33, %v1425_v28 }
 0x1d2   :  { %v1449_v38 = vadd.f32 %v1651_v33, %v1426_v20  ;;  %v1450_v39 = vadd.f32 %v1651_v33, %v1427_v29  ;;  %v1451_v40 = vadd.f32 %v1651_v33, %v1428_v21  ;;  %v1452_v41 = vadd.f32 %v1651_v33, %v1429_v16 }
 0x1d3   :  { %vm1453_vm0 = vcmp.ge.f32.partialorder %v1437_v35, 0.0  ;;  %vm1454_vm1 = vcmp.ge.f32.partialorder %v1438_v49, 0.0  ;;  %vm1455_vm2 = vcmp.ge.f32.partialorder %v1439_v26, 0.0  ;;  %vm1456_vm3 = vcmp.ge.f32.partialorder %v1440_v54, 0.0 }
 0x1d4   :  { %vm1457_vm4 = vcmp.ge.f32.partialorder %v1441_v6, 0.0  ;;  %vm1458_vm5 = vcmp.ge.f32.partialorder %v1442_v12, 0.0  ;;  %vm1459_vm6 = vcmp.ge.f32.partialorder %v1443_v48, 0.0  ;;  %vm1460_vm7 = vcmp.ge.f32.partialorder %v1444_v2, 0.0 }
 0x1d5   :  { %vm1461_vm8 = vcmp.ge.f32.partialorder %v1445_v31, 0.0  ;;  %vm1462_vm9 = vcmp.ge.f32.partialorder %v1446_v37, 0.0  ;;  %vm1463_vm10 = vcmp.ge.f32.partialorder %v1447_v34, 0.0  ;;  %vm1464_vm11 = vcmp.ge.f32.partialorder %v1448_v36, 0.0 }
 0x1d6   :  { %vm1465_vm12 = vcmp.ge.f32.partialorder %v1449_v38, 0.0  ;;  %vm1466_vm13 = vcmp.ge.f32.partialorder %v1450_v39, 0.0  ;;  %vm1467_vm14 = vcmp.ge.f32.partialorder %v1451_v40, 0.0  ;;  %vm1468_vm15 = vcmp.ge.f32.partialorder %v1452_v41, 0.0 }
 0x1d7   :  { %v1469_v14 = vmul.f32 0.05, %v1437_v35  ;;  %v1470_v62 = vmul.f32 0.05, %v1438_v49  ;;  %v1471_v42 = vmul.f32 0.05, %v1439_v26 }
 0x1d8   :  { %v1472_v43 = vmul.f32 0.05, %v1440_v54  ;;  %v1473_v44 = vmul.f32 0.05, %v1441_v6  ;;  %v1474_v45 = vmul.f32 0.05, %v1442_v12 }
 0x1d9   :  { %v1475_v53 = vmul.f32 0.05, %v1443_v48  ;;  %v1476_v47 = vmul.f32 0.05, %v1444_v2  ;;  %v1477_v0 = vmul.f32 0.05, %v1445_v31  ;;  %v1485_v50 = vsel %vm1453_vm0, %v1437_v35, %v1469_v14 }
 0x1da   :  { %v1478_v52 = vmul.f32 0.05, %v1446_v37  ;;  %v1479_v55 = vmul.f32 0.05, %v1447_v34  ;;  %v1480_v56 = vmul.f32 0.05, %v1448_v36  ;;  %v1486_v57 = vsel %vm1454_vm1, %v1438_v49, %v1470_v62  ;;  %1501 = vst [vmem:[%s2572_s5] sm:$0xff] %v1485_v50 }
 0x1db   :  { %v1481_v58 = vmul.f32 0.05, %v1449_v38  ;;  %v1482_v59 = vmul.f32 0.05, %v1450_v39  ;;  %v1483_v60 = vmul.f32 0.05, %v1451_v40  ;;  %v1487_v30 = vsel %vm1455_vm2, %v1439_v26, %v1471_v42 }
 0x1dc   :  { %1502 = vst [vmem:[%s2572_s5 + $0x8] sm:$0xff] %v1486_v57  ;;  %v1484_v61 = vmul.f32 0.05, %v1452_v41  ;;  %v1488_v17 = vsel %vm1456_vm3, %v1440_v54, %v1472_v43  ;;  %v1489_v63 = vsel %vm1457_vm4, %v1441_v6, %v1473_v44  ;;  %v1490_v1 = vsel %vm1458_vm5, %v1442_v12, %v1474_v45  ;;  %1503 = vst [vmem:[%s2572_s5 + $0x10] sm:$0xff] %v1487_v30 }
 0x1dd   :  { %v1491_v46 = vsel %vm1459_vm6, %v1443_v48, %v1475_v53  ;;  %v1492_v51 = vsel %vm1460_vm7, %v1444_v2, %v1476_v47  ;;  %v1493_v22 = vsel %vm1461_vm8, %v1445_v31, %v1477_v0  ;;  %v1494_v5 = vsel %vm1462_vm9, %v1446_v37, %v1478_v52  ;;  %1504 = vst [vmem:[%s2572_s5 + $0x18] sm:$0xff] %v1488_v17 }
 0x1de   :  { %1505 = vst [vmem:[%s2572_s5 + $0x20] sm:$0xff] %v1489_v63  ;;  %1506 = vst [vmem:[%s2572_s5 + $0x28] sm:$0xff] %v1490_v1  ;;  %v1495_v23 = vsel %vm1463_vm10, %v1447_v34, %v1479_v55  ;;  %v1496_v9 = vsel %vm1464_vm11, %v1448_v36, %v1480_v56  ;;  %v1497_v24 = vsel %vm1465_vm12, %v1449_v38, %v1481_v58 }
 0x1df   :  { %v1498_v27 = vsel %vm1466_vm13, %v1450_v39, %v1482_v59  ;;  %1507 = vst [vmem:[%s2572_s5 + $0x30] sm:$0xff] %v1491_v46  ;;  %1508 = vst [vmem:[%s2572_s5 + $0x38] sm:$0xff] %v1492_v51  ;;  %v1499_v25 = vsel %vm1467_vm14, %v1451_v40, %v1483_v60  ;;  %v1500_v3 = vsel %vm1468_vm15, %v1452_v41, %v1484_v61 }
 0x1e0   :  { %1509 = vst [vmem:[%s2572_s5 + $0x40] sm:$0xff] %v1493_v22  ;;  %1510 = vst [vmem:[%s2572_s5 + $0x48] sm:$0xff] %v1494_v5 }
 0x1e1   :  { %1511 = vst [vmem:[%s2572_s5 + $0x50] sm:$0xff] %v1495_v23  ;;  %1512 = vst [vmem:[%s2572_s5 + $0x58] sm:$0xff] %v1496_v9 }
 0x1e2   :  { %1513 = vst [vmem:[%s2572_s5 + $0x60] sm:$0xff] %v1497_v24  ;;  %1514 = vst [vmem:[%s2572_s5 + $0x68] sm:$0xff] %v1498_v27 }
 0x1e3   :  { %1515 = vst [vmem:[%s2572_s5 + $0x70] sm:$0xff] %v1499_v25  ;;  %1516 = vst [vmem:[%s2572_s5 + $0x78] sm:$0xff] %v1500_v3 }

// kernel: dx_forward.6
= control target key start
LH: loop header
LB: loop body
LE: loop exit
PB: predicated region body
PF: predicated region fallthrough
CT: control target
= control target key end

     0   :  { %s4057_s1 = inlined_call_operand.vmem [shape: bf16[2048,256], index: 1, kind: input, shape index: {}]   ;;  %s4058_s0 = inlined_call_operand.vmem [shape: bf16[32,2048], index: 0, kind: input, shape index: {}]   ;;  %s4059_s2 = inlined_call_operand.vmem [shape: f32[1,256], index: 2, kind: input, shape index: {}]   ;;  %s4060_s3 = inlined_call_operand.vmem [shape: f32[1,256], index: 3, kind: input, shape index: {}]   ;;  %s4061_s4 = inlined_call_operand.vmem [shape: f32[1,256], index: 4, kind: input, shape index: {}]   ;;  %s4062_s5 = inlined_call_operand.vmem [shape: f32[32,256], index: 5, kind: output, shape index: {}]  }
   0x1   :  { %v2681_v0 = vld [vmem:[%s4057_s1 + $0x4] ss:$8 sps:$4 sm:$0xff]   ;;  %v2685_v2 = vld [vmem:[%s4057_s1] ss:$8 sps:$4 sm:$0xff]   ;;  %v2687_v4 = vld [vmem:[%s4057_s1 + $0x14] ss:$8 sps:$4 sm:$0xff]  }
   0x2   :  { %v2683_v1 = vld [vmem:[%s4057_s1 + $0x404] ss:$8 sps:$4 sm:$0xff]   ;;  %1760 = vmatprep.subr.bf16.mxu1 %v2681_v0  ;;  %v2686_v3 = vld [vmem:[%s4057_s1 + $0x400] ss:$8 sps:$4 sm:$0xff]   ;;  %v2689_v5 = vld [vmem:[%s4057_s1 + $0x414] ss:$8 sps:$4 sm:$0xff]  }
   0x3   :  { %1972 = vmatprep.subr.bf16.mxu0 %v2683_v1  ;;  %1761 = vmatpush1.bf16.msra.mxu1 %v2685_v2  ;;  %v2691_v6 = vld [vmem:[%s4057_s1 + $0x10] ss:$8 sps:$4 sm:$0xff]   ;;  %v2693_v8 = vld [vmem:[%s4057_s1 + $0x24] ss:$8 sps:$4 sm:$0xff]   ;;  %v2697_v10 = vld [vmem:[%s4057_s1 + $0x20] ss:$8 sps:$4 sm:$0xff]  }
   0x4   :  { %1973 = vmatpush1.bf16.msra.mxu0 %v2686_v3  ;;  %1762 = vmatprep.subr.bf16.mxu1 %v2687_v4  ;;  %v2692_v7 = vld [vmem:[%s4057_s1 + $0x410] ss:$8 sps:$4 sm:$0xff]   ;;  %v2695_v9 = vld [vmem:[%s4057_s1 + $0x424] ss:$8 sps:$4 sm:$0xff]   ;;  %v2698_v11 = vld [vmem:[%s4057_s1 + $0x420] ss:$8 sps:$4 sm:$0xff]  }
   0x5   :  { %1974 = vmatprep.subr.bf16.mxu0 %v2689_v5  ;;  %v2699_v12 = vld [vmem:[%s4057_s1 + $0x34] ss:$8 sps:$4 sm:$0xff]   ;;  %v2703_v14 = vld [vmem:[%s4057_s1 + $0x30] ss:$8 sps:$4 sm:$0xff]   ;;  %v2705_v16 = vld [vmem:[%s4057_s1 + $0x44] ss:$8 sps:$4 sm:$0xff]  }
   0x6   :  { %v2701_v13 = vld [vmem:[%s4057_s1 + $0x434] ss:$8 sps:$4 sm:$0xff]   ;;  %v2704_v15 = vld [vmem:[%s4057_s1 + $0x430] ss:$8 sps:$4 sm:$0xff]   ;;  %v2707_v17 = vld [vmem:[%s4057_s1 + $0x444] ss:$8 sps:$4 sm:$0xff]  }
   0x7   :  { %1763 = vmatpush1.bf16.msra.mxu1 %v2691_v6  ;;  %v2709_v18 = vld [vmem:[%s4057_s1 + $0x40] ss:$8 sps:$4 sm:$0xff]   ;;  %v2711_v20 = vld [vmem:[%s4057_s1 + $0x54] ss:$8 sps:$4 sm:$0xff]   ;;  %v2715_v22 = vld [vmem:[%s4057_s1 + $0x50] ss:$8 sps:$4 sm:$0xff]  }
   0x8   :  { %1975 = vmatpush1.bf16.msra.mxu0 %v2692_v7  ;;  %1764 = vmatprep.subr.bf16.mxu1 %v2693_v8  ;;  %v2710_v19 = vld [vmem:[%s4057_s1 + $0x440] ss:$8 sps:$4 sm:$0xff]   ;;  %v2713_v21 = vld [vmem:[%s4057_s1 + $0x454] ss:$8 sps:$4 sm:$0xff]   ;;  %v2716_v23 = vld [vmem:[%s4057_s1 + $0x450] ss:$8 sps:$4 sm:$0xff]  }
   0x9   :  { %1976 = vmatprep.subr.bf16.mxu0 %v2695_v9  ;;  %v2717_v24 = vld [vmem:[%s4057_s1 + $0x64] ss:$8 sps:$4 sm:$0xff]   ;;  %v2721_v26 = vld [vmem:[%s4057_s1 + $0x60] ss:$8 sps:$4 sm:$0xff]   ;;  %v2723_v28 = vld [vmem:[%s4057_s1 + $0x74] ss:$8 sps:$4 sm:$0xff]  }
   0xa   :  { %v2719_v25 = vld [vmem:[%s4057_s1 + $0x464] ss:$8 sps:$4 sm:$0xff]   ;;  %v2722_v27 = vld [vmem:[%s4057_s1 + $0x460] ss:$8 sps:$4 sm:$0xff]   ;;  %v2725_v29 = vld [vmem:[%s4057_s1 + $0x474] ss:$8 sps:$4 sm:$0xff]  }
   0xb   :  { %1765 = vmatpush1.bf16.msra.mxu1 %v2697_v10  ;;  %v2727_v30 = vld [vmem:[%s4057_s1 + $0x70] ss:$8 sps:$4 sm:$0xff]   ;;  %v2729_v32 = vld [vmem:[%s4057_s1 + $0x84] ss:$8 sps:$4 sm:$0xff]   ;;  %v2733_v34 = vld [vmem:[%s4057_s1 + $0x80] ss:$8 sps:$4 sm:$0xff]  }
   0xc   :  { %1977 = vmatpush1.bf16.msra.mxu0 %v2698_v11  ;;  %1766 = vmatprep.subr.bf16.mxu1 %v2699_v12  ;;  %v2728_v31 = vld [vmem:[%s4057_s1 + $0x470] ss:$8 sps:$4 sm:$0xff]   ;;  %v2731_v33 = vld [vmem:[%s4057_s1 + $0x484] ss:$8 sps:$4 sm:$0xff]   ;;  %v2734_v35 = vld [vmem:[%s4057_s1 + $0x480] ss:$8 sps:$4 sm:$0xff]  }
   0xd   :  { %1978 = vmatprep.subr.bf16.mxu0 %v2701_v13  ;;  %v2735_v36 = vld [vmem:[%s4057_s1 + $0x94] ss:$8 sps:$4 sm:$0xff]   ;;  %v2739_v38 = vld [vmem:[%s4057_s1 + $0x90] ss:$8 sps:$4 sm:$0xff]   ;;  %v2741_v40 = vld [vmem:[%s4057_s1 + $0xa4] ss:$8 sps:$4 sm:$0xff]  }
   0xe   :  { %v2737_v37 = vld [vmem:[%s4057_s1 + $0x494] ss:$8 sps:$4 sm:$0xff]   ;;  %v2740_v39 = vld [vmem:[%s4057_s1 + $0x490] ss:$8 sps:$4 sm:$0xff]   ;;  %v2743_v41 = vld [vmem:[%s4057_s1 + $0x4a4] ss:$8 sps:$4 sm:$0xff]  }
   0xf   :  { %1767 = vmatpush1.bf16.msra.mxu1 %v2703_v14  ;;  %v2745_v42 = vld [vmem:[%s4057_s1 + $0xa0] ss:$8 sps:$4 sm:$0xff]   ;;  %v2747_v44 = vld [vmem:[%s4057_s1 + $0xb4] ss:$8 sps:$4 sm:$0xff]   ;;  %v2751_v46 = vld [vmem:[%s4057_s1 + $0xb0] ss:$8 sps:$4 sm:$0xff]  }
  0x10   :  { %1979 = vmatpush1.bf16.msra.mxu0 %v2704_v15  ;;  %1768 = vmatprep.subr.bf16.mxu1 %v2705_v16  ;;  %v2746_v43 = vld [vmem:[%s4057_s1 + $0x4a0] ss:$8 sps:$4 sm:$0xff]   ;;  %v2749_v45 = vld [vmem:[%s4057_s1 + $0x4b4] ss:$8 sps:$4 sm:$0xff]   ;;  %v2752_v47 = vld [vmem:[%s4057_s1 + $0x4b0] ss:$8 sps:$4 sm:$0xff]  }
  0x11   :  { %1980 = vmatprep.subr.bf16.mxu0 %v2707_v17  ;;  %v20_v48 = vld [vmem:[%s4058_s0] sm:$0xff]  ;;  %v2759_v58 = vld [vmem:[%s4057_s1 + $0xd4] ss:$8 sps:$4 sm:$0xff]   ;;  %v2763_v60 = vld [vmem:[%s4057_s1 + $0xd0] ss:$8 sps:$4 sm:$0xff]  }
  0x12   :  { %v28_v49 = vld [vmem:[%s4058_s0 + $0x40] sm:$0xff]  ;;  %v2761_v59 = vld [vmem:[%s4057_s1 + $0x4d4] ss:$8 sps:$4 sm:$0xff]   ;;  %v2764_v61 = vld [vmem:[%s4057_s1 + $0x4d0] ss:$8 sps:$4 sm:$0xff]  }
  0x13   :  { %1769 = vmatpush1.bf16.msra.mxu1 %v2709_v18  ;;  %v2753_v50 = vld [vmem:[%s4057_s1 + $0xc4] ss:$8 sps:$4 sm:$0xff]   ;;  %v2330_v52 = vcombine.high %v20_v48, %v28_v49  ;;  %v2757_v56 = vld [vmem:[%s4057_s1 + $0xc0] ss:$8 sps:$4 sm:$0xff]   ;;  %v2771_v2 = vld [vmem:[%s4057_s1 + $0xf4] ss:$8 sps:$4 sm:$0xff]   ;;  %v2329_v8 = vcombine.low %v20_v48, %v28_v49 }
  0x14   :  { %1981 = vmatpush1.bf16.msra.mxu0 %v2710_v19  ;;  %1770 = vmatprep.subr.bf16.mxu1 %v2711_v20  ;;  %v2755_v51 = vld [vmem:[%s4057_s1 + $0x4c4] ss:$8 sps:$4 sm:$0xff]   ;;  %v2758_v57 = vld [vmem:[%s4057_s1 + $0x4c0] ss:$8 sps:$4 sm:$0xff]   ;;  %v2773_v3 = vld [vmem:[%s4057_s1 + $0x4f4] ss:$8 sps:$4 sm:$0xff]  }
  0x15   :  { %1982 = vmatprep.subr.bf16.mxu0 %v2713_v21  ;;  %v24_v53 = vld [vmem:[%s4058_s0 + $0x20] sm:$0xff]  ;;  %1792 = vmatprep.mubr.bf16.mxu1 %v2330_v52  ;;  %v2775_v4 = vld [vmem:[%s4057_s1 + $0xf0] ss:$8 sps:$4 sm:$0xff]   ;;  %v2785_v12 = vld [vmem:[%s4057_s1 + $0x114] ss:$8 sps:$4 sm:$0xff]  }
  0x16   :  { %v32_v54 = vld [vmem:[%s4058_s0 + $0x60] sm:$0xff]  ;;  %v2776_v5 = vld [vmem:[%s4057_s1 + $0x4f0] ss:$8 sps:$4 sm:$0xff]   ;;  %v2788_v13 = vld [vmem:[%s4057_s1 + $0x514] ss:$8 sps:$4 sm:$0xff]  }
  0x17   :  { %1771 = vmatpush1.bf16.msra.mxu1 %v2715_v22  ;;  %v2338_v55 = vcombine.high %v24_v53, %v32_v54  ;;  %v2765_v62 = vld [vmem:[%s4057_s1 + $0xe4] ss:$8 sps:$4 sm:$0xff]   ;;  %v2769_v0 = vld [vmem:[%s4057_s1 + $0xe0] ss:$8 sps:$4 sm:$0xff]   ;;  %v2337_v10 = vcombine.low %v24_v53, %v32_v54  ;;  %v2783_v14 = vld [vmem:[%s4057_s1 + $0x110] ss:$8 sps:$4 sm:$0xff]  }
  0x18   :  { %1983 = vmatpush1.bf16.msra.mxu0 %v2716_v23  ;;  %1772 = vmatprep.subr.bf16.mxu1 %v2717_v24  ;;  %v2767_v63 = vld [vmem:[%s4057_s1 + $0x4e4] ss:$8 sps:$4 sm:$0xff]   ;;  %v2770_v1 = vld [vmem:[%s4057_s1 + $0x4e0] ss:$8 sps:$4 sm:$0xff]   ;;  %v2786_v15 = vld [vmem:[%s4057_s1 + $0x510] ss:$8 sps:$4 sm:$0xff]  }
  0x19   :  { %1984 = vmatprep.subr.bf16.mxu0 %v2719_v25  ;;  %2004 = vmatprep.mubr.bf16.mxu0 %v2338_v55  ;;  %v2779_v6 = vld [vmem:[%s4057_s1 + $0x104] ss:$8 sps:$4 sm:$0xff]   ;;  %v2777_v9 = vld [vmem:[%s4057_s1 + $0x100] ss:$8 sps:$4 sm:$0xff]   ;;  %v2797_v20 = vld [vmem:[%s4057_s1 + $0x134] ss:$8 sps:$4 sm:$0xff]  }
  0x1a   :  { %v2782_v7 = vld [vmem:[%s4057_s1 + $0x504] ss:$8 sps:$4 sm:$0xff]   ;;  %v2780_v11 = vld [vmem:[%s4057_s1 + $0x500] ss:$8 sps:$4 sm:$0xff]   ;;  %v2800_v21 = vld [vmem:[%s4057_s1 + $0x534] ss:$8 sps:$4 sm:$0xff]  }
  0x1b   :  { %1773 = vmatpush1.bf16.msra.mxu1 %v2721_v26  ;;  %v2791_v16 = vld [vmem:[%s4057_s1 + $0x124] ss:$8 sps:$4 sm:$0xff]   ;;  %v2789_v18 = vld [vmem:[%s4057_s1 + $0x120] ss:$8 sps:$4 sm:$0xff]   ;;  %v2795_v22 = vld [vmem:[%s4057_s1 + $0x130] ss:$8 sps:$4 sm:$0xff]  }
  0x1c   :  { %1985 = vmatpush1.bf16.msra.mxu0 %v2722_v27  ;;  %1774 = vmatprep.subr.bf16.mxu1 %v2723_v28  ;;  %v2794_v17 = vld [vmem:[%s4057_s1 + $0x524] ss:$8 sps:$4 sm:$0xff]   ;;  %v2792_v19 = vld [vmem:[%s4057_s1 + $0x520] ss:$8 sps:$4 sm:$0xff]   ;;  %v2798_v23 = vld [vmem:[%s4057_s1 + $0x530] ss:$8 sps:$4 sm:$0xff]  }
  0x1d   :  { %1986 = vmatprep.subr.bf16.mxu0 %v2725_v29  ;;  %v2803_v24 = vld [vmem:[%s4057_s1 + $0x144] ss:$8 sps:$4 sm:$0xff]   ;;  %v2801_v26 = vld [vmem:[%s4057_s1 + $0x140] ss:$8 sps:$4 sm:$0xff]   ;;  %v2809_v28 = vld [vmem:[%s4057_s1 + $0x154] ss:$8 sps:$4 sm:$0xff]  }
  0x1e   :  { %v2806_v25 = vld [vmem:[%s4057_s1 + $0x544] ss:$8 sps:$4 sm:$0xff]   ;;  %v2804_v27 = vld [vmem:[%s4057_s1 + $0x540] ss:$8 sps:$4 sm:$0xff]   ;;  %v2812_v29 = vld [vmem:[%s4057_s1 + $0x554] ss:$8 sps:$4 sm:$0xff]  }
  0x1f   :  { %1775 = vmatpush1.bf16.msra.mxu1 %v2727_v30  ;;  %v36_v30 = vld [vmem:[%s4058_s0 + $0x80] sm:$0xff]  ;;  %v3420_v49 = vld [vmem:[%s4058_s0 + $0x28] sm:$0xff]  ;;  %v2822_v52 = vld [vmem:[%s4057_s1 + $0x570] ss:$8 sps:$4 sm:$0xff]  }
  0x20   :  { %1987 = vmatpush1.bf16.msra.mxu0 %v2728_v31  ;;  %1776 = vmatprep.subr.bf16.mxu1 %v2729_v32  ;;  %v44_v31 = vld [vmem:[%s4058_s0 + $0xc0] sm:$0xff]  ;;  %v2807_v32 = vld [vmem:[%s4057_s1 + $0x150] ss:$8 sps:$4 sm:$0xff]  }
  0x21   :  { %1988 = vmatprep.subr.bf16.mxu0 %v2731_v33  ;;  %v2346_v33 = vcombine.high %v36_v30, %v44_v31  ;;  %v2827_v54 = vld [vmem:[%s4057_s1 + $0x184] ss:$8 sps:$4 sm:$0xff]  }
  0x22   :  { %v2830_v55 = vld [vmem:[%s4057_s1 + $0x584] ss:$8 sps:$4 sm:$0xff]  }
  0x23   :  { %1777 = vmatpush1.bf16.msra.mxu1 %v2733_v34  ;;  %v2810_v34 = vld [vmem:[%s4057_s1 + $0x550] ss:$8 sps:$4 sm:$0xff]  }
  0x24   :  { %1989 = vmatpush1.bf16.msra.mxu0 %v2734_v35  ;;  %1778 = vmatprep.subr.bf16.mxu1 %v2735_v36  ;;  %v40_v35 = vld [vmem:[%s4058_s0 + $0xa0] sm:$0xff] }
  0x25   :  { %1990 = vmatprep.subr.bf16.mxu0 %v2737_v37  ;;  %v48_v36 = vld [vmem:[%s4058_s0 + $0xe0] sm:$0xff]  ;;  %v2345_v37 = vcombine.low %v36_v30, %v44_v31  ;;  %v2881_v30 = vld [vmem:[%s4057_s1 + $0x214] ss:$8 sps:$4 sm:$0xff]  }
  0x26   :  { %v2884_v31 = vld [vmem:[%s4057_s1 + $0x614] ss:$8 sps:$4 sm:$0xff]  }
  0x27   :  { %1779 = vmatpush1.bf16.msra.mxu1 %v2739_v38  ;;  %v2815_v38 = vld [vmem:[%s4057_s1 + $0x164] ss:$8 sps:$4 sm:$0xff]  }
  0x28   :  { %1991 = vmatpush1.bf16.msra.mxu0 %v2740_v39  ;;  %1780 = vmatprep.subr.bf16.mxu1 %v2741_v40  ;;  %v2354_v39 = vcombine.high %v40_v35, %v48_v36  ;;  %v2353_v40 = vcombine.low %v40_v35, %v48_v36  ;;  %v2879_v36 = vld [vmem:[%s4057_s1 + $0x210] ss:$8 sps:$4 sm:$0xff]  }
  0x29   :  { %1992 = vmatprep.subr.bf16.mxu0 %v2743_v41  ;;  %v2818_v41 = vld [vmem:[%s4057_s1 + $0x564] ss:$8 sps:$4 sm:$0xff]  }
  0x2b   :  { %1781 = vmatpush1.bf16.msra.mxu1 %v2745_v42  ;;  %v2813_v42 = vld [vmem:[%s4057_s1 + $0x160] ss:$8 sps:$4 sm:$0xff]  }
  0x2c   :  { %1993 = vmatpush1.bf16.msra.mxu0 %v2746_v43  ;;  %1782 = vmatprep.subr.bf16.mxu1 %v2747_v44  ;;  %v2816_v43 = vld [vmem:[%s4057_s1 + $0x560] ss:$8 sps:$4 sm:$0xff]  }
  0x2d   :  { %1994 = vmatprep.subr.bf16.mxu0 %v2749_v45  ;;  %v3402_v44 = vld [vmem:[%s4058_s0 + $0x8] sm:$0xff] }
  0x2e   :  { %v3407_v45 = vld [vmem:[%s4058_s0 + $0x48] sm:$0xff] }
  0x2f   :  { %1783 = vmatpush1.bf16.msra.mxu1 %v2751_v46  ;;  %v2821_v46 = vld [vmem:[%s4057_s1 + $0x174] ss:$8 sps:$4 sm:$0xff]   ;;  %v2332_v48 = vcombine.high %v3402_v44, %v3407_v45 }
  0x30   :  { %1995 = vmatpush1.bf16.msra.mxu0 %v2752_v47  ;;  %1784 = vmatprep.subr.bf16.mxu1 %v2753_v50  ;;  %v2824_v47 = vld [vmem:[%s4057_s1 + $0x574] ss:$8 sps:$4 sm:$0xff]   ;;  %v3425_v50 = vld [vmem:[%s4058_s0 + $0x68] sm:$0xff] }
  0x31   :  { %1996 = vmatprep.subr.bf16.mxu0 %v2755_v51  ;;  %v2819_v51 = vld [vmem:[%s4057_s1 + $0x170] ss:$8 sps:$4 sm:$0xff]   ;;  %v2340_v53 = vcombine.high %v3420_v49, %v3425_v50 }
  0x33   :  { %1785 = vmatpush1.bf16.msra.mxu1 %v2757_v56  ;;  %v2825_v56 = vld [vmem:[%s4057_s1 + $0x180] ss:$8 sps:$4 sm:$0xff]  }
  0x34   :  { %1997 = vmatpush1.bf16.msra.mxu0 %v2758_v57  ;;  %1786 = vmatprep.subr.bf16.mxu1 %v2759_v58  ;;  %v2828_v57 = vld [vmem:[%s4057_s1 + $0x580] ss:$8 sps:$4 sm:$0xff]   ;;  %v2833_v58 = vld [vmem:[%s4057_s1 + $0x194] ss:$8 sps:$4 sm:$0xff]  }
  0x35   :  { %1998 = vmatprep.subr.bf16.mxu0 %v2761_v59  ;;  %v2836_v59 = vld [vmem:[%s4057_s1 + $0x594] ss:$8 sps:$4 sm:$0xff]  }
  0x37   :  { %1787 = vmatpush1.bf16.msra.mxu1 %v2763_v60  ;;  %v2831_v60 = vld [vmem:[%s4057_s1 + $0x190] ss:$8 sps:$4 sm:$0xff]  }
  0x38   :  { %1999 = vmatpush1.bf16.msra.mxu0 %v2764_v61  ;;  %1788 = vmatprep.subr.bf16.mxu1 %v2765_v62  ;;  %v2834_v61 = vld [vmem:[%s4057_s1 + $0x590] ss:$8 sps:$4 sm:$0xff]   ;;  %v2839_v62 = vld [vmem:[%s4057_s1 + $0x1a4] ss:$8 sps:$4 sm:$0xff]  }
  0x39   :  { %2000 = vmatprep.subr.bf16.mxu0 %v2767_v63  ;;  %v2842_v63 = vld [vmem:[%s4057_s1 + $0x5a4] ss:$8 sps:$4 sm:$0xff]  }
  0x3b   :  { %1789 = vmatpush1.bf16.msra.mxu1 %v2769_v0  ;;  %v2837_v0 = vld [vmem:[%s4057_s1 + $0x1a0] ss:$8 sps:$4 sm:$0xff]  }
  0x3c   :  { %2001 = vmatpush1.bf16.msra.mxu0 %v2770_v1  ;;  %1790 = vmatprep.subr.bf16.mxu1 %v2771_v2  ;;  %v2840_v1 = vld [vmem:[%s4057_s1 + $0x5a0] ss:$8 sps:$4 sm:$0xff]   ;;  %v2845_v2 = vld [vmem:[%s4057_s1 + $0x1b4] ss:$8 sps:$4 sm:$0xff]  }
  0x3d   :  { %2002 = vmatprep.subr.bf16.mxu0 %v2773_v3  ;;  %v2848_v3 = vld [vmem:[%s4057_s1 + $0x5b4] ss:$8 sps:$4 sm:$0xff]  }
  0x3f   :  { %1791 = vmatpush1.bf16.msra.mxu1 %v2775_v4  ;;  %v2843_v4 = vld [vmem:[%s4057_s1 + $0x1b0] ss:$8 sps:$4 sm:$0xff]  }
  0x40   :  { %2003 = vmatpush1.bf16.msra.mxu0 %v2776_v5  ;;  %1813 = vmatprep.subr.bf16.mxu1 %v2779_v6  ;;  %v2846_v5 = vld [vmem:[%s4057_s1 + $0x5b0] ss:$8 sps:$4 sm:$0xff]   ;;  %v2851_v6 = vld [vmem:[%s4057_s1 + $0x1c4] ss:$8 sps:$4 sm:$0xff]  }
  0x41   :  { %2025 = vmatprep.subr.bf16.mxu0 %v2782_v7  ;;  %v2854_v7 = vld [vmem:[%s4057_s1 + $0x5c4] ss:$8 sps:$4 sm:$0xff]  }
  0x42   :  { %1793 = vmatmul.mubr.bf16.vlgmr.msra.gmra.mrb[0].mxu1 %v2329_v8  ;;  %v2849_v8 = vld [vmem:[%s4057_s1 + $0x1c0] ss:$8 sps:$4 sm:$0xff]  }
  0x43   :  { %2005 = vmatmul.mubr.bf16.vlgmr.msra.gmra.mrb[0].mxu0 %v2337_v10  ;;  %1814 = vmatpush1.bf16.msra.mxu1 %v2777_v9  ;;  %v2852_v9 = vld [vmem:[%s4057_s1 + $0x5c0] ss:$8 sps:$4 sm:$0xff]   ;;  %v2857_v10 = vld [vmem:[%s4057_s1 + $0x1d4] ss:$8 sps:$4 sm:$0xff]  }
  0x44   :  { %2026 = vmatpush1.bf16.msra.mxu0 %v2780_v11  ;;  %1815 = vmatprep.subr.bf16.mxu1 %v2785_v12  ;;  %v2860_v11 = vld [vmem:[%s4057_s1 + $0x5d4] ss:$8 sps:$4 sm:$0xff]   ;;  %v2855_v12 = vld [vmem:[%s4057_s1 + $0x1d0] ss:$8 sps:$4 sm:$0xff]  }
  0x45   :  { %2027 = vmatprep.subr.bf16.mxu0 %v2788_v13  ;;  %1802 = vmatprep.mubr.bf16.mxu1 %v2346_v33  ;;  %v2858_v13 = vld [vmem:[%s4057_s1 + $0x5d0] ss:$8 sps:$4 sm:$0xff]   ;;  %v49_v33 = vld [vmem:[%s4058_s0 + $0xe8] sm:$0xff] }
  0x46   :  { %2014 = vmatprep.mubr.bf16.mxu0 %v2354_v39  ;;  %v2890_v39 = vld [vmem:[%s4057_s1 + $0x624] ss:$8 sps:$4 sm:$0xff]  }
  0x47   :  { %1816 = vmatpush1.bf16.msra.mxu1 %v2783_v14  ;;  %v2863_v14 = vld [vmem:[%s4057_s1 + $0x1e4] ss:$8 sps:$4 sm:$0xff]  }
  0x48   :  { %2028 = vmatpush1.bf16.msra.mxu0 %v2786_v15  ;;  %1817 = vmatprep.subr.bf16.mxu1 %v2791_v16  ;;  %v2866_v15 = vld [vmem:[%s4057_s1 + $0x5e4] ss:$8 sps:$4 sm:$0xff]   ;;  %v2861_v16 = vld [vmem:[%s4057_s1 + $0x1e0] ss:$8 sps:$4 sm:$0xff]  }
  0x49   :  { %2029 = vmatprep.subr.bf16.mxu0 %v2794_v17  ;;  %v2864_v17 = vld [vmem:[%s4057_s1 + $0x5e0] ss:$8 sps:$4 sm:$0xff]  }
  0x4a   :  { %1803 = vmatmul.mubr.bf16.gmra.mrb[4].mxu1 %v2345_v37  ;;  %v2882_v37 = vld [vmem:[%s4057_s1 + $0x610] ss:$8 sps:$4 sm:$0xff]  }
  0x4b   :  { %1818 = vmatpush1.bf16.msra.mxu1 %v2789_v18  ;;  %2015 = vmatmul.mubr.bf16.gmra.mrb[4].mxu0 %v2353_v40  ;;  %v2869_v18 = vld [vmem:[%s4057_s1 + $0x1f4] ss:$8 sps:$4 sm:$0xff]   ;;  %v2885_v40 = vld [vmem:[%s4057_s1 + $0x220] ss:$8 sps:$4 sm:$0xff]  }
  0x4c   :  { %2030 = vmatpush1.bf16.msra.mxu0 %v2792_v19  ;;  %1819 = vmatprep.subr.bf16.mxu1 %v2797_v20  ;;  %v2872_v19 = vld [vmem:[%s4057_s1 + $0x5f4] ss:$8 sps:$4 sm:$0xff]   ;;  %v2867_v20 = vld [vmem:[%s4057_s1 + $0x1f0] ss:$8 sps:$4 sm:$0xff]  }
  0x4d   :  { %2031 = vmatprep.subr.bf16.mxu0 %v2800_v21  ;;  %1845 = vmatprep.mubr.bf16.mxu1 %v2332_v48  ;;  %v2870_v21 = vld [vmem:[%s4057_s1 + $0x5f0] ss:$8 sps:$4 sm:$0xff]   ;;  %v2893_v48 = vld [vmem:[%s4057_s1 + $0x234] ss:$8 sps:$4 sm:$0xff]  }
  0x4e   :  { %2057 = vmatprep.mubr.bf16.mxu0 %v2340_v53  ;;  %v2894_v53 = vld [vmem:[%s4057_s1 + $0x630] ss:$8 sps:$4 sm:$0xff]  }
  0x4f   :  { %1820 = vmatpush1.bf16.msra.mxu1 %v2795_v22  ;;  %v2875_v22 = vld [vmem:[%s4057_s1 + $0x204] ss:$8 sps:$4 sm:$0xff]  }
  0x50   :  { %2032 = vmatpush1.bf16.msra.mxu0 %v2798_v23  ;;  %1821 = vmatprep.subr.bf16.mxu1 %v2803_v24  ;;  %v2878_v23 = vld [vmem:[%s4057_s1 + $0x604] ss:$8 sps:$4 sm:$0xff]   ;;  %v2873_v24 = vld [vmem:[%s4057_s1 + $0x200] ss:$8 sps:$4 sm:$0xff]  }
  0x51   :  { %2033 = vmatprep.subr.bf16.mxu0 %v2806_v25  ;;  %v2876_v25 = vld [vmem:[%s4057_s1 + $0x600] ss:$8 sps:$4 sm:$0xff]  }
  0x53   :  { %1822 = vmatpush1.bf16.msra.mxu1 %v2801_v26  ;;  %v37_v26 = vld [vmem:[%s4058_s0 + $0x88] sm:$0xff] }
  0x54   :  { %2034 = vmatpush1.bf16.msra.mxu0 %v2804_v27  ;;  %1823 = vmatprep.subr.bf16.mxu1 %v2809_v28  ;;  %v2331_v27 = vcombine.low %v3402_v44, %v3407_v45  ;;  %v2339_v28 = vcombine.low %v3420_v49, %v3425_v50  ;;  %v3591_v45 = vld [vmem:[%s4058_s0 + $0x50] sm:$0xff] }
  0x55   :  { %2035 = vmatprep.subr.bf16.mxu0 %v2812_v29  ;;  %v45_v29 = vld [vmem:[%s4058_s0 + $0xc8] sm:$0xff]  ;;  %v2896_v49 = vld [vmem:[%s4057_s1 + $0x634] ss:$8 sps:$4 sm:$0xff]  }
  0x57   :  { %1824 = vmatpush1.bf16.msra.mxu1 %v2807_v32  ;;  %v41_v32 = vld [vmem:[%s4058_s0 + $0xa8] sm:$0xff] }
  0x58   :  { %2036 = vmatpush1.bf16.msra.mxu0 %v2810_v34  ;;  %1825 = vmatprep.subr.bf16.mxu1 %v2815_v38  ;;  %v2348_v34 = vcombine.high %v37_v26, %v45_v29  ;;  %v2356_v35 = vcombine.high %v41_v32, %v49_v33  ;;  %v2887_v38 = vld [vmem:[%s4057_s1 + $0x224] ss:$8 sps:$4 sm:$0xff]   ;;  %v2355_v44 = vcombine.low %v41_v32, %v49_v33  ;;  %v2957_v32 = vld [vmem:[%s4057_s1 + $0x2e0] ss:$8 sps:$4 sm:$0xff]  }
  0x59   :  { %2037 = vmatprep.subr.bf16.mxu0 %v2818_v41  ;;  %v2888_v41 = vld [vmem:[%s4057_s1 + $0x620] ss:$8 sps:$4 sm:$0xff]  }
  0x5a   :  { %v2960_v33 = vld [vmem:[%s4057_s1 + $0x6e0] ss:$8 sps:$4 sm:$0xff]  }
  0x5b   :  { %1826 = vmatpush1.bf16.msra.mxu1 %v2813_v42  ;;  %v3586_v42 = vld [vmem:[%s4058_s0 + $0x10] sm:$0xff] }
  0x5c   :  { %2038 = vmatpush1.bf16.msra.mxu0 %v2816_v43  ;;  %1827 = vmatprep.subr.bf16.mxu1 %v2821_v46  ;;  %v2347_v43 = vcombine.low %v37_v26, %v45_v29  ;;  %v3596_v46 = vld [vmem:[%s4058_s0 + $0x30] sm:$0xff]  ;;  %v2334_v50 = vcombine.high %v3586_v42, %v3591_v45 }
  0x5d   :  { %2039 = vmatprep.subr.bf16.mxu0 %v2824_v47  ;;  %v3601_v47 = vld [vmem:[%s4058_s0 + $0x70] sm:$0xff] }
  0x5e   :  { %v2953_v26 = vld [vmem:[%s4057_s1 + $0x2d4] ss:$8 sps:$4 sm:$0xff]   ;;  %v2954_v29 = vld [vmem:[%s4057_s1 + $0x6d0] ss:$8 sps:$4 sm:$0xff]  }
  0x5f   :  { %1828 = vmatpush1.bf16.msra.mxu1 %v2819_v51  ;;  %v2342_v51 = vcombine.high %v3596_v46, %v3601_v47 }
  0x60   :  { %2040 = vmatpush1.bf16.msra.mxu0 %v2822_v52  ;;  %1829 = vmatprep.subr.bf16.mxu1 %v2827_v54  ;;  %v2891_v52 = vld [vmem:[%s4057_s1 + $0x230] ss:$8 sps:$4 sm:$0xff]   ;;  %v2899_v54 = vld [vmem:[%s4057_s1 + $0x244] ss:$8 sps:$4 sm:$0xff]  }
  0x61   :  { %2041 = vmatprep.subr.bf16.mxu0 %v2830_v55  ;;  %v2902_v55 = vld [vmem:[%s4057_s1 + $0x644] ss:$8 sps:$4 sm:$0xff]  }
  0x63   :  { %1830 = vmatpush1.bf16.msra.mxu1 %v2825_v56  ;;  %v2897_v56 = vld [vmem:[%s4057_s1 + $0x240] ss:$8 sps:$4 sm:$0xff]  }
  0x64   :  { %2042 = vmatpush1.bf16.msra.mxu0 %v2828_v57  ;;  %1831 = vmatprep.subr.bf16.mxu1 %v2833_v58  ;;  %v2900_v57 = vld [vmem:[%s4057_s1 + $0x640] ss:$8 sps:$4 sm:$0xff]   ;;  %v2905_v58 = vld [vmem:[%s4057_s1 + $0x254] ss:$8 sps:$4 sm:$0xff]  }
  0x65   :  { %2043 = vmatprep.subr.bf16.mxu0 %v2836_v59  ;;  %v2908_v59 = vld [vmem:[%s4057_s1 + $0x654] ss:$8 sps:$4 sm:$0xff]  }
  0x67   :  { %1832 = vmatpush1.bf16.msra.mxu1 %v2831_v60  ;;  %v2903_v60 = vld [vmem:[%s4057_s1 + $0x250] ss:$8 sps:$4 sm:$0xff]  }
  0x68   :  { %2044 = vmatpush1.bf16.msra.mxu0 %v2834_v61  ;;  %1833 = vmatprep.subr.bf16.mxu1 %v2839_v62  ;;  %v2906_v61 = vld [vmem:[%s4057_s1 + $0x650] ss:$8 sps:$4 sm:$0xff]   ;;  %v2911_v62 = vld [vmem:[%s4057_s1 + $0x264] ss:$8 sps:$4 sm:$0xff]  }
  0x69   :  { %2045 = vmatprep.subr.bf16.mxu0 %v2842_v63  ;;  %v2914_v63 = vld [vmem:[%s4057_s1 + $0x664] ss:$8 sps:$4 sm:$0xff]  }
  0x6b   :  { %1834 = vmatpush1.bf16.msra.mxu1 %v2837_v0  ;;  %v2909_v0 = vld [vmem:[%s4057_s1 + $0x260] ss:$8 sps:$4 sm:$0xff]  }
  0x6c   :  { %2046 = vmatpush1.bf16.msra.mxu0 %v2840_v1  ;;  %1835 = vmatprep.subr.bf16.mxu1 %v2845_v2  ;;  %v2912_v1 = vld [vmem:[%s4057_s1 + $0x660] ss:$8 sps:$4 sm:$0xff]   ;;  %v2917_v2 = vld [vmem:[%s4057_s1 + $0x274] ss:$8 sps:$4 sm:$0xff]  }
  0x6d   :  { %2047 = vmatprep.subr.bf16.mxu0 %v2848_v3  ;;  %v2920_v3 = vld [vmem:[%s4057_s1 + $0x674] ss:$8 sps:$4 sm:$0xff]  }
  0x6f   :  { %1836 = vmatpush1.bf16.msra.mxu1 %v2843_v4  ;;  %v2915_v4 = vld [vmem:[%s4057_s1 + $0x270] ss:$8 sps:$4 sm:$0xff]  }
  0x70   :  { %2048 = vmatpush1.bf16.msra.mxu0 %v2846_v5  ;;  %1837 = vmatprep.subr.bf16.mxu1 %v2851_v6  ;;  %v2918_v5 = vld [vmem:[%s4057_s1 + $0x670] ss:$8 sps:$4 sm:$0xff]   ;;  %v2923_v6 = vld [vmem:[%s4057_s1 + $0x284] ss:$8 sps:$4 sm:$0xff]  }
  0x71   :  { %2049 = vmatprep.subr.bf16.mxu0 %v2854_v7  ;;  %v2926_v7 = vld [vmem:[%s4057_s1 + $0x684] ss:$8 sps:$4 sm:$0xff]  }
  0x73   :  { %1838 = vmatpush1.bf16.msra.mxu1 %v2849_v8  ;;  %v2921_v8 = vld [vmem:[%s4057_s1 + $0x280] ss:$8 sps:$4 sm:$0xff]  }
  0x74   :  { %2050 = vmatpush1.bf16.msra.mxu0 %v2852_v9  ;;  %1839 = vmatprep.subr.bf16.mxu1 %v2857_v10  ;;  %v2924_v9 = vld [vmem:[%s4057_s1 + $0x680] ss:$8 sps:$4 sm:$0xff]   ;;  %v2929_v10 = vld [vmem:[%s4057_s1 + $0x294] ss:$8 sps:$4 sm:$0xff]  }
  0x75   :  { %2051 = vmatprep.subr.bf16.mxu0 %v2860_v11  ;;  %v2932_v11 = vld [vmem:[%s4057_s1 + $0x694] ss:$8 sps:$4 sm:$0xff]  }
  0x77   :  { %1840 = vmatpush1.bf16.msra.mxu1 %v2855_v12  ;;  %v2927_v12 = vld [vmem:[%s4057_s1 + $0x290] ss:$8 sps:$4 sm:$0xff]  }
  0x78   :  { %2052 = vmatpush1.bf16.msra.mxu0 %v2858_v13  ;;  %1841 = vmatprep.subr.bf16.mxu1 %v2863_v14  ;;  %v2930_v13 = vld [vmem:[%s4057_s1 + $0x690] ss:$8 sps:$4 sm:$0xff]   ;;  %v2935_v14 = vld [vmem:[%s4057_s1 + $0x2a4] ss:$8 sps:$4 sm:$0xff]  }
  0x79   :  { %2053 = vmatprep.subr.bf16.mxu0 %v2866_v15  ;;  %v2938_v15 = vld [vmem:[%s4057_s1 + $0x6a4] ss:$8 sps:$4 sm:$0xff]  }
  0x7b   :  { %1842 = vmatpush1.bf16.msra.mxu1 %v2861_v16  ;;  %v2933_v16 = vld [vmem:[%s4057_s1 + $0x2a0] ss:$8 sps:$4 sm:$0xff]  }
  0x7c   :  { %2054 = vmatpush1.bf16.msra.mxu0 %v2864_v17  ;;  %1843 = vmatprep.subr.bf16.mxu1 %v2869_v18  ;;  %v2936_v17 = vld [vmem:[%s4057_s1 + $0x6a0] ss:$8 sps:$4 sm:$0xff]   ;;  %v2941_v18 = vld [vmem:[%s4057_s1 + $0x2b4] ss:$8 sps:$4 sm:$0xff]  }
  0x7d   :  { %2055 = vmatprep.subr.bf16.mxu0 %v2872_v19  ;;  %v2944_v19 = vld [vmem:[%s4057_s1 + $0x6b4] ss:$8 sps:$4 sm:$0xff]  }
  0x7f   :  { %1844 = vmatpush1.bf16.msra.mxu1 %v2867_v20  ;;  %v2939_v20 = vld [vmem:[%s4057_s1 + $0x2b0] ss:$8 sps:$4 sm:$0xff]  }
  0x80   :  { %2056 = vmatpush1.bf16.msra.mxu0 %v2870_v21  ;;  %1866 = vmatprep.subr.bf16.mxu1 %v2875_v22  ;;  %v2942_v21 = vld [vmem:[%s4057_s1 + $0x6b0] ss:$8 sps:$4 sm:$0xff]   ;;  %v2947_v22 = vld [vmem:[%s4057_s1 + $0x2c4] ss:$8 sps:$4 sm:$0xff]  }
  0x81   :  { %2078 = vmatprep.subr.bf16.mxu0 %v2878_v23  ;;  %v2950_v23 = vld [vmem:[%s4057_s1 + $0x6c4] ss:$8 sps:$4 sm:$0xff]  }
  0x82   :  { %1846 = vmatmul.mubr.bf16.vlgmr.msra.gmra.mrb[0].mxu1 %v2331_v27  ;;  %v2956_v27 = vld [vmem:[%s4057_s1 + $0x6d4] ss:$8 sps:$4 sm:$0xff]  }
  0x83   :  { %2058 = vmatmul.mubr.bf16.vlgmr.msra.gmra.mrb[0].mxu0 %v2339_v28  ;;  %1867 = vmatpush1.bf16.msra.mxu1 %v2873_v24  ;;  %v2945_v24 = vld [vmem:[%s4057_s1 + $0x2c0] ss:$8 sps:$4 sm:$0xff]   ;;  %v2951_v28 = vld [vmem:[%s4057_s1 + $0x2d0] ss:$8 sps:$4 sm:$0xff]  }
  0x84   :  { %2079 = vmatpush1.bf16.msra.mxu0 %v2876_v25  ;;  %1868 = vmatprep.subr.bf16.mxu1 %v2881_v30  ;;  %v2948_v25 = vld [vmem:[%s4057_s1 + $0x6c0] ss:$8 sps:$4 sm:$0xff]   ;;  %v2959_v30 = vld [vmem:[%s4057_s1 + $0x2e4] ss:$8 sps:$4 sm:$0xff]  }
  0x85   :  { %2080 = vmatprep.subr.bf16.mxu0 %v2884_v31  ;;  %1855 = vmatprep.mubr.bf16.mxu1 %v2348_v34  ;;  %v2962_v31 = vld [vmem:[%s4057_s1 + $0x6e4] ss:$8 sps:$4 sm:$0xff]   ;;  %v2965_v34 = vld [vmem:[%s4057_s1 + $0x2f4] ss:$8 sps:$4 sm:$0xff]  }
  0x86   :  { %2067 = vmatprep.mubr.bf16.mxu0 %v2356_v35  ;;  %v2968_v35 = vld [vmem:[%s4057_s1 + $0x6f4] ss:$8 sps:$4 sm:$0xff]  }
  0x87   :  { %1869 = vmatpush1.bf16.msra.mxu1 %v2879_v36  ;;  %v2963_v36 = vld [vmem:[%s4057_s1 + $0x2f0] ss:$8 sps:$4 sm:$0xff]  }
  0x88   :  { %2081 = vmatpush1.bf16.msra.mxu0 %v2882_v37  ;;  %1870 = vmatprep.subr.bf16.mxu1 %v2887_v38  ;;  %v2966_v37 = vld [vmem:[%s4057_s1 + $0x6f0] ss:$8 sps:$4 sm:$0xff]   ;;  %v2971_v38 = vld [vmem:[%s4057_s1 + $0x304] ss:$8 sps:$4 sm:$0xff]  }
  0x89   :  { %2082 = vmatprep.subr.bf16.mxu0 %v2890_v39  ;;  %v2974_v39 = vld [vmem:[%s4057_s1 + $0x704] ss:$8 sps:$4 sm:$0xff]  }
  0x8a   :  { %1856 = vmatmul.mubr.bf16.gmra.mrb[4].mxu1 %v2347_v43  ;;  %v2341_v43 = vcombine.low %v3596_v46, %v3601_v47  ;;  %v2977_v46 = vld [vmem:[%s4057_s1 + $0x314] ss:$8 sps:$4 sm:$0xff]  }
  0x8b   :  { %2068 = vmatmul.mubr.bf16.gmra.mrb[4].mxu0 %v2355_v44  ;;  %1871 = vmatpush1.bf16.msra.mxu1 %v2885_v40  ;;  %v38_v40 = vld [vmem:[%s4058_s0 + $0x90] sm:$0xff] }
  0x8c   :  { %2083 = vmatpush1.bf16.msra.mxu0 %v2888_v41  ;;  %1872 = vmatprep.subr.bf16.mxu1 %v2893_v48  ;;  %v2333_v41 = vcombine.low %v3586_v42, %v3591_v45  ;;  %v46_v44 = vld [vmem:[%s4058_s0 + $0xd0] sm:$0xff]  ;;  %v2969_v42 = vld [vmem:[%s4057_s1 + $0x300] ss:$8 sps:$4 sm:$0xff]  }
  0x8d   :  { %2084 = vmatprep.subr.bf16.mxu0 %v2896_v49  ;;  %1898 = vmatprep.mubr.bf16.mxu1 %v2334_v50  ;;  %v42_v48 = vld [vmem:[%s4058_s0 + $0xb0] sm:$0xff]  ;;  %v2972_v45 = vld [vmem:[%s4057_s1 + $0x700] ss:$8 sps:$4 sm:$0xff]   ;;  %v2350_v50 = vcombine.high %v38_v40, %v46_v44 }
  0x8e   :  { %2110 = vmatprep.mubr.bf16.mxu0 %v2342_v51  ;;  %v50_v49 = vld [vmem:[%s4058_s0 + $0xf0] sm:$0xff] }
  0x8f   :  { %1873 = vmatpush1.bf16.msra.mxu1 %v2891_v52  ;;  %v2980_v47 = vld [vmem:[%s4057_s1 + $0x714] ss:$8 sps:$4 sm:$0xff]   ;;  %v2358_v51 = vcombine.high %v42_v48, %v50_v49  ;;  %v2975_v52 = vld [vmem:[%s4057_s1 + $0x310] ss:$8 sps:$4 sm:$0xff]  }
  0x90   :  { %2085 = vmatpush1.bf16.msra.mxu0 %v2894_v53  ;;  %1874 = vmatprep.subr.bf16.mxu1 %v2899_v54  ;;  %v2978_v53 = vld [vmem:[%s4057_s1 + $0x710] ss:$8 sps:$4 sm:$0xff]   ;;  %v2983_v54 = vld [vmem:[%s4057_s1 + $0x324] ss:$8 sps:$4 sm:$0xff]  }
  0x91   :  { %2086 = vmatprep.subr.bf16.mxu0 %v2902_v55  ;;  %v2986_v55 = vld [vmem:[%s4057_s1 + $0x724] ss:$8 sps:$4 sm:$0xff]  }
  0x93   :  { %1875 = vmatpush1.bf16.msra.mxu1 %v2897_v56  ;;  %v3812_v56 = vld [vmem:[%s4058_s0 + $0x18] sm:$0xff] }
  0x94   :  { %2087 = vmatpush1.bf16.msra.mxu0 %v2900_v57  ;;  %1876 = vmatprep.subr.bf16.mxu1 %v2905_v58  ;;  %v2349_v57 = vcombine.low %v38_v40, %v46_v44  ;;  %v2357_v58 = vcombine.low %v42_v48, %v50_v49  ;;  %v3041_v40 = vld [vmem:[%s4057_s1 + $0x3c0] ss:$8 sps:$4 sm:$0xff]   ;;  %v3052_v44 = vld [vmem:[%s4057_s1 + $0x7d4] ss:$8 sps:$4 sm:$0xff]   ;;  %v3047_v48 = vld [vmem:[%s4057_s1 + $0x3d0] ss:$8 sps:$4 sm:$0xff]  }
  0x95   :  { %2088 = vmatprep.subr.bf16.mxu0 %v2908_v59  ;;  %v3817_v59 = vld [vmem:[%s4058_s0 + $0x58] sm:$0xff] }
  0x96   :  { %v3050_v49 = vld [vmem:[%s4057_s1 + $0x7d0] ss:$8 sps:$4 sm:$0xff]  }
  0x97   :  { %1877 = vmatpush1.bf16.msra.mxu1 %v2903_v60  ;;  %v3822_v60 = vld [vmem:[%s4058_s0 + $0x38] sm:$0xff] }
  0x98   :  { %2089 = vmatpush1.bf16.msra.mxu0 %v2906_v61  ;;  %1878 = vmatprep.subr.bf16.mxu1 %v2911_v62  ;;  %v3827_v61 = vld [vmem:[%s4058_s0 + $0x78] sm:$0xff]  ;;  %v2981_v62 = vld [vmem:[%s4057_s1 + $0x320] ss:$8 sps:$4 sm:$0xff]  }
  0x99   :  { %2090 = vmatprep.subr.bf16.mxu0 %v2914_v63  ;;  %v2984_v63 = vld [vmem:[%s4057_s1 + $0x720] ss:$8 sps:$4 sm:$0xff]  }
  0x9b   :  { %1879 = vmatpush1.bf16.msra.mxu1 %v2909_v0  ;;  %v2989_v0 = vld [vmem:[%s4057_s1 + $0x334] ss:$8 sps:$4 sm:$0xff]  }
  0x9c   :  { %2091 = vmatpush1.bf16.msra.mxu0 %v2912_v1  ;;  %1880 = vmatprep.subr.bf16.mxu1 %v2917_v2  ;;  %v2992_v1 = vld [vmem:[%s4057_s1 + $0x734] ss:$8 sps:$4 sm:$0xff]   ;;  %v2336_v2 = vcombine.high %v3812_v56, %v3817_v59 }
  0x9d   :  { %2092 = vmatprep.subr.bf16.mxu0 %v2920_v3  ;;  %v2344_v3 = vcombine.high %v3822_v60, %v3827_v61 }
  0x9f   :  { %1881 = vmatpush1.bf16.msra.mxu1 %v2915_v4  ;;  %v2987_v4 = vld [vmem:[%s4057_s1 + $0x330] ss:$8 sps:$4 sm:$0xff]  }
  0xa0   :  { %2093 = vmatpush1.bf16.msra.mxu0 %v2918_v5  ;;  %1882 = vmatprep.subr.bf16.mxu1 %v2923_v6  ;;  %v2990_v5 = vld [vmem:[%s4057_s1 + $0x730] ss:$8 sps:$4 sm:$0xff]   ;;  %v2995_v6 = vld [vmem:[%s4057_s1 + $0x344] ss:$8 sps:$4 sm:$0xff]  }
  0xa1   :  { %2094 = vmatprep.subr.bf16.mxu0 %v2926_v7  ;;  %v2998_v7 = vld [vmem:[%s4057_s1 + $0x744] ss:$8 sps:$4 sm:$0xff]  }
  0xa3   :  { %1883 = vmatpush1.bf16.msra.mxu1 %v2921_v8  ;;  %v2993_v8 = vld [vmem:[%s4057_s1 + $0x340] ss:$8 sps:$4 sm:$0xff]  }
  0xa4   :  { %2095 = vmatpush1.bf16.msra.mxu0 %v2924_v9  ;;  %1884 = vmatprep.subr.bf16.mxu1 %v2929_v10  ;;  %v2996_v9 = vld [vmem:[%s4057_s1 + $0x740] ss:$8 sps:$4 sm:$0xff]   ;;  %v3001_v10 = vld [vmem:[%s4057_s1 + $0x354] ss:$8 sps:$4 sm:$0xff]  }
  0xa5   :  { %2096 = vmatprep.subr.bf16.mxu0 %v2932_v11  ;;  %v3004_v11 = vld [vmem:[%s4057_s1 + $0x754] ss:$8 sps:$4 sm:$0xff]  }
  0xa7   :  { %1885 = vmatpush1.bf16.msra.mxu1 %v2927_v12  ;;  %v2999_v12 = vld [vmem:[%s4057_s1 + $0x350] ss:$8 sps:$4 sm:$0xff]  }
  0xa8   :  { %2097 = vmatpush1.bf16.msra.mxu0 %v2930_v13  ;;  %1886 = vmatprep.subr.bf16.mxu1 %v2935_v14  ;;  %v3002_v13 = vld [vmem:[%s4057_s1 + $0x750] ss:$8 sps:$4 sm:$0xff]   ;;  %v3007_v14 = vld [vmem:[%s4057_s1 + $0x364] ss:$8 sps:$4 sm:$0xff]  }
  0xa9   :  { %2098 = vmatprep.subr.bf16.mxu0 %v2938_v15  ;;  %v3010_v15 = vld [vmem:[%s4057_s1 + $0x764] ss:$8 sps:$4 sm:$0xff]  }
  0xab   :  { %1887 = vmatpush1.bf16.msra.mxu1 %v2933_v16  ;;  %v3005_v16 = vld [vmem:[%s4057_s1 + $0x360] ss:$8 sps:$4 sm:$0xff]  }
  0xac   :  { %2099 = vmatpush1.bf16.msra.mxu0 %v2936_v17  ;;  %1888 = vmatprep.subr.bf16.mxu1 %v2941_v18  ;;  %v3008_v17 = vld [vmem:[%s4057_s1 + $0x760] ss:$8 sps:$4 sm:$0xff]   ;;  %v3013_v18 = vld [vmem:[%s4057_s1 + $0x374] ss:$8 sps:$4 sm:$0xff]  }
  0xad   :  { %2100 = vmatprep.subr.bf16.mxu0 %v2944_v19  ;;  %v3016_v19 = vld [vmem:[%s4057_s1 + $0x774] ss:$8 sps:$4 sm:$0xff]  }
  0xaf   :  { %1889 = vmatpush1.bf16.msra.mxu1 %v2939_v20  ;;  %v3011_v20 = vld [vmem:[%s4057_s1 + $0x370] ss:$8 sps:$4 sm:$0xff]  }
  0xb0   :  { %2101 = vmatpush1.bf16.msra.mxu0 %v2942_v21  ;;  %1890 = vmatprep.subr.bf16.mxu1 %v2947_v22  ;;  %v3014_v21 = vld [vmem:[%s4057_s1 + $0x770] ss:$8 sps:$4 sm:$0xff]   ;;  %v3019_v22 = vld [vmem:[%s4057_s1 + $0x384] ss:$8 sps:$4 sm:$0xff]  }
  0xb1   :  { %2102 = vmatprep.subr.bf16.mxu0 %v2950_v23  ;;  %v3022_v23 = vld [vmem:[%s4057_s1 + $0x784] ss:$8 sps:$4 sm:$0xff]  }
  0xb3   :  { %1891 = vmatpush1.bf16.msra.mxu1 %v2945_v24  ;;  %v3017_v24 = vld [vmem:[%s4057_s1 + $0x380] ss:$8 sps:$4 sm:$0xff]  }
  0xb4   :  { %2103 = vmatpush1.bf16.msra.mxu0 %v2948_v25  ;;  %1892 = vmatprep.subr.bf16.mxu1 %v2953_v26  ;;  %v3020_v25 = vld [vmem:[%s4057_s1 + $0x780] ss:$8 sps:$4 sm:$0xff]   ;;  %v3025_v26 = vld [vmem:[%s4057_s1 + $0x394] ss:$8 sps:$4 sm:$0xff]  }
  0xb5   :  { %2104 = vmatprep.subr.bf16.mxu0 %v2956_v27  ;;  %v3028_v27 = vld [vmem:[%s4057_s1 + $0x794] ss:$8 sps:$4 sm:$0xff]  }
  0xb7   :  { %1893 = vmatpush1.bf16.msra.mxu1 %v2951_v28  ;;  %v3023_v28 = vld [vmem:[%s4057_s1 + $0x390] ss:$8 sps:$4 sm:$0xff]  }
  0xb8   :  { %2105 = vmatpush1.bf16.msra.mxu0 %v2954_v29  ;;  %1894 = vmatprep.subr.bf16.mxu1 %v2959_v30  ;;  %v3026_v29 = vld [vmem:[%s4057_s1 + $0x790] ss:$8 sps:$4 sm:$0xff]   ;;  %v3031_v30 = vld [vmem:[%s4057_s1 + $0x3a4] ss:$8 sps:$4 sm:$0xff]  }
  0xb9   :  { %2106 = vmatprep.subr.bf16.mxu0 %v2962_v31  ;;  %v3034_v31 = vld [vmem:[%s4057_s1 + $0x7a4] ss:$8 sps:$4 sm:$0xff]  }
  0xbb   :  { %1895 = vmatpush1.bf16.msra.mxu1 %v2957_v32  ;;  %v3029_v32 = vld [vmem:[%s4057_s1 + $0x3a0] ss:$8 sps:$4 sm:$0xff]  }
  0xbc   :  { %2107 = vmatpush1.bf16.msra.mxu0 %v2960_v33  ;;  %1896 = vmatprep.subr.bf16.mxu1 %v2965_v34  ;;  %v3032_v33 = vld [vmem:[%s4057_s1 + $0x7a0] ss:$8 sps:$4 sm:$0xff]   ;;  %v3037_v34 = vld [vmem:[%s4057_s1 + $0x3b4] ss:$8 sps:$4 sm:$0xff]  }
  0xbd   :  { %2108 = vmatprep.subr.bf16.mxu0 %v2968_v35  ;;  %v3040_v35 = vld [vmem:[%s4057_s1 + $0x7b4] ss:$8 sps:$4 sm:$0xff]  }
  0xbf   :  { %1897 = vmatpush1.bf16.msra.mxu1 %v2963_v36  ;;  %v3035_v36 = vld [vmem:[%s4057_s1 + $0x3b0] ss:$8 sps:$4 sm:$0xff]  }
  0xc0   :  { %2109 = vmatpush1.bf16.msra.mxu0 %v2966_v37  ;;  %1919 = vmatprep.subr.bf16.mxu1 %v2971_v38  ;;  %v3038_v37 = vld [vmem:[%s4057_s1 + $0x7b0] ss:$8 sps:$4 sm:$0xff]   ;;  %v3043_v38 = vld [vmem:[%s4057_s1 + $0x3c4] ss:$8 sps:$4 sm:$0xff]  }
  0xc1   :  { %2131 = vmatprep.subr.bf16.mxu0 %v2974_v39  ;;  %v3046_v39 = vld [vmem:[%s4057_s1 + $0x7c4] ss:$8 sps:$4 sm:$0xff]  }
  0xc2   :  { %1899 = vmatmul.mubr.bf16.vlgmr.msra.gmra.mrb[0].mxu1 %v2333_v41  ;;  %v3044_v41 = vld [vmem:[%s4057_s1 + $0x7c0] ss:$8 sps:$4 sm:$0xff]  }
  0xc3   :  { %2111 = vmatmul.mubr.bf16.vlgmr.msra.gmra.mrb[0].mxu0 %v2341_v43  ;;  %1920 = vmatpush1.bf16.msra.mxu1 %v2969_v42  ;;  %v3049_v43 = vld [vmem:[%s4057_s1 + $0x3d4] ss:$8 sps:$4 sm:$0xff]   ;;  %v3055_v42 = vld [vmem:[%s4057_s1 + $0x3e4] ss:$8 sps:$4 sm:$0xff]  }
  0xc4   :  { %2132 = vmatpush1.bf16.msra.mxu0 %v2972_v45  ;;  %1921 = vmatprep.subr.bf16.mxu1 %v2977_v46  ;;  %v3058_v45 = vld [vmem:[%s4057_s1 + $0x7e4] ss:$8 sps:$4 sm:$0xff]   ;;  %v3053_v46 = vld [vmem:[%s4057_s1 + $0x3e0] ss:$8 sps:$4 sm:$0xff]  }
  0xc5   :  { %2133 = vmatprep.subr.bf16.mxu0 %v2980_v47  ;;  %1908 = vmatprep.mubr.bf16.mxu1 %v2350_v50  ;;  %v3056_v47 = vld [vmem:[%s4057_s1 + $0x7e0] ss:$8 sps:$4 sm:$0xff]   ;;  %v3061_v50 = vld [vmem:[%s4057_s1 + $0x3f4] ss:$8 sps:$4 sm:$0xff]  }
  0xc6   :  { %2120 = vmatprep.mubr.bf16.mxu0 %v2358_v51  ;;  %v3064_v51 = vld [vmem:[%s4057_s1 + $0x7f4] ss:$8 sps:$4 sm:$0xff]  }
  0xc7   :  { %1922 = vmatpush1.bf16.msra.mxu1 %v2975_v52  ;;  %v3059_v52 = vld [vmem:[%s4057_s1 + $0x3f0] ss:$8 sps:$4 sm:$0xff]  }
  0xc8   :  { %2134 = vmatpush1.bf16.msra.mxu0 %v2978_v53  ;;  %1923 = vmatprep.subr.bf16.mxu1 %v2983_v54  ;;  %v3062_v53 = vld [vmem:[%s4057_s1 + $0x7f0] ss:$8 sps:$4 sm:$0xff]  }
  0xc9   :  { %2135 = vmatprep.subr.bf16.mxu0 %v2986_v55  ;;  %v39_v54 = vld [vmem:[%s4058_s0 + $0x98] sm:$0xff] }
  0xca   :  { %1909 = vmatmul.mubr.bf16.gmra.mrb[4].mxu1 %v2349_v57  ;;  %v47_v55 = vld [vmem:[%s4058_s0 + $0xd8] sm:$0xff] }
  0xcb   :  { %2121 = vmatmul.mubr.bf16.gmra.mrb[4].mxu0 %v2357_v58  ;;  %1924 = vmatpush1.bf16.msra.mxu1 %v2981_v62  ;;  %v43_v57 = vld [vmem:[%s4058_s0 + $0xb8] sm:$0xff]  ;;  %v2335_v62 = vcombine.low %v3812_v56, %v3817_v59  ;;  %v308_v56 = vld [vmem:[%s4059_s2] sm:$0x3] }
  0xcc   :  { %2136 = vmatpush1.bf16.msra.mxu0 %v2984_v63  ;;  %1925 = vmatprep.subr.bf16.mxu1 %v2989_v0  ;;  %v51_v58 = vld [vmem:[%s4058_s0 + $0xf8] sm:$0xff]  ;;  %v2343_v63 = vcombine.low %v3822_v60, %v3827_v61  ;;  %v2352_v0 = vcombine.high %v39_v54, %v47_v55 }
  0xcd   :  { %2137 = vmatprep.subr.bf16.mxu0 %v2992_v1  ;;  %1951 = vmatprep.mubr.bf16.mxu1 %v2336_v2  ;;  %v2360_v1 = vcombine.high %v43_v57, %v51_v58  ;;  %v2351_v2 = vcombine.low %v39_v54, %v47_v55 }
  0xce   :  { %2163 = vmatprep.mubr.bf16.mxu0 %v2344_v3  ;;  %v2359_v3 = vcombine.low %v43_v57, %v51_v58 }
  0xcf   :  { %1926 = vmatpush1.bf16.msra.mxu1 %v2987_v4  ;;  %v310_v4 = vlaneseq }
  0xd0   :  { %2138 = vmatpush1.bf16.msra.mxu0 %v2990_v5  ;;  %1927 = vmatprep.subr.bf16.mxu1 %v2995_v6 }
  0xd1   :  { %2139 = vmatprep.subr.bf16.mxu0 %v2998_v7  ;;  %v311_v5 = vshrl.u32 %v310_v4, 7 }
  0xd3   :  { %1928 = vmatpush1.bf16.msra.mxu1 %v2993_v8  ;;  %v4011_v6 = vsub.s32 0, %v311_v5  ;;  %v4016_v59 = vsub.s32 1, %v311_v5 }
  0xd4   :  { %2140 = vmatpush1.bf16.msra.mxu0 %v2996_v9  ;;  %1929 = vmatprep.subr.bf16.mxu1 %v3001_v10 }
  0xd5   :  { %2141 = vmatprep.subr.bf16.mxu0 %v3004_v11  ;;  %v313_v60 = vrot.slane %v308_v56, %v4011_v6  ;;  %v317_v61 = vrot.slane %v308_v56, %v4016_v59 }
  0xd7   :  { %1930 = vmatpush1.bf16.msra.mxu1 %v2999_v12 }
  0xd8   :  { %2142 = vmatpush1.bf16.msra.mxu0 %v3002_v13  ;;  %1931 = vmatprep.subr.bf16.mxu1 %v3007_v14 }
  0xd9   :  { %2143 = vmatprep.subr.bf16.mxu0 %v3010_v15 }
  0xdb   :  { %1932 = vmatpush1.bf16.msra.mxu1 %v3005_v16 }
  0xdc   :  { %2144 = vmatpush1.bf16.msra.mxu0 %v3008_v17  ;;  %1933 = vmatprep.subr.bf16.mxu1 %v3013_v18 }
  0xdd   :  { %2145 = vmatprep.subr.bf16.mxu0 %v3016_v19 }
  0xdf   :  { %1934 = vmatpush1.bf16.msra.mxu1 %v3011_v20 }
  0xe0   :  { %2146 = vmatpush1.bf16.msra.mxu0 %v3014_v21  ;;  %1935 = vmatprep.subr.bf16.mxu1 %v3019_v22 }
  0xe1   :  { %2147 = vmatprep.subr.bf16.mxu0 %v3022_v23 }
  0xe3   :  { %1936 = vmatpush1.bf16.msra.mxu1 %v3017_v24 }
  0xe4   :  { %2148 = vmatpush1.bf16.msra.mxu0 %v3020_v25  ;;  %1937 = vmatprep.subr.bf16.mxu1 %v3025_v26 }
  0xe5   :  { %2149 = vmatprep.subr.bf16.mxu0 %v3028_v27 }
  0xe7   :  { %1938 = vmatpush1.bf16.msra.mxu1 %v3023_v28 }
  0xe8   :  { %2150 = vmatpush1.bf16.msra.mxu0 %v3026_v29  ;;  %1939 = vmatprep.subr.bf16.mxu1 %v3031_v30 }
  0xe9   :  { %2151 = vmatprep.subr.bf16.mxu0 %v3034_v31 }
  0xeb   :  { %1940 = vmatpush1.bf16.msra.mxu1 %v3029_v32 }
  0xec   :  { %2152 = vmatpush1.bf16.msra.mxu0 %v3032_v33  ;;  %1941 = vmatprep.subr.bf16.mxu1 %v3037_v34 }
  0xed   :  { %2153 = vmatprep.subr.bf16.mxu0 %v3040_v35 }
  0xef   :  { %1942 = vmatpush1.bf16.msra.mxu1 %v3035_v36 }
  0xf0   :  { %2154 = vmatpush1.bf16.msra.mxu0 %v3038_v37  ;;  %1943 = vmatprep.subr.bf16.mxu1 %v3043_v38 }
  0xf1   :  { %2155 = vmatprep.subr.bf16.mxu0 %v3046_v39 }
  0xf3   :  { %1944 = vmatpush1.bf16.msra.mxu1 %v3041_v40 }
  0xf4   :  { %2156 = vmatpush1.bf16.msra.mxu0 %v3044_v41  ;;  %1945 = vmatprep.subr.bf16.mxu1 %v3049_v43 }
  0xf5   :  { %2157 = vmatprep.subr.bf16.mxu0 %v3052_v44 }
  0xf7   :  { %1946 = vmatpush1.bf16.msra.mxu1 %v3047_v48 }
  0xf8   :  { %2158 = vmatpush1.bf16.msra.mxu0 %v3050_v49  ;;  %1947 = vmatprep.subr.bf16.mxu1 %v3055_v42 }
  0xf9   :  { %2159 = vmatprep.subr.bf16.mxu0 %v3058_v45 }
  0xfb   :  { %1948 = vmatpush1.bf16.msra.mxu1 %v3053_v46 }
  0xfc   :  { %2160 = vmatpush1.bf16.msra.mxu0 %v3056_v47  ;;  %1949 = vmatprep.subr.bf16.mxu1 %v3061_v50 }
  0xfd   :  { %2161 = vmatprep.subr.bf16.mxu0 %v3064_v51 }
  0xff   :  { %1950 = vmatpush1.bf16.msra.mxu1 %v3059_v52 }
 0x100   :  { %2162 = vmatpush1.bf16.msra.mxu0 %v3062_v53 }
 0x102   :  { %1952 = vmatmul.mubr.bf16.vlgmr.msra.gmra.mrb[0].mxu1 %v2335_v62 }
 0x103   :  { %2164 = vmatmul.mubr.bf16.vlgmr.msra.gmra.mrb[0].mxu0 %v2343_v63  ;;  %1961 = vmatprep.mubr.bf16.mxu1 %v2352_v0 }
 0x104   :  { %2173 = vmatprep.mubr.bf16.mxu0 %v2360_v1 }
 0x10a   :  { %1962 = vmatmul.mubr.bf16.gmra.mrb[4].mxu1 %v2351_v2 }
 0x10b   :  { %2174 = vmatmul.mubr.bf16.gmra.mrb[4].mxu0 %v2359_v3 }
 0x1d5   :  { %v1953_v7 = vpop.f32.mrb[0].mxu1 }
 0x1d6   :  { %v2165_v8 = vpop.f32.mrb[0].mxu0  ;;  %v2617_v9 = vadd.f32 %v1953_v7, %v313_v60  ;;  %v1955_v10 = vpop.f32.mrb[1].mxu1 }
 0x1d7   :  { %v2167_v11 = vpop.f32.mrb[1].mxu0  ;;  %v2619_v12 = vadd.f32 %v1955_v10, %v317_v61  ;;  %v1957_v13 = vpop.f32.mrb[2].mxu1 }
 0x1d8   :  { %v2169_v14 = vpop.f32.mrb[2].mxu0  ;;  %v2618_v15 = vadd.f32 %v2617_v9, %v2165_v8  ;;  %v2621_v16 = vadd.f32 %v1957_v13, %v313_v60  ;;  %v1959_v17 = vpop.f32.mrb[3].mxu1 }
 0x1d9   :  { %v2171_v18 = vpop.f32.mrb[3].mxu0  ;;  %v2620_v19 = vadd.f32 %v2619_v12, %v2167_v11  ;;  %v2623_v20 = vadd.f32 %v1959_v17, %v317_v61 }
 0x1da   :  { %v2622_v21 = vadd.f32 %v2621_v16, %v2169_v14 }
 0x1db   :  { %v2624_v22 = vadd.f32 %v2623_v20, %v2171_v18 }
 0x1dc   :  { %v2184_v23 = vadd.f32 %v2622_v21, %v2618_v15 }
 0x1dd   :  { %v2193_v24 = vadd.f32 %v2624_v22, %v2620_v19  ;;  %v1963_v25 = vpop.f32.mrb[4].mxu1 }
 0x1de   :  { %v2175_v26 = vpop.f32.mrb[4].mxu0  ;;  %v2625_v27 = vadd.f32 %v1963_v25, %v313_v60  ;;  %v1965_v28 = vpop.f32.mrb[5].mxu1 }
 0x1df   :  { %v2177_v29 = vpop.f32.mrb[5].mxu0  ;;  %v2627_v30 = vadd.f32 %v1965_v28, %v317_v61  ;;  %v1967_v31 = vpop.f32.mrb[6].mxu1 }
 0x1e0   :  { %v2179_v32 = vpop.f32.mrb[6].mxu0  ;;  %v2626_v33 = vadd.f32 %v2625_v27, %v2175_v26  ;;  %v2629_v34 = vadd.f32 %v1967_v31, %v313_v60  ;;  %v1969_v35 = vpop.f32.mrb[7].mxu1 }
 0x1e1   :  { %v2181_v36 = vpop.f32.mrb[7].mxu0  ;;  %v2628_v37 = vadd.f32 %v2627_v30, %v2177_v29  ;;  %v2631_v38 = vadd.f32 %v1969_v35, %v317_v61  ;;  %v2253_v35 = vld [vmem:[%s4060_s3] sm:$0x3] }
 0x1e2   :  { %v2185_v39 = vadd.f32 %v2626_v33, %v2184_v23  ;;  %v2630_v40 = vadd.f32 %v2629_v34, %v2179_v32 }
 0x1e3   :  { %v2194_v41 = vadd.f32 %v2628_v37, %v2193_v24  ;;  %v2632_v43 = vadd.f32 %v2631_v38, %v2181_v36  ;;  %v2273_v36 = vld [vmem:[%s4061_s4] sm:$0x3] }
 0x1e4   :  { %v2186_v44 = vadd.f32 %v2630_v40, %v2185_v39  ;;  %v2278_v39 = vrot.slane %v2273_v36, %v4011_v6 }
 0x1e5   :  { %v2195_v48 = vadd.f32 %v2632_v43, %v2194_v41  ;;  %v2282_v41 = vrot.slane %v2273_v36, %v4016_v59 }
 0x1e6   :  { %v2187_v49 = vrot.slane %v2186_v44, 4 }
 0x1e7   :  { %v2196_v42 = vrot.slane %v2195_v48, 4 }
 0x1e8   :  { %v2188_v45 = vadd.f32 %v2187_v49, %v2186_v44 }
 0x1e9   :  { %v2197_v46 = vadd.f32 %v2196_v42, %v2195_v48 }
 0x1ea   :  { %v2189_v47 = vrot.slane %v2188_v45, 2 }
 0x1eb   :  { %v2198_v50 = vrot.slane %v2197_v46, 2 }
 0x1ec   :  { %v2190_v51 = vadd.f32 %v2189_v47, %v2188_v45 }
 0x1ed   :  { %v2199_v52 = vadd.f32 %v2198_v50, %v2197_v46 }
 0x1ee   :  { %v2191_v53 = vrot.slane %v2190_v51, 1 }
 0x1ef   :  { %v2200_v54 = vrot.slane %v2199_v52, 1 }
 0x1f0   :  { %v2192_v55 = vadd.f32 %v2191_v53, %v2190_v51 }
 0x1f1   :  { %v2201_v57 = vadd.f32 %v2200_v54, %v2199_v52 }
 0x1f2   :  { %v2203_v58 = vmul.f32 0.03125, %v2192_v55 }
 0x1f3   :  { %v2204_v62 = vmul.f32 0.03125, %v2201_v57 }
 0x1f4   :  { %v2205_v63 = vsub.f32 %v2618_v15, %v2203_v58  ;;  %v2207_v0 = vsub.f32 %v2622_v21, %v2203_v58  ;;  %v2209_v1 = vsub.f32 %v2626_v33, %v2203_v58  ;;  %v2211_v2 = vsub.f32 %v2630_v40, %v2203_v58 }
 0x1f5   :  { %v2206_v3 = vsub.f32 %v2620_v19, %v2204_v62  ;;  %v2208_v4 = vsub.f32 %v2624_v22, %v2204_v62  ;;  %v2210_v5 = vsub.f32 %v2628_v37, %v2204_v62  ;;  %v2212_v56 = vsub.f32 %v2632_v43, %v2204_v62 }
 0x1f6   :  { %v2213_v60 = vmul.f32 %v2205_v63, %v2205_v63  ;;  %v2215_v61 = vmul.f32 %v2207_v0, %v2207_v0  ;;  %v2217_v9 = vmul.f32 %v2209_v1, %v2209_v1  ;;  %v2219_v13 = vmul.f32 %v2211_v2, %v2211_v2 }
 0x1f7   :  { %v2214_v7 = vmul.f32 %v2206_v3, %v2206_v3  ;;  %v2216_v8 = vmul.f32 %v2208_v4, %v2208_v4  ;;  %v2218_v11 = vmul.f32 %v2210_v5, %v2210_v5  ;;  %v2220_v16 = vmul.f32 %v2212_v56, %v2212_v56 }
 0x1f8   :  { %v2221_v10 = vadd.f32 %v2215_v61, %v2213_v60  ;;  %v2258_v37 = vrot.slane %v2253_v35, %v4011_v6  ;;  %v2262_v40 = vrot.slane %v2253_v35, %v4016_v59 }
 0x1f9   :  { %v2230_v12 = vadd.f32 %v2216_v8, %v2214_v7 }
 0x1fa   :  { %v2222_v14 = vadd.f32 %v2221_v10, %v2217_v9 }
 0x1fb   :  { %v2231_v17 = vadd.f32 %v2230_v12, %v2218_v11 }
 0x1fc   :  { %v2223_v15 = vadd.f32 %v2222_v14, %v2219_v13 }
 0x1fd   :  { %v2232_v18 = vadd.f32 %v2231_v17, %v2220_v16 }
 0x1fe   :  { %v2224_v20 = vrot.slane %v2223_v15, 4 }
 0x1ff   :  { %v2233_v21 = vrot.slane %v2232_v18, 4 }
 0x200   :  { %v2225_v19 = vadd.f32 %v2224_v20, %v2223_v15 }
 0x201   :  { %v2234_v22 = vadd.f32 %v2233_v21, %v2232_v18 }
 0x202   :  { %v2226_v23 = vrot.slane %v2225_v19, 2 }
 0x203   :  { %v2235_v24 = vrot.slane %v2234_v22, 2 }
 0x204   :  { %v2227_v25 = vadd.f32 %v2226_v23, %v2225_v19 }
 0x205   :  { %v2236_v26 = vadd.f32 %v2235_v24, %v2234_v22 }
 0x206   :  { %v2228_v27 = vrot.slane %v2227_v25, 1 }
 0x207   :  { %v2237_v28 = vrot.slane %v2236_v26, 1 }
 0x208   :  { %v2229_v29 = vadd.f32 %v2228_v27, %v2227_v25 }
 0x209   :  { %v2238_v30 = vadd.f32 %v2237_v28, %v2236_v26 }
 0x20a   :  { %v2239_v31 = vmul.f32 0.03125, %v2229_v29 }
 0x20b   :  { %v2240_v32 = vmul.f32 0.03125, %v2238_v30 }
 0x20c   :  { %v2241_v33 = vadd.f32 1e-05, %v2239_v31 }
 0x20d   :  { %v2242_v34 = vadd.f32 1e-05, %v2240_v32 }
 0x20e   :  { %3065 = vrsqrt.f32 %v2241_v33 }
 0x20f   :  { %3067 = vrsqrt.f32 %v2242_v34 }
 0x218   :  { %v3066_v38 = vpop.eup %3065 }
 0x219   :  { %v3068_v43 = vpop.eup %3067  ;;  %v2245_v44 = vmul.f32 %v3066_v38, %v2205_v63  ;;  %v2247_v48 = vmul.f32 %v3066_v38, %v2207_v0  ;;  %v2249_v49 = vmul.f32 %v3066_v38, %v2209_v1  ;;  %v2251_v42 = vmul.f32 %v3066_v38, %v2211_v2 }
 0x21a   :  { %v2246_v45 = vmul.f32 %v3068_v43, %v2206_v3  ;;  %v2248_v46 = vmul.f32 %v3068_v43, %v2208_v4  ;;  %v2250_v47 = vmul.f32 %v3068_v43, %v2210_v5  ;;  %v2252_v50 = vmul.f32 %v3068_v43, %v2212_v56 }
 0x21b   :  { %v2265_v51 = vmul.f32 %v2258_v37, %v2245_v44  ;;  %v2267_v52 = vmul.f32 %v2258_v37, %v2247_v48  ;;  %v2269_v53 = vmul.f32 %v2258_v37, %v2249_v49  ;;  %v2271_v54 = vmul.f32 %v2258_v37, %v2251_v42 }
 0x21c   :  { %v2266_v55 = vmul.f32 %v2262_v40, %v2246_v45  ;;  %v2268_v57 = vmul.f32 %v2262_v40, %v2248_v46  ;;  %v2270_v6 = vmul.f32 %v2262_v40, %v2250_v47  ;;  %v2272_v58 = vmul.f32 %v2262_v40, %v2252_v50 }
 0x21d   :  { %v2285_v62 = vadd.f32 %v2278_v39, %v2265_v51  ;;  %v2287_v60 = vadd.f32 %v2278_v39, %v2267_v52  ;;  %v2289_v59 = vadd.f32 %v2278_v39, %v2269_v53  ;;  %v2291_v61 = vadd.f32 %v2278_v39, %v2271_v54 }
 0x21e   :  { %v2286_v63 = vadd.f32 %v2282_v41, %v2266_v55  ;;  %v2288_v0 = vadd.f32 %v2282_v41, %v2268_v57  ;;  %v2290_v1 = vadd.f32 %v2282_v41, %v2270_v6  ;;  %v2292_v2 = vadd.f32 %v2282_v41, %v2272_v58 }
 0x21f   :  { %vm2293_vm0 = vcmp.ge.f32.partialorder %v2285_v62, 0.0  ;;  %vm2295_vm1 = vcmp.ge.f32.partialorder %v2287_v60, 0.0  ;;  %vm2297_vm2 = vcmp.ge.f32.partialorder %v2289_v59, 0.0  ;;  %vm2299_vm3 = vcmp.ge.f32.partialorder %v2291_v61, 0.0 }
 0x220   :  { %v2301_v3 = vmul.f32 0.05, %v2285_v62  ;;  %v2303_v4 = vmul.f32 0.05, %v2287_v60  ;;  %v2305_v5 = vmul.f32 0.05, %v2289_v59 }
 0x221   :  { %v2307_v56 = vmul.f32 0.05, %v2291_v61  ;;  %vm2294_vm4 = vcmp.ge.f32.partialorder %v2286_v63, 0.0  ;;  %vm2296_vm5 = vcmp.ge.f32.partialorder %v2288_v0, 0.0  ;;  %vm2298_vm6 = vcmp.ge.f32.partialorder %v2290_v1, 0.0 }
 0x222   :  { %v2309_v7 = vsel %vm2293_vm0, %v2285_v62, %v2301_v3  ;;  %v2311_v8 = vsel %vm2295_vm1, %v2287_v60, %v2303_v4  ;;  %v2313_v9 = vsel %vm2297_vm2, %v2289_v59, %v2305_v5  ;;  %vm2300_vm7 = vcmp.ge.f32.partialorder %v2292_v2, 0.0 }
 0x223   :  { %v2315_v10 = vsel %vm2299_vm3, %v2291_v61, %v2307_v56  ;;  %2317 = vst [vmem:[%s4062_s5] sm:$0xff] %v2309_v7  ;;  %2319 = vst [vmem:[%s4062_s5 + $0x10] sm:$0xff] %v2311_v8  ;;  %v2302_v11 = vmul.f32 0.05, %v2286_v63  ;;  %v2304_v12 = vmul.f32 0.05, %v2288_v0 }
 0x224   :  { %2321 = vst [vmem:[%s4062_s5 + $0x20] sm:$0xff] %v2313_v9  ;;  %v2306_v13 = vmul.f32 0.05, %v2290_v1  ;;  %2323 = vst [vmem:[%s4062_s5 + $0x30] sm:$0xff] %v2315_v10  ;;  %v2308_v14 = vmul.f32 0.05, %v2292_v2 }
 0x225   :  { %v2310_v16 = vsel %vm2294_vm4, %v2286_v63, %v2302_v11  ;;  %v2312_v17 = vsel %vm2296_vm5, %v2288_v0, %v2304_v12 }
 0x226   :  { %v2314_v15 = vsel %vm2298_vm6, %v2290_v1, %v2306_v13  ;;  %v2316_v18 = vsel %vm2300_vm7, %v2292_v2, %v2308_v14  ;;  %2318 = vst [vmem:[%s4062_s5 + $0x8] sm:$0xff] %v2310_v16  ;;  %2320 = vst [vmem:[%s4062_s5 + $0x18] sm:$0xff] %v2312_v17 }
 0x227   :  { %2322 = vst [vmem:[%s4062_s5 + $0x28] sm:$0xff] %v2314_v15  ;;  %2324 = vst [vmem:[%s4062_s5 + $0x38] sm:$0xff] %v2316_v18 }

// kernel: dx_forward.7
= control target key start
LH: loop header
LB: loop body
LE: loop exit
PB: predicated region body
PF: predicated region fallthrough
CT: control target
= control target key end

     0   :  { %s4714_s1 = inlined_call_operand.vmem [shape: bf16[4096,128], index: 1, kind: input, shape index: {}]   ;;  %s4715_s0 = inlined_call_operand.vmem [shape: bf16[16,4096], index: 0, kind: input, shape index: {}]   ;;  %s4716_s2 = inlined_call_operand.vmem [shape: f32[1,128], index: 2, kind: input, shape index: {}]   ;;  %s4717_s3 = inlined_call_operand.vmem [shape: f32[16,128], index: 3, kind: output, shape index: {}]  }
   0x1   :  { %v3565_v0 = vld [vmem:[%s4714_s1 + $0x40] sm:$0xff]   ;;  %v3569_v4 = vld [vmem:[%s4714_s1 + $0x48] sm:$0xff]   ;;  %v3573_v8 = vld [vmem:[%s4714_s1 + $0x50] sm:$0xff]  }
   0x2   :  { %v3566_v1 = vld [vmem:[%s4714_s1 + $0xc0] sm:$0xff]   ;;  %3213 = vmatprep.subr.bf16.mxu0 %v3565_v0  ;;  %v3570_v5 = vld [vmem:[%s4714_s1 + $0xc8] sm:$0xff]   ;;  %v3574_v9 = vld [vmem:[%s4714_s1 + $0xd0] sm:$0xff]  }
   0x3   :  { %v3567_v2 = vld [vmem:[%s4714_s1] sm:$0xff]   ;;  %3235 = vmatprep.subr.bf16.mxu1 %v3566_v1  ;;  %v3571_v6 = vld [vmem:[%s4714_s1 + $0x8] sm:$0xff]   ;;  %v3575_v10 = vld [vmem:[%s4714_s1 + $0x10] sm:$0xff]  }
   0x4   :  { %v3568_v3 = vld [vmem:[%s4714_s1 + $0x80] sm:$0xff]   ;;  %3214 = vmatpush3.bf16.msra.mxu0 %v3567_v2  ;;  %v3572_v7 = vld [vmem:[%s4714_s1 + $0x88] sm:$0xff]   ;;  %v3576_v11 = vld [vmem:[%s4714_s1 + $0x90] sm:$0xff]  }
   0x5   :  { %3236 = vmatpush3.bf16.msra.mxu1 %v3568_v3  ;;  %3215 = vmatprep.subr.bf16.mxu0 %v3569_v4  ;;  %v3577_v12 = vld [vmem:[%s4714_s1 + $0x58] sm:$0xff]   ;;  %v3581_v16 = vld [vmem:[%s4714_s1 + $0x60] sm:$0xff]   ;;  %v3585_v20 = vld [vmem:[%s4714_s1 + $0x68] sm:$0xff]  }
   0x6   :  { %3237 = vmatprep.subr.bf16.mxu1 %v3570_v5  ;;  %v3578_v13 = vld [vmem:[%s4714_s1 + $0xd8] sm:$0xff]   ;;  %v3582_v17 = vld [vmem:[%s4714_s1 + $0xe0] sm:$0xff]   ;;  %v3586_v21 = vld [vmem:[%s4714_s1 + $0xe8] sm:$0xff]  }
   0x7   :  { %v3579_v14 = vld [vmem:[%s4714_s1 + $0x18] sm:$0xff]   ;;  %v3583_v18 = vld [vmem:[%s4714_s1 + $0x20] sm:$0xff]   ;;  %v3587_v22 = vld [vmem:[%s4714_s1 + $0x28] sm:$0xff]  }
   0x8   :  { %3216 = vmatpush3.bf16.msra.mxu0 %v3571_v6  ;;  %v3580_v15 = vld [vmem:[%s4714_s1 + $0x98] sm:$0xff]   ;;  %v3584_v19 = vld [vmem:[%s4714_s1 + $0xa0] sm:$0xff]   ;;  %v3588_v23 = vld [vmem:[%s4714_s1 + $0xa8] sm:$0xff]  }
   0x9   :  { %3238 = vmatpush3.bf16.msra.mxu1 %v3572_v7  ;;  %3217 = vmatprep.subr.bf16.mxu0 %v3573_v8  ;;  %v3589_v24 = vld [vmem:[%s4714_s1 + $0x70] sm:$0xff]   ;;  %v3593_v28 = vld [vmem:[%s4714_s1 + $0x78] sm:$0xff]   ;;  %v15_v32 = vld [vmem:[%s4715_s0] sm:$0xff] }
   0xa   :  { %3239 = vmatprep.subr.bf16.mxu1 %v3574_v9  ;;  %v3590_v25 = vld [vmem:[%s4714_s1 + $0xf0] sm:$0xff]   ;;  %v3594_v29 = vld [vmem:[%s4714_s1 + $0xf8] sm:$0xff]   ;;  %v31_v33 = vld [vmem:[%s4715_s0 + $0x80] sm:$0xff] }
   0xb   :  { %v3591_v26 = vld [vmem:[%s4714_s1 + $0x30] sm:$0xff]   ;;  %v3595_v30 = vld [vmem:[%s4714_s1 + $0x38] sm:$0xff]   ;;  %v16_v34 = vld [vmem:[%s4715_s0 + $0x8] sm:$0xff]  ;;  %v2925_v35 = vcombine.low %v15_v32, %v31_v33  ;;  %v2926_v36 = vcombine.high %v15_v32, %v31_v33 }
   0xc   :  { %3218 = vmatpush3.bf16.msra.mxu0 %v3575_v10  ;;  %v3592_v27 = vld [vmem:[%s4714_s1 + $0xb0] sm:$0xff]   ;;  %v3596_v31 = vld [vmem:[%s4714_s1 + $0xb8] sm:$0xff]   ;;  %v32_v37 = vld [vmem:[%s4715_s0 + $0x88] sm:$0xff] }
   0xd   :  { %3240 = vmatpush3.bf16.msra.mxu1 %v3576_v11  ;;  %3219 = vmatprep.subr.bf16.mxu0 %v3577_v12  ;;  %v2927_v38 = vcombine.low %v16_v34, %v32_v37  ;;  %v2928_v39 = vcombine.high %v16_v34, %v32_v37  ;;  %v3597_v40 = vld [vmem:[%s4714_s1 + $0x140] sm:$0xff]   ;;  %v3601_v44 = vld [vmem:[%s4714_s1 + $0x148] sm:$0xff]   ;;  %v3605_v48 = vld [vmem:[%s4714_s1 + $0x150] sm:$0xff]  }
   0xe   :  { %3241 = vmatprep.subr.bf16.mxu1 %v3578_v13  ;;  %2294 = vmatprep.mubr.bf16.mxu0 %v2926_v36  ;;  %v3598_v41 = vld [vmem:[%s4714_s1 + $0x1c0] sm:$0xff]   ;;  %v3602_v45 = vld [vmem:[%s4714_s1 + $0x1c8] sm:$0xff]   ;;  %v3606_v49 = vld [vmem:[%s4714_s1 + $0x1d0] sm:$0xff]  }
   0xf   :  { %2335 = vmatprep.mubr.bf16.mxu1 %v2928_v39  ;;  %v3599_v42 = vld [vmem:[%s4714_s1 + $0x100] sm:$0xff]   ;;  %v3603_v46 = vld [vmem:[%s4714_s1 + $0x108] sm:$0xff]   ;;  %v3607_v50 = vld [vmem:[%s4714_s1 + $0x110] sm:$0xff]  }
  0x10   :  { %3220 = vmatpush3.bf16.msra.mxu0 %v3579_v14  ;;  %v3600_v43 = vld [vmem:[%s4714_s1 + $0x180] sm:$0xff]   ;;  %v3604_v47 = vld [vmem:[%s4714_s1 + $0x188] sm:$0xff]   ;;  %v3608_v51 = vld [vmem:[%s4714_s1 + $0x190] sm:$0xff]  }
  0x11   :  { %3242 = vmatpush3.bf16.msra.mxu1 %v3580_v15  ;;  %3221 = vmatprep.subr.bf16.mxu0 %v3581_v16  ;;  %v3609_v52 = vld [vmem:[%s4714_s1 + $0x158] sm:$0xff]   ;;  %v3613_v56 = vld [vmem:[%s4714_s1 + $0x160] sm:$0xff]   ;;  %v3617_v60 = vld [vmem:[%s4714_s1 + $0x168] sm:$0xff]  }
  0x12   :  { %3243 = vmatprep.subr.bf16.mxu1 %v3582_v17  ;;  %v3610_v53 = vld [vmem:[%s4714_s1 + $0x1d8] sm:$0xff]   ;;  %v3614_v57 = vld [vmem:[%s4714_s1 + $0x1e0] sm:$0xff]   ;;  %v3618_v61 = vld [vmem:[%s4714_s1 + $0x1e8] sm:$0xff]  }
  0x13   :  { %v3611_v54 = vld [vmem:[%s4714_s1 + $0x118] sm:$0xff]   ;;  %v3615_v58 = vld [vmem:[%s4714_s1 + $0x120] sm:$0xff]   ;;  %v3619_v62 = vld [vmem:[%s4714_s1 + $0x128] sm:$0xff]  }
  0x14   :  { %3222 = vmatpush3.bf16.msra.mxu0 %v3583_v18  ;;  %v3612_v55 = vld [vmem:[%s4714_s1 + $0x198] sm:$0xff]   ;;  %v3616_v59 = vld [vmem:[%s4714_s1 + $0x1a0] sm:$0xff]   ;;  %v3620_v63 = vld [vmem:[%s4714_s1 + $0x1a8] sm:$0xff]  }
  0x15   :  { %3244 = vmatpush3.bf16.msra.mxu1 %v3584_v19  ;;  %3223 = vmatprep.subr.bf16.mxu0 %v3585_v20  ;;  %v3621_v0 = vld [vmem:[%s4714_s1 + $0x170] sm:$0xff]   ;;  %v3625_v4 = vld [vmem:[%s4714_s1 + $0x178] sm:$0xff]   ;;  %v3629_v16 = vld [vmem:[%s4714_s1 + $0x240] sm:$0xff]  }
  0x16   :  { %3245 = vmatprep.subr.bf16.mxu1 %v3586_v21  ;;  %v3622_v1 = vld [vmem:[%s4714_s1 + $0x1f0] sm:$0xff]   ;;  %v3626_v5 = vld [vmem:[%s4714_s1 + $0x1f8] sm:$0xff]   ;;  %v3630_v17 = vld [vmem:[%s4714_s1 + $0x2c0] sm:$0xff]  }
  0x17   :  { %v3623_v2 = vld [vmem:[%s4714_s1 + $0x130] sm:$0xff]   ;;  %v3627_v6 = vld [vmem:[%s4714_s1 + $0x138] sm:$0xff]   ;;  %v3631_v18 = vld [vmem:[%s4714_s1 + $0x200] sm:$0xff]  }
  0x18   :  { %3224 = vmatpush3.bf16.msra.mxu0 %v3587_v22  ;;  %v3624_v3 = vld [vmem:[%s4714_s1 + $0x1b0] sm:$0xff]   ;;  %v3628_v7 = vld [vmem:[%s4714_s1 + $0x1b8] sm:$0xff]   ;;  %v3632_v19 = vld [vmem:[%s4714_s1 + $0x280] sm:$0xff]  }
  0x19   :  { %3246 = vmatpush3.bf16.msra.mxu1 %v3588_v23  ;;  %3225 = vmatprep.subr.bf16.mxu0 %v3589_v24  ;;  %v17_v8 = vld [vmem:[%s4715_s0 + $0x10] sm:$0xff]  ;;  %v18_v12 = vld [vmem:[%s4715_s0 + $0x18] sm:$0xff]  ;;  %v3633_v20 = vld [vmem:[%s4714_s1 + $0x248] sm:$0xff]  }
  0x1a   :  { %3247 = vmatprep.subr.bf16.mxu1 %v3590_v25  ;;  %v33_v9 = vld [vmem:[%s4715_s0 + $0x90] sm:$0xff]  ;;  %v34_v13 = vld [vmem:[%s4715_s0 + $0x98] sm:$0xff]  ;;  %v3634_v21 = vld [vmem:[%s4714_s1 + $0x2c8] sm:$0xff]  }
  0x1b   :  { %v2929_v10 = vcombine.low %v17_v8, %v33_v9  ;;  %v2930_v11 = vcombine.high %v17_v8, %v33_v9  ;;  %v2931_v14 = vcombine.low %v18_v12, %v34_v13  ;;  %v2932_v15 = vcombine.high %v18_v12, %v34_v13  ;;  %v3635_v22 = vld [vmem:[%s4714_s1 + $0x208] sm:$0xff]   ;;  %v3637_v24 = vld [vmem:[%s4714_s1 + $0x250] sm:$0xff]   ;;  %v3645_v32 = vld [vmem:[%s4714_s1 + $0x260] sm:$0xff]  }
  0x1c   :  { %3226 = vmatpush3.bf16.msra.mxu0 %v3591_v26  ;;  %v3636_v23 = vld [vmem:[%s4714_s1 + $0x288] sm:$0xff]   ;;  %v3638_v25 = vld [vmem:[%s4714_s1 + $0x2d0] sm:$0xff]   ;;  %v3646_v33 = vld [vmem:[%s4714_s1 + $0x2e0] sm:$0xff]  }
  0x1d   :  { %3248 = vmatpush3.bf16.msra.mxu1 %v3592_v27  ;;  %3227 = vmatprep.subr.bf16.mxu0 %v3593_v28  ;;  %v3639_v26 = vld [vmem:[%s4714_s1 + $0x210] sm:$0xff]   ;;  %v3641_v28 = vld [vmem:[%s4714_s1 + $0x258] sm:$0xff]   ;;  %v3647_v34 = vld [vmem:[%s4714_s1 + $0x220] sm:$0xff]  }
  0x1e   :  { %3249 = vmatprep.subr.bf16.mxu1 %v3594_v29  ;;  %v3640_v27 = vld [vmem:[%s4714_s1 + $0x290] sm:$0xff]   ;;  %v3642_v29 = vld [vmem:[%s4714_s1 + $0x2d8] sm:$0xff]   ;;  %v3649_v36 = vld [vmem:[%s4714_s1 + $0x268] sm:$0xff]  }
  0x1f   :  { %v3650_v37 = vld [vmem:[%s4714_s1 + $0x2e8] sm:$0xff]   ;;  %v3677_v8 = vld [vmem:[%s4714_s1 + $0x360] sm:$0xff]  }
  0x20   :  { %3228 = vmatpush3.bf16.msra.mxu0 %v3595_v30  ;;  %v3643_v30 = vld [vmem:[%s4714_s1 + $0x218] sm:$0xff]   ;;  %v3652_v39 = vld [vmem:[%s4714_s1 + $0x2a8] sm:$0xff]   ;;  %v3678_v9 = vld [vmem:[%s4714_s1 + $0x3e0] sm:$0xff]  }
  0x21   :  { %3250 = vmatpush3.bf16.msra.mxu1 %v3596_v31  ;;  %3257 = vmatprep.subr.bf16.mxu0 %v3597_v40  ;;  %v3644_v31 = vld [vmem:[%s4714_s1 + $0x298] sm:$0xff]   ;;  %v3653_v40 = vld [vmem:[%s4714_s1 + $0x270] sm:$0xff]   ;;  %v3681_v12 = vld [vmem:[%s4714_s1 + $0x368] sm:$0xff]  }
  0x22   :  { %3279 = vmatprep.subr.bf16.mxu1 %v3598_v41  ;;  %v3654_v41 = vld [vmem:[%s4714_s1 + $0x2f0] sm:$0xff]   ;;  %v3682_v13 = vld [vmem:[%s4714_s1 + $0x3e8] sm:$0xff]  }
  0x23   :  { %2295 = vmatmul.mubr.bf16.vlgmr.msra.gmra.mrb[0].mxu0 %v2925_v35  ;;  %v3648_v35 = vld [vmem:[%s4714_s1 + $0x2a0] sm:$0xff]  }
  0x24   :  { %2336 = vmatmul.mubr.bf16.vlgmr.msra.gmra.mrb[0].mxu1 %v2927_v38  ;;  %3258 = vmatpush3.bf16.msra.mxu0 %v3599_v42  ;;  %v3651_v38 = vld [vmem:[%s4714_s1 + $0x228] sm:$0xff]   ;;  %v3655_v42 = vld [vmem:[%s4714_s1 + $0x230] sm:$0xff]  }
  0x25   :  { %3280 = vmatpush3.bf16.msra.mxu1 %v3600_v43  ;;  %3259 = vmatprep.subr.bf16.mxu0 %v3601_v44  ;;  %v3656_v43 = vld [vmem:[%s4714_s1 + $0x2b0] sm:$0xff]   ;;  %v3657_v44 = vld [vmem:[%s4714_s1 + $0x278] sm:$0xff]  }
  0x26   :  { %3281 = vmatprep.subr.bf16.mxu1 %v3602_v45  ;;  %2376 = vmatprep.mubr.bf16.mxu0 %v2930_v11  ;;  %v3658_v45 = vld [vmem:[%s4714_s1 + $0x2f8] sm:$0xff]   ;;  %v3680_v11 = vld [vmem:[%s4714_s1 + $0x3a0] sm:$0xff]  }
  0x27   :  { %2417 = vmatprep.mubr.bf16.mxu1 %v2932_v15  ;;  %v3684_v15 = vld [vmem:[%s4714_s1 + $0x3a8] sm:$0xff]  }
  0x28   :  { %3260 = vmatpush3.bf16.msra.mxu0 %v3603_v46  ;;  %v3659_v46 = vld [vmem:[%s4714_s1 + $0x238] sm:$0xff]  }
  0x29   :  { %3282 = vmatpush3.bf16.msra.mxu1 %v3604_v47  ;;  %3261 = vmatprep.subr.bf16.mxu0 %v3605_v48  ;;  %v3660_v47 = vld [vmem:[%s4714_s1 + $0x2b8] sm:$0xff]   ;;  %v19_v48 = vld [vmem:[%s4715_s0 + $0x20] sm:$0xff] }
  0x2a   :  { %3283 = vmatprep.subr.bf16.mxu1 %v3606_v49  ;;  %v35_v49 = vld [vmem:[%s4715_s0 + $0xa0] sm:$0xff] }
  0x2c   :  { %3262 = vmatpush3.bf16.msra.mxu0 %v3607_v50  ;;  %v20_v50 = vld [vmem:[%s4715_s0 + $0x28] sm:$0xff] }
  0x2d   :  { %3284 = vmatpush3.bf16.msra.mxu1 %v3608_v51  ;;  %3263 = vmatprep.subr.bf16.mxu0 %v3609_v52  ;;  %v36_v51 = vld [vmem:[%s4715_s0 + $0xa8] sm:$0xff]  ;;  %v2933_v52 = vcombine.low %v19_v48, %v35_v49 }
  0x2e   :  { %3285 = vmatprep.subr.bf16.mxu1 %v3610_v53  ;;  %v2934_v53 = vcombine.high %v19_v48, %v35_v49  ;;  %v3709_v48 = vld [vmem:[%s4714_s1 + $0x460] sm:$0xff]  }
  0x2f   :  { %v3710_v49 = vld [vmem:[%s4714_s1 + $0x4e0] sm:$0xff]  }
  0x30   :  { %3264 = vmatpush3.bf16.msra.mxu0 %v3611_v54  ;;  %v2935_v54 = vcombine.low %v20_v50, %v36_v51 }
  0x31   :  { %3286 = vmatpush3.bf16.msra.mxu1 %v3612_v55  ;;  %3265 = vmatprep.subr.bf16.mxu0 %v3613_v56  ;;  %v2936_v55 = vcombine.high %v20_v50, %v36_v51  ;;  %v3661_v56 = vld [vmem:[%s4714_s1 + $0x340] sm:$0xff]  }
  0x32   :  { %3287 = vmatprep.subr.bf16.mxu1 %v3614_v57  ;;  %v3662_v57 = vld [vmem:[%s4714_s1 + $0x3c0] sm:$0xff]  }
  0x33   :  { %v3711_v50 = vld [vmem:[%s4714_s1 + $0x420] sm:$0xff]  }
  0x34   :  { %3266 = vmatpush3.bf16.msra.mxu0 %v3615_v58  ;;  %v3663_v58 = vld [vmem:[%s4714_s1 + $0x300] sm:$0xff]  }
  0x35   :  { %3288 = vmatpush3.bf16.msra.mxu1 %v3616_v59  ;;  %3267 = vmatprep.subr.bf16.mxu0 %v3617_v60  ;;  %v3664_v59 = vld [vmem:[%s4714_s1 + $0x380] sm:$0xff]   ;;  %v3665_v60 = vld [vmem:[%s4714_s1 + $0x348] sm:$0xff]  }
  0x36   :  { %3289 = vmatprep.subr.bf16.mxu1 %v3618_v61  ;;  %v3666_v61 = vld [vmem:[%s4714_s1 + $0x3c8] sm:$0xff]   ;;  %v3712_v51 = vld [vmem:[%s4714_s1 + $0x4a0] sm:$0xff]  }
  0x38   :  { %3268 = vmatpush3.bf16.msra.mxu0 %v3619_v62  ;;  %v3667_v62 = vld [vmem:[%s4714_s1 + $0x308] sm:$0xff]  }
  0x39   :  { %3290 = vmatpush3.bf16.msra.mxu1 %v3620_v63  ;;  %3269 = vmatprep.subr.bf16.mxu0 %v3621_v0  ;;  %v3668_v63 = vld [vmem:[%s4714_s1 + $0x388] sm:$0xff]   ;;  %v3669_v0 = vld [vmem:[%s4714_s1 + $0x350] sm:$0xff]  }
  0x3a   :  { %3291 = vmatprep.subr.bf16.mxu1 %v3622_v1  ;;  %v3670_v1 = vld [vmem:[%s4714_s1 + $0x3d0] sm:$0xff]  }
  0x3c   :  { %3270 = vmatpush3.bf16.msra.mxu0 %v3623_v2  ;;  %v3671_v2 = vld [vmem:[%s4714_s1 + $0x310] sm:$0xff]  }
  0x3d   :  { %3292 = vmatpush3.bf16.msra.mxu1 %v3624_v3  ;;  %3271 = vmatprep.subr.bf16.mxu0 %v3625_v4  ;;  %v3672_v3 = vld [vmem:[%s4714_s1 + $0x390] sm:$0xff]   ;;  %v3673_v4 = vld [vmem:[%s4714_s1 + $0x358] sm:$0xff]  }
  0x3e   :  { %3293 = vmatprep.subr.bf16.mxu1 %v3626_v5  ;;  %v3674_v5 = vld [vmem:[%s4714_s1 + $0x3d8] sm:$0xff]  }
  0x40   :  { %3272 = vmatpush3.bf16.msra.mxu0 %v3627_v6  ;;  %v3675_v6 = vld [vmem:[%s4714_s1 + $0x318] sm:$0xff]  }
  0x41   :  { %3294 = vmatpush3.bf16.msra.mxu1 %v3628_v7  ;;  %3301 = vmatprep.subr.bf16.mxu0 %v3629_v16  ;;  %v3676_v7 = vld [vmem:[%s4714_s1 + $0x398] sm:$0xff]   ;;  %v3685_v16 = vld [vmem:[%s4714_s1 + $0x370] sm:$0xff]  }
  0x42   :  { %3323 = vmatprep.subr.bf16.mxu1 %v3630_v17  ;;  %v3686_v17 = vld [vmem:[%s4714_s1 + $0x3f0] sm:$0xff]  }
  0x43   :  { %2377 = vmatmul.mubr.bf16.vlgmr.msra.gmra.mrb[4].mxu0 %v2929_v10  ;;  %v3679_v10 = vld [vmem:[%s4714_s1 + $0x320] sm:$0xff]  }
  0x44   :  { %2418 = vmatmul.mubr.bf16.vlgmr.msra.gmra.mrb[4].mxu1 %v2931_v14  ;;  %3302 = vmatpush3.bf16.msra.mxu0 %v3631_v18  ;;  %v3683_v14 = vld [vmem:[%s4714_s1 + $0x328] sm:$0xff]   ;;  %v3687_v18 = vld [vmem:[%s4714_s1 + $0x330] sm:$0xff]  }
  0x45   :  { %3324 = vmatpush3.bf16.msra.mxu1 %v3632_v19  ;;  %3303 = vmatprep.subr.bf16.mxu0 %v3633_v20  ;;  %v3688_v19 = vld [vmem:[%s4714_s1 + $0x3b0] sm:$0xff]   ;;  %v3689_v20 = vld [vmem:[%s4714_s1 + $0x378] sm:$0xff]  }
  0x46   :  { %3325 = vmatprep.subr.bf16.mxu1 %v3634_v21  ;;  %2458 = vmatprep.mubr.bf16.mxu0 %v2934_v53  ;;  %v3690_v21 = vld [vmem:[%s4714_s1 + $0x3f8] sm:$0xff]   ;;  %v3714_v53 = vld [vmem:[%s4714_s1 + $0x4e8] sm:$0xff]  }
  0x47   :  { %2499 = vmatprep.mubr.bf16.mxu1 %v2936_v55  ;;  %v3716_v55 = vld [vmem:[%s4714_s1 + $0x4a8] sm:$0xff]  }
  0x48   :  { %3304 = vmatpush3.bf16.msra.mxu0 %v3635_v22  ;;  %v3691_v22 = vld [vmem:[%s4714_s1 + $0x338] sm:$0xff]  }
  0x49   :  { %3326 = vmatpush3.bf16.msra.mxu1 %v3636_v23  ;;  %3305 = vmatprep.subr.bf16.mxu0 %v3637_v24  ;;  %v3692_v23 = vld [vmem:[%s4714_s1 + $0x3b8] sm:$0xff]   ;;  %v21_v24 = vld [vmem:[%s4715_s0 + $0x30] sm:$0xff] }
  0x4a   :  { %3327 = vmatprep.subr.bf16.mxu1 %v3638_v25  ;;  %v37_v25 = vld [vmem:[%s4715_s0 + $0xb0] sm:$0xff] }
  0x4c   :  { %3306 = vmatpush3.bf16.msra.mxu0 %v3639_v26  ;;  %v22_v26 = vld [vmem:[%s4715_s0 + $0x38] sm:$0xff] }
  0x4d   :  { %3328 = vmatpush3.bf16.msra.mxu1 %v3640_v27  ;;  %3307 = vmatprep.subr.bf16.mxu0 %v3641_v28  ;;  %v2937_v27 = vcombine.low %v21_v24, %v37_v25  ;;  %v2938_v28 = vcombine.high %v21_v24, %v37_v25  ;;  %v3741_v24 = vld [vmem:[%s4714_s1 + $0x560] sm:$0xff]  }
  0x4e   :  { %3329 = vmatprep.subr.bf16.mxu1 %v3642_v29  ;;  %v38_v29 = vld [vmem:[%s4715_s0 + $0xb8] sm:$0xff]  ;;  %v3742_v25 = vld [vmem:[%s4714_s1 + $0x5e0] sm:$0xff]  }
  0x50   :  { %3308 = vmatpush3.bf16.msra.mxu0 %v3643_v30  ;;  %v2939_v30 = vcombine.low %v22_v26, %v38_v29 }
  0x51   :  { %3330 = vmatpush3.bf16.msra.mxu1 %v3644_v31  ;;  %3309 = vmatprep.subr.bf16.mxu0 %v3645_v32  ;;  %v2940_v31 = vcombine.high %v22_v26, %v38_v29  ;;  %v3693_v32 = vld [vmem:[%s4714_s1 + $0x440] sm:$0xff]   ;;  %v3746_v29 = vld [vmem:[%s4714_s1 + $0x5e8] sm:$0xff]  }
  0x52   :  { %3331 = vmatprep.subr.bf16.mxu1 %v3646_v33  ;;  %v3694_v33 = vld [vmem:[%s4714_s1 + $0x4c0] sm:$0xff]  }
  0x53   :  { %v3743_v26 = vld [vmem:[%s4714_s1 + $0x520] sm:$0xff]  }
  0x54   :  { %3310 = vmatpush3.bf16.msra.mxu0 %v3647_v34  ;;  %v3695_v34 = vld [vmem:[%s4714_s1 + $0x400] sm:$0xff]  }
  0x55   :  { %3332 = vmatpush3.bf16.msra.mxu1 %v3648_v35  ;;  %3311 = vmatprep.subr.bf16.mxu0 %v3649_v36  ;;  %v3696_v35 = vld [vmem:[%s4714_s1 + $0x480] sm:$0xff]   ;;  %v3697_v36 = vld [vmem:[%s4714_s1 + $0x448] sm:$0xff]  }
  0x56   :  { %3333 = vmatprep.subr.bf16.mxu1 %v3650_v37  ;;  %v3698_v37 = vld [vmem:[%s4714_s1 + $0x4c8] sm:$0xff]  }
  0x58   :  { %3312 = vmatpush3.bf16.msra.mxu0 %v3651_v38  ;;  %v3699_v38 = vld [vmem:[%s4714_s1 + $0x408] sm:$0xff]  }
  0x59   :  { %3334 = vmatpush3.bf16.msra.mxu1 %v3652_v39  ;;  %3313 = vmatprep.subr.bf16.mxu0 %v3653_v40  ;;  %v3700_v39 = vld [vmem:[%s4714_s1 + $0x488] sm:$0xff]   ;;  %v3701_v40 = vld [vmem:[%s4714_s1 + $0x450] sm:$0xff]  }
  0x5a   :  { %3335 = vmatprep.subr.bf16.mxu1 %v3654_v41  ;;  %v3702_v41 = vld [vmem:[%s4714_s1 + $0x4d0] sm:$0xff]  }
  0x5c   :  { %3314 = vmatpush3.bf16.msra.mxu0 %v3655_v42  ;;  %v3703_v42 = vld [vmem:[%s4714_s1 + $0x410] sm:$0xff]  }
  0x5d   :  { %3336 = vmatpush3.bf16.msra.mxu1 %v3656_v43  ;;  %3315 = vmatprep.subr.bf16.mxu0 %v3657_v44  ;;  %v3704_v43 = vld [vmem:[%s4714_s1 + $0x490] sm:$0xff]   ;;  %v3705_v44 = vld [vmem:[%s4714_s1 + $0x458] sm:$0xff]  }
  0x5e   :  { %3337 = vmatprep.subr.bf16.mxu1 %v3658_v45  ;;  %v3706_v45 = vld [vmem:[%s4714_s1 + $0x4d8] sm:$0xff]  }
  0x60   :  { %3316 = vmatpush3.bf16.msra.mxu0 %v3659_v46  ;;  %v3707_v46 = vld [vmem:[%s4714_s1 + $0x418] sm:$0xff]  }
  0x61   :  { %3338 = vmatpush3.bf16.msra.mxu1 %v3660_v47  ;;  %3345 = vmatprep.subr.bf16.mxu0 %v3661_v56  ;;  %v3708_v47 = vld [vmem:[%s4714_s1 + $0x498] sm:$0xff]   ;;  %v3717_v56 = vld [vmem:[%s4714_s1 + $0x470] sm:$0xff]  }
  0x62   :  { %3367 = vmatprep.subr.bf16.mxu1 %v3662_v57  ;;  %v3718_v57 = vld [vmem:[%s4714_s1 + $0x4f0] sm:$0xff]  }
  0x63   :  { %2459 = vmatmul.mubr.bf16.vlgmr.msra.gmra.mrb[8].mxu0 %v2933_v52  ;;  %v3713_v52 = vld [vmem:[%s4714_s1 + $0x468] sm:$0xff]  }
  0x64   :  { %2500 = vmatmul.mubr.bf16.vlgmr.msra.gmra.mrb[8].mxu1 %v2935_v54  ;;  %3346 = vmatpush3.bf16.msra.mxu0 %v3663_v58  ;;  %v3715_v54 = vld [vmem:[%s4714_s1 + $0x428] sm:$0xff]   ;;  %v3719_v58 = vld [vmem:[%s4714_s1 + $0x430] sm:$0xff]  }
  0x65   :  { %3368 = vmatpush3.bf16.msra.mxu1 %v3664_v59  ;;  %3347 = vmatprep.subr.bf16.mxu0 %v3665_v60  ;;  %v3720_v59 = vld [vmem:[%s4714_s1 + $0x4b0] sm:$0xff]   ;;  %v3721_v60 = vld [vmem:[%s4714_s1 + $0x478] sm:$0xff]  }
  0x66   :  { %3369 = vmatprep.subr.bf16.mxu1 %v3666_v61  ;;  %2540 = vmatprep.mubr.bf16.mxu0 %v2938_v28  ;;  %v3722_v61 = vld [vmem:[%s4714_s1 + $0x4f8] sm:$0xff]   ;;  %v3745_v28 = vld [vmem:[%s4714_s1 + $0x568] sm:$0xff]  }
  0x67   :  { %2581 = vmatprep.mubr.bf16.mxu1 %v2940_v31  ;;  %v3748_v31 = vld [vmem:[%s4714_s1 + $0x5a8] sm:$0xff]  }
  0x68   :  { %3348 = vmatpush3.bf16.msra.mxu0 %v3667_v62  ;;  %v3723_v62 = vld [vmem:[%s4714_s1 + $0x438] sm:$0xff]  }
  0x69   :  { %3370 = vmatpush3.bf16.msra.mxu1 %v3668_v63  ;;  %3349 = vmatprep.subr.bf16.mxu0 %v3669_v0  ;;  %v3724_v63 = vld [vmem:[%s4714_s1 + $0x4b8] sm:$0xff]   ;;  %v23_v0 = vld [vmem:[%s4715_s0 + $0x40] sm:$0xff] }
  0x6a   :  { %3371 = vmatprep.subr.bf16.mxu1 %v3670_v1  ;;  %v39_v1 = vld [vmem:[%s4715_s0 + $0xc0] sm:$0xff] }
  0x6c   :  { %3350 = vmatpush3.bf16.msra.mxu0 %v3671_v2  ;;  %v2941_v2 = vcombine.low %v23_v0, %v39_v1 }
  0x6d   :  { %3372 = vmatpush3.bf16.msra.mxu1 %v3672_v3  ;;  %3351 = vmatprep.subr.bf16.mxu0 %v3673_v4  ;;  %v2942_v3 = vcombine.high %v23_v0, %v39_v1  ;;  %v24_v4 = vld [vmem:[%s4715_s0 + $0x48] sm:$0xff]  ;;  %v3773_v0 = vld [vmem:[%s4714_s1 + $0x660] sm:$0xff]  }
  0x6e   :  { %3373 = vmatprep.subr.bf16.mxu1 %v3674_v5  ;;  %v40_v5 = vld [vmem:[%s4715_s0 + $0xc8] sm:$0xff]  ;;  %v3774_v1 = vld [vmem:[%s4714_s1 + $0x6e0] sm:$0xff]  }
  0x70   :  { %3352 = vmatpush3.bf16.msra.mxu0 %v3675_v6  ;;  %v2943_v6 = vcombine.low %v24_v4, %v40_v5 }
  0x71   :  { %3374 = vmatpush3.bf16.msra.mxu1 %v3676_v7  ;;  %3353 = vmatprep.subr.bf16.mxu0 %v3677_v8  ;;  %v2944_v7 = vcombine.high %v24_v4, %v40_v5  ;;  %v3725_v8 = vld [vmem:[%s4714_s1 + $0x540] sm:$0xff]   ;;  %v3777_v4 = vld [vmem:[%s4714_s1 + $0x668] sm:$0xff]  }
  0x72   :  { %3375 = vmatprep.subr.bf16.mxu1 %v3678_v9  ;;  %v3726_v9 = vld [vmem:[%s4714_s1 + $0x5c0] sm:$0xff]   ;;  %v3778_v5 = vld [vmem:[%s4714_s1 + $0x6e8] sm:$0xff]  }
  0x74   :  { %3354 = vmatpush3.bf16.msra.mxu0 %v3679_v10  ;;  %v3727_v10 = vld [vmem:[%s4714_s1 + $0x500] sm:$0xff]  }
  0x75   :  { %3376 = vmatpush3.bf16.msra.mxu1 %v3680_v11  ;;  %3355 = vmatprep.subr.bf16.mxu0 %v3681_v12  ;;  %v3728_v11 = vld [vmem:[%s4714_s1 + $0x580] sm:$0xff]   ;;  %v3729_v12 = vld [vmem:[%s4714_s1 + $0x548] sm:$0xff]  }
  0x76   :  { %3377 = vmatprep.subr.bf16.mxu1 %v3682_v13  ;;  %v3730_v13 = vld [vmem:[%s4714_s1 + $0x5c8] sm:$0xff]  }
  0x78   :  { %3356 = vmatpush3.bf16.msra.mxu0 %v3683_v14  ;;  %v3731_v14 = vld [vmem:[%s4714_s1 + $0x508] sm:$0xff]  }
  0x79   :  { %3378 = vmatpush3.bf16.msra.mxu1 %v3684_v15  ;;  %3357 = vmatprep.subr.bf16.mxu0 %v3685_v16  ;;  %v3732_v15 = vld [vmem:[%s4714_s1 + $0x588] sm:$0xff]   ;;  %v3733_v16 = vld [vmem:[%s4714_s1 + $0x550] sm:$0xff]  }
  0x7a   :  { %3379 = vmatprep.subr.bf16.mxu1 %v3686_v17  ;;  %v3734_v17 = vld [vmem:[%s4714_s1 + $0x5d0] sm:$0xff]  }
  0x7c   :  { %3358 = vmatpush3.bf16.msra.mxu0 %v3687_v18  ;;  %v3735_v18 = vld [vmem:[%s4714_s1 + $0x510] sm:$0xff]  }
  0x7d   :  { %3380 = vmatpush3.bf16.msra.mxu1 %v3688_v19  ;;  %3359 = vmatprep.subr.bf16.mxu0 %v3689_v20  ;;  %v3736_v19 = vld [vmem:[%s4714_s1 + $0x590] sm:$0xff]   ;;  %v3737_v20 = vld [vmem:[%s4714_s1 + $0x558] sm:$0xff]  }
  0x7e   :  { %3381 = vmatprep.subr.bf16.mxu1 %v3690_v21  ;;  %v3738_v21 = vld [vmem:[%s4714_s1 + $0x5d8] sm:$0xff]  }
  0x80   :  { %3360 = vmatpush3.bf16.msra.mxu0 %v3691_v22  ;;  %v3739_v22 = vld [vmem:[%s4714_s1 + $0x518] sm:$0xff]  }
  0x81   :  { %3382 = vmatpush3.bf16.msra.mxu1 %v3692_v23  ;;  %3389 = vmatprep.subr.bf16.mxu0 %v3693_v32  ;;  %v3740_v23 = vld [vmem:[%s4714_s1 + $0x598] sm:$0xff]   ;;  %v3749_v32 = vld [vmem:[%s4714_s1 + $0x570] sm:$0xff]  }
  0x82   :  { %3411 = vmatprep.subr.bf16.mxu1 %v3694_v33  ;;  %v3750_v33 = vld [vmem:[%s4714_s1 + $0x5f0] sm:$0xff]  }
  0x83   :  { %2541 = vmatmul.mubr.bf16.vlgmr.msra.gmra.mrb[12].mxu0 %v2937_v27  ;;  %v3744_v27 = vld [vmem:[%s4714_s1 + $0x5a0] sm:$0xff]  }
  0x84   :  { %2582 = vmatmul.mubr.bf16.vlgmr.msra.gmra.mrb[12].mxu1 %v2939_v30  ;;  %3390 = vmatpush3.bf16.msra.mxu0 %v3695_v34  ;;  %v3747_v30 = vld [vmem:[%s4714_s1 + $0x528] sm:$0xff]   ;;  %v3751_v34 = vld [vmem:[%s4714_s1 + $0x530] sm:$0xff]  }
  0x85   :  { %3412 = vmatpush3.bf16.msra.mxu1 %v3696_v35  ;;  %3391 = vmatprep.subr.bf16.mxu0 %v3697_v36  ;;  %v3752_v35 = vld [vmem:[%s4714_s1 + $0x5b0] sm:$0xff]   ;;  %v3753_v36 = vld [vmem:[%s4714_s1 + $0x578] sm:$0xff]  }
  0x86   :  { %3413 = vmatprep.subr.bf16.mxu1 %v3698_v37  ;;  %2622 = vmatprep.mubr.bf16.mxu0 %v2942_v3  ;;  %v3754_v37 = vld [vmem:[%s4714_s1 + $0x5f8] sm:$0xff]   ;;  %v3776_v3 = vld [vmem:[%s4714_s1 + $0x6a0] sm:$0xff]  }
  0x87   :  { %2663 = vmatprep.mubr.bf16.mxu1 %v2944_v7  ;;  %v3780_v7 = vld [vmem:[%s4714_s1 + $0x6a8] sm:$0xff]  }
  0x88   :  { %3392 = vmatpush3.bf16.msra.mxu0 %v3699_v38  ;;  %v3755_v38 = vld [vmem:[%s4714_s1 + $0x538] sm:$0xff]  }
  0x89   :  { %3414 = vmatpush3.bf16.msra.mxu1 %v3700_v39  ;;  %3393 = vmatprep.subr.bf16.mxu0 %v3701_v40  ;;  %v3756_v39 = vld [vmem:[%s4714_s1 + $0x5b8] sm:$0xff]   ;;  %v25_v40 = vld [vmem:[%s4715_s0 + $0x50] sm:$0xff] }
  0x8a   :  { %3415 = vmatprep.subr.bf16.mxu1 %v3702_v41  ;;  %v41_v41 = vld [vmem:[%s4715_s0 + $0xd0] sm:$0xff] }
  0x8c   :  { %3394 = vmatpush3.bf16.msra.mxu0 %v3703_v42  ;;  %v26_v42 = vld [vmem:[%s4715_s0 + $0x58] sm:$0xff] }
  0x8d   :  { %3416 = vmatpush3.bf16.msra.mxu1 %v3704_v43  ;;  %3395 = vmatprep.subr.bf16.mxu0 %v3705_v44  ;;  %v42_v43 = vld [vmem:[%s4715_s0 + $0xd8] sm:$0xff]  ;;  %v2945_v44 = vcombine.low %v25_v40, %v41_v41 }
  0x8e   :  { %3417 = vmatprep.subr.bf16.mxu1 %v3706_v45  ;;  %v2946_v45 = vcombine.high %v25_v40, %v41_v41  ;;  %v3804_v41 = vld [vmem:[%s4714_s1 + $0x798] sm:$0xff]  }
  0x90   :  { %3396 = vmatpush3.bf16.msra.mxu0 %v3707_v46  ;;  %v2947_v46 = vcombine.low %v26_v42, %v42_v43 }
  0x91   :  { %3418 = vmatpush3.bf16.msra.mxu1 %v3708_v47  ;;  %3397 = vmatprep.subr.bf16.mxu0 %v3709_v48  ;;  %v2948_v47 = vcombine.high %v26_v42, %v42_v43  ;;  %v3757_v48 = vld [vmem:[%s4714_s1 + $0x640] sm:$0xff]  }
  0x92   :  { %3419 = vmatprep.subr.bf16.mxu1 %v3710_v49  ;;  %v3758_v49 = vld [vmem:[%s4714_s1 + $0x6c0] sm:$0xff]  }
  0x93   :  { %v3805_v43 = vld [vmem:[%s4714_s1 + $0x760] sm:$0xff]  }
  0x94   :  { %3398 = vmatpush3.bf16.msra.mxu0 %v3711_v50  ;;  %v3759_v50 = vld [vmem:[%s4714_s1 + $0x600] sm:$0xff]  }
  0x95   :  { %3420 = vmatpush3.bf16.msra.mxu1 %v3712_v51  ;;  %3399 = vmatprep.subr.bf16.mxu0 %v3713_v52  ;;  %v3760_v51 = vld [vmem:[%s4714_s1 + $0x680] sm:$0xff]   ;;  %v3761_v52 = vld [vmem:[%s4714_s1 + $0x648] sm:$0xff]  }
  0x96   :  { %3421 = vmatprep.subr.bf16.mxu1 %v3714_v53  ;;  %v3762_v53 = vld [vmem:[%s4714_s1 + $0x6c8] sm:$0xff]  }
  0x98   :  { %3400 = vmatpush3.bf16.msra.mxu0 %v3715_v54  ;;  %v3763_v54 = vld [vmem:[%s4714_s1 + $0x608] sm:$0xff]  }
  0x99   :  { %3422 = vmatpush3.bf16.msra.mxu1 %v3716_v55  ;;  %3401 = vmatprep.subr.bf16.mxu0 %v3717_v56  ;;  %v3764_v55 = vld [vmem:[%s4714_s1 + $0x688] sm:$0xff]   ;;  %v3765_v56 = vld [vmem:[%s4714_s1 + $0x650] sm:$0xff]  }
  0x9a   :  { %3423 = vmatprep.subr.bf16.mxu1 %v3718_v57  ;;  %v3766_v57 = vld [vmem:[%s4714_s1 + $0x6d0] sm:$0xff]  }
  0x9c   :  { %3402 = vmatpush3.bf16.msra.mxu0 %v3719_v58  ;;  %v3767_v58 = vld [vmem:[%s4714_s1 + $0x610] sm:$0xff]  }
  0x9d   :  { %3424 = vmatpush3.bf16.msra.mxu1 %v3720_v59  ;;  %3403 = vmatprep.subr.bf16.mxu0 %v3721_v60  ;;  %v3768_v59 = vld [vmem:[%s4714_s1 + $0x690] sm:$0xff]   ;;  %v3769_v60 = vld [vmem:[%s4714_s1 + $0x658] sm:$0xff]  }
  0x9e   :  { %3425 = vmatprep.subr.bf16.mxu1 %v3722_v61  ;;  %v3770_v61 = vld [vmem:[%s4714_s1 + $0x6d8] sm:$0xff]  }
  0xa0   :  { %3404 = vmatpush3.bf16.msra.mxu0 %v3723_v62  ;;  %v3771_v62 = vld [vmem:[%s4714_s1 + $0x618] sm:$0xff]  }
  0xa1   :  { %3426 = vmatpush3.bf16.msra.mxu1 %v3724_v63  ;;  %3433 = vmatprep.subr.bf16.mxu0 %v3725_v8  ;;  %v3772_v63 = vld [vmem:[%s4714_s1 + $0x698] sm:$0xff]   ;;  %v3781_v8 = vld [vmem:[%s4714_s1 + $0x670] sm:$0xff]  }
  0xa2   :  { %3455 = vmatprep.subr.bf16.mxu1 %v3726_v9  ;;  %v3782_v9 = vld [vmem:[%s4714_s1 + $0x6f0] sm:$0xff]  }
  0xa3   :  { %2623 = vmatmul.mubr.bf16.vlgmr.msra.gmra.mrb[16].mxu0 %v2941_v2  ;;  %v3775_v2 = vld [vmem:[%s4714_s1 + $0x620] sm:$0xff]  }
  0xa4   :  { %2664 = vmatmul.mubr.bf16.vlgmr.msra.gmra.mrb[16].mxu1 %v2943_v6  ;;  %3434 = vmatpush3.bf16.msra.mxu0 %v3727_v10  ;;  %v3779_v6 = vld [vmem:[%s4714_s1 + $0x628] sm:$0xff]   ;;  %v3783_v10 = vld [vmem:[%s4714_s1 + $0x630] sm:$0xff]  }
  0xa5   :  { %3456 = vmatpush3.bf16.msra.mxu1 %v3728_v11  ;;  %3435 = vmatprep.subr.bf16.mxu0 %v3729_v12  ;;  %v3784_v11 = vld [vmem:[%s4714_s1 + $0x6b0] sm:$0xff]   ;;  %v3785_v12 = vld [vmem:[%s4714_s1 + $0x678] sm:$0xff]  }
  0xa6   :  { %3457 = vmatprep.subr.bf16.mxu1 %v3730_v13  ;;  %2704 = vmatprep.mubr.bf16.mxu0 %v2946_v45  ;;  %v3786_v13 = vld [vmem:[%s4714_s1 + $0x6f8] sm:$0xff]  }
  0xa7   :  { %2745 = vmatprep.mubr.bf16.mxu1 %v2948_v47 }
  0xa8   :  { %3436 = vmatpush3.bf16.msra.mxu0 %v3731_v14  ;;  %v3787_v14 = vld [vmem:[%s4714_s1 + $0x638] sm:$0xff]  }
  0xa9   :  { %3458 = vmatpush3.bf16.msra.mxu1 %v3732_v15  ;;  %3437 = vmatprep.subr.bf16.mxu0 %v3733_v16  ;;  %v3788_v15 = vld [vmem:[%s4714_s1 + $0x6b8] sm:$0xff]   ;;  %v27_v16 = vld [vmem:[%s4715_s0 + $0x60] sm:$0xff] }
  0xaa   :  { %3459 = vmatprep.subr.bf16.mxu1 %v3734_v17  ;;  %v43_v17 = vld [vmem:[%s4715_s0 + $0xe0] sm:$0xff] }
  0xac   :  { %3438 = vmatpush3.bf16.msra.mxu0 %v3735_v18  ;;  %v28_v18 = vld [vmem:[%s4715_s0 + $0x68] sm:$0xff] }
  0xad   :  { %3460 = vmatpush3.bf16.msra.mxu1 %v3736_v19  ;;  %3439 = vmatprep.subr.bf16.mxu0 %v3737_v20  ;;  %v2949_v19 = vcombine.low %v27_v16, %v43_v17  ;;  %v2950_v20 = vcombine.high %v27_v16, %v43_v17 }
  0xae   :  { %3461 = vmatprep.subr.bf16.mxu1 %v3738_v21  ;;  %v44_v21 = vld [vmem:[%s4715_s0 + $0xe8] sm:$0xff] }
  0xb0   :  { %3440 = vmatpush3.bf16.msra.mxu0 %v3739_v22  ;;  %v2951_v22 = vcombine.low %v28_v18, %v44_v21 }
  0xb1   :  { %3462 = vmatpush3.bf16.msra.mxu1 %v3740_v23  ;;  %3441 = vmatprep.subr.bf16.mxu0 %v3741_v24  ;;  %v2952_v23 = vcombine.high %v28_v18, %v44_v21  ;;  %v3789_v24 = vld [vmem:[%s4714_s1 + $0x740] sm:$0xff]  }
  0xb2   :  { %3463 = vmatprep.subr.bf16.mxu1 %v3742_v25  ;;  %v3790_v25 = vld [vmem:[%s4714_s1 + $0x7c0] sm:$0xff]  }
  0xb4   :  { %3442 = vmatpush3.bf16.msra.mxu0 %v3743_v26  ;;  %v3791_v26 = vld [vmem:[%s4714_s1 + $0x700] sm:$0xff]  }
  0xb5   :  { %3464 = vmatpush3.bf16.msra.mxu1 %v3744_v27  ;;  %3443 = vmatprep.subr.bf16.mxu0 %v3745_v28  ;;  %v3792_v27 = vld [vmem:[%s4714_s1 + $0x780] sm:$0xff]   ;;  %v3793_v28 = vld [vmem:[%s4714_s1 + $0x748] sm:$0xff]  }
  0xb6   :  { %3465 = vmatprep.subr.bf16.mxu1 %v3746_v29  ;;  %v3794_v29 = vld [vmem:[%s4714_s1 + $0x7c8] sm:$0xff]  }
  0xb8   :  { %3444 = vmatpush3.bf16.msra.mxu0 %v3747_v30  ;;  %v3795_v30 = vld [vmem:[%s4714_s1 + $0x708] sm:$0xff]  }
  0xb9   :  { %3466 = vmatpush3.bf16.msra.mxu1 %v3748_v31  ;;  %3445 = vmatprep.subr.bf16.mxu0 %v3749_v32  ;;  %v3796_v31 = vld [vmem:[%s4714_s1 + $0x788] sm:$0xff]   ;;  %v3797_v32 = vld [vmem:[%s4714_s1 + $0x750] sm:$0xff]  }
  0xba   :  { %3467 = vmatprep.subr.bf16.mxu1 %v3750_v33  ;;  %v3798_v33 = vld [vmem:[%s4714_s1 + $0x7d0] sm:$0xff]  }
  0xbc   :  { %3446 = vmatpush3.bf16.msra.mxu0 %v3751_v34  ;;  %v3799_v34 = vld [vmem:[%s4714_s1 + $0x710] sm:$0xff]  }
  0xbd   :  { %3468 = vmatpush3.bf16.msra.mxu1 %v3752_v35  ;;  %3447 = vmatprep.subr.bf16.mxu0 %v3753_v36  ;;  %v3800_v35 = vld [vmem:[%s4714_s1 + $0x790] sm:$0xff]   ;;  %v3801_v36 = vld [vmem:[%s4714_s1 + $0x758] sm:$0xff]  }
  0xbe   :  { %3469 = vmatprep.subr.bf16.mxu1 %v3754_v37  ;;  %v3802_v37 = vld [vmem:[%s4714_s1 + $0x7d8] sm:$0xff]  }
  0xc0   :  { %3448 = vmatpush3.bf16.msra.mxu0 %v3755_v38 }
  0xc1   :  { %3470 = vmatpush3.bf16.msra.mxu1 %v3756_v39  ;;  %3477 = vmatprep.subr.bf16.mxu0 %v3757_v48  ;;  %v3803_v39 = vld [vmem:[%s4714_s1 + $0x718] sm:$0xff]  }
  0xc2   :  { %3499 = vmatprep.subr.bf16.mxu1 %v3758_v49  ;;  %v3807_v49 = vld [vmem:[%s4714_s1 + $0x720] sm:$0xff]  }
  0xc3   :  { %2705 = vmatmul.mubr.bf16.vlgmr.msra.gmra.mrb[20].mxu0 %v2945_v44 }
  0xc4   :  { %2746 = vmatmul.mubr.bf16.vlgmr.msra.gmra.mrb[20].mxu1 %v2947_v46  ;;  %3478 = vmatpush3.bf16.msra.mxu0 %v3759_v50  ;;  %v3806_v46 = vld [vmem:[%s4714_s1 + $0x7e0] sm:$0xff]  }
  0xc5   :  { %3500 = vmatpush3.bf16.msra.mxu1 %v3760_v51  ;;  %3479 = vmatprep.subr.bf16.mxu0 %v3761_v52  ;;  %v3808_v51 = vld [vmem:[%s4714_s1 + $0x7a0] sm:$0xff]  }
  0xc6   :  { %3501 = vmatprep.subr.bf16.mxu1 %v3762_v53  ;;  %2786 = vmatprep.mubr.bf16.mxu0 %v2950_v20  ;;  %v2924_v52 = vld [vmem:[%s4716_s2] ss:$0 sm:$0xff] }
  0xc7   :  { %2827 = vmatprep.mubr.bf16.mxu1 %v2952_v23 }
  0xc8   :  { %3480 = vmatpush3.bf16.msra.mxu0 %v3763_v54 }
  0xc9   :  { %3502 = vmatpush3.bf16.msra.mxu1 %v3764_v55  ;;  %3481 = vmatprep.subr.bf16.mxu0 %v3765_v56  ;;  %v3809_v55 = vld [vmem:[%s4714_s1 + $0x768] sm:$0xff]  }
  0xca   :  { %3503 = vmatprep.subr.bf16.mxu1 %v3766_v57 }
  0xcc   :  { %3482 = vmatpush3.bf16.msra.mxu0 %v3767_v58  ;;  %v3810_v58 = vld [vmem:[%s4714_s1 + $0x7e8] sm:$0xff]  }
  0xcd   :  { %3504 = vmatpush3.bf16.msra.mxu1 %v3768_v59  ;;  %3483 = vmatprep.subr.bf16.mxu0 %v3769_v60 }
  0xce   :  { %3505 = vmatprep.subr.bf16.mxu1 %v3770_v61  ;;  %v3811_v61 = vld [vmem:[%s4714_s1 + $0x728] sm:$0xff]  }
  0xd0   :  { %3484 = vmatpush3.bf16.msra.mxu0 %v3771_v62 }
  0xd1   :  { %3506 = vmatpush3.bf16.msra.mxu1 %v3772_v63  ;;  %3485 = vmatprep.subr.bf16.mxu0 %v3773_v0  ;;  %v3812_v63 = vld [vmem:[%s4714_s1 + $0x7a8] sm:$0xff]  }
  0xd2   :  { %3507 = vmatprep.subr.bf16.mxu1 %v3774_v1  ;;  %v3813_v1 = vld [vmem:[%s4714_s1 + $0x770] sm:$0xff]  }
  0xd4   :  { %3486 = vmatpush3.bf16.msra.mxu0 %v3775_v2  ;;  %v3814_v2 = vld [vmem:[%s4714_s1 + $0x7f0] sm:$0xff]  }
  0xd5   :  { %3508 = vmatpush3.bf16.msra.mxu1 %v3776_v3  ;;  %3487 = vmatprep.subr.bf16.mxu0 %v3777_v4  ;;  %v3815_v3 = vld [vmem:[%s4714_s1 + $0x730] sm:$0xff]  }
  0xd6   :  { %3509 = vmatprep.subr.bf16.mxu1 %v3778_v5  ;;  %v3816_v4 = vld [vmem:[%s4714_s1 + $0x7b0] sm:$0xff]   ;;  %v3817_v5 = vld [vmem:[%s4714_s1 + $0x778] sm:$0xff]  }
  0xd8   :  { %3488 = vmatpush3.bf16.msra.mxu0 %v3779_v6  ;;  %v3818_v6 = vld [vmem:[%s4714_s1 + $0x7f8] sm:$0xff]  }
  0xd9   :  { %3510 = vmatpush3.bf16.msra.mxu1 %v3780_v7  ;;  %3489 = vmatprep.subr.bf16.mxu0 %v3781_v8  ;;  %v3819_v7 = vld [vmem:[%s4714_s1 + $0x738] sm:$0xff]  }
  0xda   :  { %3511 = vmatprep.subr.bf16.mxu1 %v3782_v9  ;;  %v3820_v8 = vld [vmem:[%s4714_s1 + $0x7b8] sm:$0xff]   ;;  %v29_v9 = vld [vmem:[%s4715_s0 + $0x70] sm:$0xff] }
  0xdc   :  { %3490 = vmatpush3.bf16.msra.mxu0 %v3783_v10  ;;  %v45_v10 = vld [vmem:[%s4715_s0 + $0xf0] sm:$0xff] }
  0xdd   :  { %3512 = vmatpush3.bf16.msra.mxu1 %v3784_v11  ;;  %3491 = vmatprep.subr.bf16.mxu0 %v3785_v12  ;;  %v30_v11 = vld [vmem:[%s4715_s0 + $0x78] sm:$0xff] }
  0xde   :  { %3513 = vmatprep.subr.bf16.mxu1 %v3786_v13  ;;  %v46_v12 = vld [vmem:[%s4715_s0 + $0xf8] sm:$0xff]  ;;  %v2953_v13 = vcombine.low %v29_v9, %v45_v10 }
  0xdf   :  { %v2956_v16 = vcombine.high %v30_v11, %v46_v12 }
  0xe0   :  { %3492 = vmatpush3.bf16.msra.mxu0 %v3787_v14  ;;  %v2954_v14 = vcombine.high %v29_v9, %v45_v10 }
  0xe1   :  { %3514 = vmatpush3.bf16.msra.mxu1 %v3788_v15  ;;  %3521 = vmatprep.subr.bf16.mxu0 %v3789_v24  ;;  %v2955_v15 = vcombine.low %v30_v11, %v46_v12 }
  0xe2   :  { %3543 = vmatprep.subr.bf16.mxu1 %v3790_v25 }
  0xe3   :  { %2787 = vmatmul.mubr.bf16.vlgmr.msra.gmra.mrb[24].mxu0 %v2949_v19 }
  0xe4   :  { %2828 = vmatmul.mubr.bf16.vlgmr.msra.gmra.mrb[24].mxu1 %v2951_v22  ;;  %3522 = vmatpush3.bf16.msra.mxu0 %v3791_v26 }
  0xe5   :  { %3544 = vmatpush3.bf16.msra.mxu1 %v3792_v27  ;;  %3523 = vmatprep.subr.bf16.mxu0 %v3793_v28 }
  0xe6   :  { %3545 = vmatprep.subr.bf16.mxu1 %v3794_v29  ;;  %2868 = vmatprep.mubr.bf16.mxu0 %v2954_v14 }
  0xe7   :  { %2909 = vmatprep.mubr.bf16.mxu1 %v2956_v16 }
  0xe8   :  { %3524 = vmatpush3.bf16.msra.mxu0 %v3795_v30 }
  0xe9   :  { %3546 = vmatpush3.bf16.msra.mxu1 %v3796_v31  ;;  %3525 = vmatprep.subr.bf16.mxu0 %v3797_v32 }
  0xea   :  { %3547 = vmatprep.subr.bf16.mxu1 %v3798_v33 }
  0xec   :  { %3526 = vmatpush3.bf16.msra.mxu0 %v3799_v34 }
  0xed   :  { %3548 = vmatpush3.bf16.msra.mxu1 %v3800_v35  ;;  %3527 = vmatprep.subr.bf16.mxu0 %v3801_v36 }
  0xee   :  { %3549 = vmatprep.subr.bf16.mxu1 %v3802_v37 }
  0xf0   :  { %3528 = vmatpush3.bf16.msra.mxu0 %v3803_v39 }
  0xf1   :  { %3550 = vmatpush3.bf16.msra.mxu1 %v3804_v41  ;;  %3529 = vmatprep.subr.bf16.mxu0 %v3805_v43 }
  0xf2   :  { %3551 = vmatprep.subr.bf16.mxu1 %v3806_v46 }
  0xf4   :  { %3530 = vmatpush3.bf16.msra.mxu0 %v3807_v49 }
  0xf5   :  { %3552 = vmatpush3.bf16.msra.mxu1 %v3808_v51  ;;  %3531 = vmatprep.subr.bf16.mxu0 %v3809_v55 }
  0xf6   :  { %v3229_v38 = vpop.f32.mrb[0].mxu0  ;;  %3553 = vmatprep.subr.bf16.mxu1 %v3810_v58 }
  0xf7   :  { %v3251_v40 = vpop.f32.mrb[0].mxu1  ;;  %v3230_v42 = vpop.f32.mrb[1].mxu0 }
  0xf8   :  { %v3231_v44 = vadd.f32 %v3230_v42, %v3229_v38  ;;  %v3252_v45 = vpop.f32.mrb[1].mxu1  ;;  %v3232_v48 = vpop.f32.mrb[2].mxu0  ;;  %3532 = vmatpush3.bf16.msra.mxu0 %v3811_v61 }
  0xf9   :  { %v3253_v47 = vadd.f32 %v3252_v45, %v3251_v40  ;;  %v3254_v50 = vpop.f32.mrb[2].mxu1  ;;  %v3233_v53 = vpop.f32.mrb[3].mxu0  ;;  %3554 = vmatpush3.bf16.msra.mxu1 %v3812_v63  ;;  %3533 = vmatprep.subr.bf16.mxu0 %v3813_v1 }
  0xfa   :  { %v2297_v54 = vadd.f32 %v3231_v44, %v2924_v52  ;;  %v3234_v56 = vadd.f32 %v3233_v53, %v3232_v48  ;;  %v3255_v57 = vpop.f32.mrb[3].mxu1  ;;  %3555 = vmatprep.subr.bf16.mxu1 %v3814_v2 }
  0xfb   :  { %v3256_v59 = vadd.f32 %v3255_v57, %v3254_v50 }
  0xfc   :  { %v2338_v60 = vadd.f32 %v3253_v47, %v2297_v54  ;;  %v2300_v62 = vadd.f32 %v3234_v56, %v2924_v52  ;;  %3534 = vmatpush3.bf16.msra.mxu0 %v3815_v3 }
  0xfd   :  { %3556 = vmatpush3.bf16.msra.mxu1 %v3816_v4  ;;  %3535 = vmatprep.subr.bf16.mxu0 %v3817_v5 }
  0xfe   :  { %v2341_v0 = vadd.f32 %v3256_v59, %v2300_v62  ;;  %3557 = vmatprep.subr.bf16.mxu1 %v3818_v6 }
 0x100   :  { %3536 = vmatpush3.bf16.msra.mxu0 %v3819_v7 }
 0x101   :  { %3558 = vmatpush3.bf16.msra.mxu1 %v3820_v8 }
 0x103   :  { %2869 = vmatmul.mubr.bf16.vlgmr.msra.gmra.mrb[28].mxu0 %v2953_v13 }
 0x104   :  { %2910 = vmatmul.mubr.bf16.vlgmr.msra.gmra.mrb[28].mxu1 %v2955_v15 }
 0x116   :  { %v3273_v17 = vpop.f32.mrb[4].mxu0 }
 0x117   :  { %v3295_v18 = vpop.f32.mrb[4].mxu1  ;;  %v3274_v19 = vpop.f32.mrb[5].mxu0 }
 0x118   :  { %v3275_v20 = vadd.f32 %v3274_v19, %v3273_v17  ;;  %v3296_v21 = vpop.f32.mrb[5].mxu1  ;;  %v3276_v22 = vpop.f32.mrb[6].mxu0 }
 0x119   :  { %v3297_v23 = vadd.f32 %v3296_v21, %v3295_v18  ;;  %v3298_v24 = vpop.f32.mrb[6].mxu1  ;;  %v3277_v25 = vpop.f32.mrb[7].mxu0 }
 0x11a   :  { %v2379_v26 = vadd.f32 %v3275_v20, %v2338_v60  ;;  %v3278_v27 = vadd.f32 %v3277_v25, %v3276_v22  ;;  %v3299_v28 = vpop.f32.mrb[7].mxu1 }
 0x11b   :  { %v3300_v29 = vadd.f32 %v3299_v28, %v3298_v24 }
 0x11c   :  { %v2420_v30 = vadd.f32 %v3297_v23, %v2379_v26  ;;  %v2382_v31 = vadd.f32 %v3278_v27, %v2341_v0 }
 0x11e   :  { %v2423_v32 = vadd.f32 %v3300_v29, %v2382_v31 }
 0x136   :  { %v3317_v33 = vpop.f32.mrb[8].mxu0 }
 0x137   :  { %v3339_v34 = vpop.f32.mrb[8].mxu1  ;;  %v3318_v35 = vpop.f32.mrb[9].mxu0 }
 0x138   :  { %v3340_v36 = vpop.f32.mrb[9].mxu1  ;;  %v3319_v37 = vadd.f32 %v3318_v35, %v3317_v33  ;;  %v3320_v39 = vpop.f32.mrb[10].mxu0 }
 0x139   :  { %v3341_v38 = vadd.f32 %v3340_v36, %v3339_v34  ;;  %v3342_v40 = vpop.f32.mrb[10].mxu1  ;;  %v3321_v41 = vpop.f32.mrb[11].mxu0 }
 0x13a   :  { %v3343_v42 = vpop.f32.mrb[11].mxu1  ;;  %v2461_v43 = vadd.f32 %v3319_v37, %v2420_v30  ;;  %v3322_v44 = vadd.f32 %v3321_v41, %v3320_v39 }
 0x13b   :  { %v3344_v45 = vadd.f32 %v3343_v42, %v3342_v40 }
 0x13c   :  { %v2502_v46 = vadd.f32 %v3341_v38, %v2461_v43  ;;  %v2464_v47 = vadd.f32 %v3322_v44, %v2423_v32 }
 0x13e   :  { %v2505_v48 = vadd.f32 %v3344_v45, %v2464_v47 }
 0x156   :  { %v3361_v49 = vpop.f32.mrb[12].mxu0 }
 0x157   :  { %v3383_v50 = vpop.f32.mrb[12].mxu1  ;;  %v3362_v51 = vpop.f32.mrb[13].mxu0 }
 0x158   :  { %v3363_v52 = vadd.f32 %v3362_v51, %v3361_v49  ;;  %v3384_v53 = vpop.f32.mrb[13].mxu1  ;;  %v3364_v54 = vpop.f32.mrb[14].mxu0 }
 0x159   :  { %v3385_v55 = vadd.f32 %v3384_v53, %v3383_v50  ;;  %v3386_v56 = vpop.f32.mrb[14].mxu1  ;;  %v3365_v57 = vpop.f32.mrb[15].mxu0 }
 0x15a   :  { %v2543_v58 = vadd.f32 %v3363_v52, %v2502_v46  ;;  %v3366_v59 = vadd.f32 %v3365_v57, %v3364_v54  ;;  %v3387_v60 = vpop.f32.mrb[15].mxu1 }
 0x15b   :  { %v3388_v61 = vadd.f32 %v3387_v60, %v3386_v56 }
 0x15c   :  { %v2584_v62 = vadd.f32 %v3385_v55, %v2543_v58  ;;  %v2546_v63 = vadd.f32 %v3366_v59, %v2505_v48 }
 0x15e   :  { %v2587_v0 = vadd.f32 %v3388_v61, %v2546_v63 }
 0x176   :  { %v3405_v1 = vpop.f32.mrb[16].mxu0 }
 0x177   :  { %v3427_v2 = vpop.f32.mrb[16].mxu1  ;;  %v3406_v3 = vpop.f32.mrb[17].mxu0 }
 0x178   :  { %v3407_v4 = vadd.f32 %v3406_v3, %v3405_v1  ;;  %v3428_v5 = vpop.f32.mrb[17].mxu1  ;;  %v3408_v6 = vpop.f32.mrb[18].mxu0 }
 0x179   :  { %v3429_v7 = vadd.f32 %v3428_v5, %v3427_v2  ;;  %v3430_v8 = vpop.f32.mrb[18].mxu1  ;;  %v3409_v9 = vpop.f32.mrb[19].mxu0 }
 0x17a   :  { %v2625_v10 = vadd.f32 %v3407_v4, %v2584_v62  ;;  %v3410_v11 = vadd.f32 %v3409_v9, %v3408_v6  ;;  %v3431_v12 = vpop.f32.mrb[19].mxu1 }
 0x17b   :  { %v3432_v13 = vadd.f32 %v3431_v12, %v3430_v8 }
 0x17c   :  { %v2666_v14 = vadd.f32 %v3429_v7, %v2625_v10  ;;  %v2628_v15 = vadd.f32 %v3410_v11, %v2587_v0 }
 0x17e   :  { %v2669_v16 = vadd.f32 %v3432_v13, %v2628_v15 }
 0x196   :  { %v3449_v17 = vpop.f32.mrb[20].mxu0 }
 0x197   :  { %v3471_v18 = vpop.f32.mrb[20].mxu1  ;;  %v3450_v19 = vpop.f32.mrb[21].mxu0 }
 0x198   :  { %v3472_v20 = vpop.f32.mrb[21].mxu1  ;;  %v3451_v21 = vadd.f32 %v3450_v19, %v3449_v17  ;;  %v3452_v23 = vpop.f32.mrb[22].mxu0 }
 0x199   :  { %v3473_v22 = vadd.f32 %v3472_v20, %v3471_v18  ;;  %v3474_v24 = vpop.f32.mrb[22].mxu1  ;;  %v3453_v25 = vpop.f32.mrb[23].mxu0 }
 0x19a   :  { %v3475_v26 = vpop.f32.mrb[23].mxu1  ;;  %v2707_v27 = vadd.f32 %v3451_v21, %v2666_v14  ;;  %v3454_v28 = vadd.f32 %v3453_v25, %v3452_v23 }
 0x19b   :  { %v3476_v29 = vadd.f32 %v3475_v26, %v3474_v24 }
 0x19c   :  { %v2748_v30 = vadd.f32 %v3473_v22, %v2707_v27  ;;  %v2710_v31 = vadd.f32 %v3454_v28, %v2669_v16 }
 0x19e   :  { %v2751_v32 = vadd.f32 %v3476_v29, %v2710_v31 }
 0x1b6   :  { %v3493_v33 = vpop.f32.mrb[24].mxu0 }
 0x1b7   :  { %v3515_v34 = vpop.f32.mrb[24].mxu1  ;;  %v3494_v35 = vpop.f32.mrb[25].mxu0 }
 0x1b8   :  { %v3495_v36 = vadd.f32 %v3494_v35, %v3493_v33  ;;  %v3516_v37 = vpop.f32.mrb[25].mxu1  ;;  %v3496_v38 = vpop.f32.mrb[26].mxu0 }
 0x1b9   :  { %v3517_v39 = vadd.f32 %v3516_v37, %v3515_v34  ;;  %v3518_v40 = vpop.f32.mrb[26].mxu1  ;;  %v3497_v41 = vpop.f32.mrb[27].mxu0 }
 0x1ba   :  { %v2789_v42 = vadd.f32 %v3495_v36, %v2748_v30  ;;  %v3498_v43 = vadd.f32 %v3497_v41, %v3496_v38  ;;  %v3519_v44 = vpop.f32.mrb[27].mxu1 }
 0x1bb   :  { %v3520_v45 = vadd.f32 %v3519_v44, %v3518_v40 }
 0x1bc   :  { %v2830_v46 = vadd.f32 %v3517_v39, %v2789_v42  ;;  %v2792_v47 = vadd.f32 %v3498_v43, %v2751_v32 }
 0x1be   :  { %v2833_v48 = vadd.f32 %v3520_v45, %v2792_v47 }
 0x1d6   :  { %v3537_v49 = vpop.f32.mrb[28].mxu0 }
 0x1d7   :  { %v3559_v50 = vpop.f32.mrb[28].mxu1  ;;  %v3538_v51 = vpop.f32.mrb[29].mxu0 }
 0x1d8   :  { %v3560_v52 = vpop.f32.mrb[29].mxu1  ;;  %v3539_v53 = vadd.f32 %v3538_v51, %v3537_v49  ;;  %v3540_v55 = vpop.f32.mrb[30].mxu0 }
 0x1d9   :  { %v3561_v54 = vadd.f32 %v3560_v52, %v3559_v50  ;;  %v3562_v56 = vpop.f32.mrb[30].mxu1  ;;  %v3541_v57 = vpop.f32.mrb[31].mxu0 }
 0x1da   :  { %v3563_v58 = vpop.f32.mrb[31].mxu1  ;;  %v2871_v59 = vadd.f32 %v3539_v53, %v2830_v46  ;;  %v3542_v60 = vadd.f32 %v3541_v57, %v3540_v55 }
 0x1db   :  { %v3564_v61 = vadd.f32 %v3563_v58, %v3562_v56 }
 0x1dc   :  { %v2912_v62 = vadd.f32 %v3561_v54, %v2871_v59  ;;  %v2874_v63 = vadd.f32 %v3542_v60, %v2833_v48 }
 0x1de   :  { %2918 = vst [vmem:[%s4717_s3] sm:$0xff] %v2912_v62  ;;  %v2915_v0 = vadd.f32 %v3564_v61, %v2874_v63 }
 0x1e0   :  { %2919 = vst [vmem:[%s4717_s3 + $0x8] sm:$0xff] %v2915_v0 }

</bundles_post_ra>
